<compile_context>
chip_gen: v7x
topology: tpu7x:2x2x1
jax: 0.10.0
libtpu: 0.0.40
codegen_flags: <defaults>
</compile_context>

<pallas_src>
import math

import jax
import jax.numpy as jnp
from jax.experimental import pallas as pl
from jax.experimental.pallas import tpu as pltpu

_TARGET_ROWS = 512  # aim for ~256-512 matmul rows (M = TB*H) per grid step


# ---------------------------------------------------------------------------
# Kernel 1: fused 3x(conv + BN + ReLU) + per-merged-row sum over H
# ---------------------------------------------------------------------------
def _make_fused_kernel(H):
    def kernel(x_ref, w1_ref, s1_ref, b1_ref,
               w2_ref, s2_ref, b2_ref,
               w3_ref, s3_ref, b3_ref,
               pool_ref, o_ref):
        # x_ref:    (M, K1*C_in)  bf16   im2col'ed layer-1 input, M = TB*H rows
        # w1_ref:   (K1*C_in, C1) bf16
        # w2_ref:   (K2, C1, C2)  bf16   w3_ref: (K3, C2, C3) bf16
        # s*/b*:    (1, C)        f32    fused BN scale / bias
        # pool_ref: (TB, M)       f32    0/1 row -> merged-row pooling matrix
        # o_ref:    (TB, C3)      f32    per merged-row sum over H of features
        M = x_ref.shape[0]
        # h position of each flat row inside its merged row (rows are (b, h)).
        hh = jax.lax.broadcasted_iota(jnp.int32, (M, 1), 0) % H

        def bn_relu(acc, s_ref, b_ref):
            # f32 epilogue on the f32 accumulator (safe on v5e too).
            return jnp.maximum(acc * s_ref[...] + b_ref[...], 0.0)

        def conv_taps(act_f32, w_ref):
            # "same" 1-D conv over H as K shifted bf16 matmuls, f32 accum.
            # Shifts are pltpu.roll along the row axis (XLU); rows that would
            # read across a sample's H boundary (or wrap the tile) are masked.
            K = w_ref.shape[0]
            pad = (K - 1) // 2
            # init accumulator with the center tap (no zeros + extra add)
            acc = jnp.dot(act_f32.astype(jnp.bfloat16), w_ref[pad],
                          preferred_element_type=jnp.float32)
            for t in range(K):            # K is 3 or 5 -> fully unrolled
                d = t - pad
                if d == 0:
                    continue
                rolled = pltpu.roll(act_f32, shift=(-d) % M, axis=0)
                valid = jnp.logical_and(hh >= -d, hh < H - d)
                tap = jnp.where(valid, rolled, 0.0).astype(jnp.bfloat16)
                acc = acc + jnp.dot(tap, w_ref[t],
                                    preferred_element_type=jnp.float32)
            return acc

        # layer 1: im2col already folded -> one matmul, contraction K1*C_in
        a1 = bn_relu(jnp.dot(x_ref[...], w1_ref[...],
                             preferred_element_type=jnp.float32),
                     s1_ref, b1_ref)                           # (M, C1) f32
        a2 = bn_relu(conv_taps(a1, w2_ref), s2_ref, b2_ref)    # (M, C2) f32
        a3 = bn_relu(conv_taps(a2, w3_ref), s3_ref, b3_ref)    # (M, C3) f32
        # per merged-row sum over H done on the MXU via the pooling matrix
        o_ref[...] = jnp.dot(pool_ref[...], a3,
                             preferred_element_type=jnp.float32).astype(o_ref.dtype)

    return kernel


def fused_conv_stack(patches_flat, params, tb, H):
    # patches_flat: (B_pad*H, K1*C_in) bf16
    M_total, KC = patches_flat.shape
    B_pad = M_total // H
    num_tiles = B_pad // tb
    m_tile = tb * H

    (w1, s1, b1), (w2, s2, b2), (w3, s3, b3) = params["convs"]
    K1, C_in, C1 = w1.shape
    K2, _, C2 = w2.shape
    K3, _, C3 = w3.shape

    w1f = w1.reshape(K1 * C_in, C1).astype(jnp.bfloat16)
    w2b = w2.astype(jnp.bfloat16)
    w3b = w3.astype(jnp.bfloat16)

    # 0/1 pooling matrix: pool[b, r] = 1 iff flat row r of the tile belongs to
    # merged row b (flat rows are laid out (merged_row, h)).
    row_of = jax.lax.broadcasted_iota(jnp.int32, (tb, m_tile), 1) // H
    b_of = jax.lax.broadcasted_iota(jnp.int32, (tb, m_tile), 0)
    pool = (row_of == b_of).astype(jnp.float32)

    kernel = _make_fused_kernel(H)
    const2 = lambda i: (0, 0)
    const3 = lambda i: (0, 0, 0)
    return pl.pallas_call(
        kernel,
        out_shape=jax.ShapeDtypeStruct((B_pad, C3), jnp.float32),
        grid_spec=pltpu.PrefetchScalarGridSpec(
            num_scalar_prefetch=0,
            grid=(num_tiles,),
            in_specs=[
                pl.BlockSpec((m_tile, KC), lambda i: (i, 0)),
                pl.BlockSpec((K1 * C_in, C1), const2),
                pl.BlockSpec((1, C1), const2),
                pl.BlockSpec((1, C1), const2),
                pl.BlockSpec((K2, C1, C2), const3),
                pl.BlockSpec((1, C2), const2),
                pl.BlockSpec((1, C2), const2),
                pl.BlockSpec((K3, C2, C3), const3),
                pl.BlockSpec((1, C3), const2),
                pl.BlockSpec((1, C3), const2),
                pl.BlockSpec((tb, m_tile), const2),
            ],
            out_specs=pl.BlockSpec((tb, C3), lambda i: (i, 0)),
        ),
        compiler_params=pltpu.CompilerParams(dimension_semantics=("parallel",)),
    )(patches_flat, w1f,
      s1.reshape(1, C1), b1.reshape(1, C1),
      w2b, s2.reshape(1, C2), b2.reshape(1, C2),
      w3b, s3.reshape(1, C3), b3.reshape(1, C3),
      pool)


# ---------------------------------------------------------------------------
# Kernel 2: head = global average pool over (H, W) + Linear (single grid step)
# ---------------------------------------------------------------------------
def head_kernel(pool_ref, rs_ref, w_ref, b_ref, o_ref):
    # pool_ref: (N, B_pad) f32 with 1/(H*W) on the rows belonging to sample n
    # rs_ref:   (B_pad, C) f32 per merged-row H-sums
    pooled = jnp.dot(pool_ref[...], rs_ref[...],
                     preferred_element_type=jnp.float32)          # (N, C)
    o_ref[...] = (jnp.dot(pooled, w_ref[...],
                          preferred_element_type=jnp.float32)
                  + b_ref[...]).astype(o_ref.dtype)


def head_call(rowsum, pool_n, fc_w, fc_b):
    N = pool_n.shape[0]
    ncls = fc_w.shape[1]
    return pl.pallas_call(
        head_kernel,
        out_shape=jax.ShapeDtypeStruct((N, ncls), jnp.float32),
        grid_spec=pltpu.PrefetchScalarGridSpec(
            num_scalar_prefetch=0,
            grid=(1,),
            in_specs=[
                pl.BlockSpec(pool_n.shape, lambda i: (0, 0)),
                pl.BlockSpec(rowsum.shape, lambda i: (0, 0)),
                pl.BlockSpec(fc_w.shape, lambda i: (0, 0)),
                pl.BlockSpec((1, ncls), lambda i: (0, 0)),
            ],
            out_specs=pl.BlockSpec((N, ncls), lambda i: (0, 0)),
        ),
        compiler_params=pltpu.CompilerParams(dimension_semantics=("arbitrary",)),
    )(pool_n, rowsum, fc_w, fc_b.reshape(1, ncls))


# ---------------------------------------------------------------------------
# Full forward pass
# ---------------------------------------------------------------------------
def fcn_net(x_nchw, params):
    N, C_in, H, W = x_nchw.shape
    B = N * W
    w1 = params["convs"][0][0]
    K1 = w1.shape[0]
    pad1 = (K1 - 1) // 2

    # NCHW -> (N, W, H, C) -> merged rows (N*W, H, C); conv is 1-D over H.
    x = jnp.transpose(x_nchw, (0, 3, 2, 1)).reshape(B, H, C_in)

    # Host-side im2col for the tiny first layer: (B, H, C_in) -> (B, H, K1*C_in)
    # so layer 1 becomes a single matmul with contraction K1*C_in (=28)
    # instead of K1 matmuls with contraction C_in (=4).
    xp = jnp.pad(x, ((0, 0), (pad1, pad1), (0, 0)))
    patches = jnp.concatenate([xp[:, t:t + H, :] for t in range(K1)], axis=-1)

    # Batch tiling: TB merged rows per grid step -> M = TB*H matmul rows.
    tb = max(1, _TARGET_ROWS // H)
    tb = min(tb, pl.cdiv(B, 2))        # keep >= 2 grid steps when possible (v7x: 2 TCs)
    tb = max(8, 8 * ((tb + 7) // 8))   # 8-aligned block rows
    num_tiles = pl.cdiv(B, tb)
    B_pad = num_tiles * tb
    if B_pad != B:
        patches = jnp.pad(patches, ((0, B_pad - B), (0, 0), (0, 0)))
    patches_flat = patches.reshape(B_pad * H, K1 * C_in).astype(jnp.bfloat16)

    rowsum = fused_conv_stack(patches_flat, params, tb, H)   # (B_pad, 128) f32

    # Head: mean over (H, W) + Linear. Padded merged rows get zero weight
    # automatically since their index // W >= N.
    r_idx = jax.lax.broadcasted_iota(jnp.int32, (N, B_pad), 1)
    n_idx = jax.lax.broadcasted_iota(jnp.int32, (N, B_pad), 0)
    pool_n = jnp.where(r_idx // W == n_idx, 1.0 / (H * W), 0.0).astype(jnp.float32)
    return head_call(rowsum, pool_n, params["fc_w"], params["fc_b"])


# ---------------------------------------------------------------------------
# Deterministic parameter construction (mirrors FCNNet.__init__ shapes)
# ---------------------------------------------------------------------------
def init_params(key, in_channels, n_classes):
    ks = jax.random.split(key, 16)
    eps = 1e-5

    def conv_w(k, K, cin, cout):
        fan_in = cin * K
        return jax.random.normal(k, (K, cin, cout), jnp.float32) / math.sqrt(fan_in)

    def bn_affine(kg, kb, c):
        gamma = 1.0 + 0.1 * jax.random.normal(kg, (c,), jnp.float32)
        beta = 0.1 * jax.random.normal(kb, (c,), jnp.float32)
        running_mean = jnp.zeros((c,), jnp.float32)
        running_var = jnp.ones((c,), jnp.float32)
        # TODO(synk): PyTorch default is train-mode BN (batch stats); eval-mode
        # (running stats) is implemented here, fused as per-channel affine.
        scale = gamma * jax.lax.rsqrt(running_var + eps)
        bias = beta - running_mean * scale
        return scale, bias

    convs = []
    layer_defs = [(7, in_channels, 128), (5, 128, 256), (3, 256, 128)]
    for i, (K, cin, cout) in enumerate(layer_defs):
        w = conv_w(ks[3 * i], K, cin, cout)
        scale, bias = bn_affine(ks[3 * i + 1], ks[3 * i + 2], cout)
        convs.append((w, scale, bias))

    fc_w = jax.random.normal(ks[9], (128, n_classes), jnp.float32) / math.sqrt(128.0)
    fc_b = 0.01 * jax.random.normal(ks[10], (n_classes,), jnp.float32)
    return {"convs": convs, "fc_w": fc_w, "fc_b": fc_b}


# ---------------------------------------------------------------------------
# Pure-JAX reference (NCHW, same precision policy) for the correctness check
# ---------------------------------------------------------------------------
def fcn_net_ref(x_nchw, params):
    x = x_nchw.astype(jnp.bfloat16)
    y = None
    for (w, scale, bias) in params["convs"]:
        K = w.shape[0]
        pad = (K - 1) // 2
        w_oihw = jnp.transpose(w, (2, 1, 0))[..., None].astype(jnp.bfloat16)
        y = jax.lax.conv_general_dilated(
            x, w_oihw, window_strides=(1, 1),
            padding=((pad, pad), (0, 0)),
            dimension_numbers=("NCHW", "OIHW", "NCHW"),
            preferred_element_type=jnp.float32)
        y = jnp.maximum(y * scale[None, :, None, None] + bias[None, :, None, None], 0.0)
        x = y.astype(jnp.bfloat16)
    pooled = jnp.mean(y, axis=(2, 3))   # (N, 128) f32
    return pooled @ params["fc_w"] + params["fc_b"]


if __name__ == "__main__":
    key = jax.random.PRNGKey(0)
    k_x, k_p = jax.random.split(key)

    in_channels, n_classes = 4, 10
    N, H, W = 2, 16, 16
    x = jax.random.normal(k_x, (N, in_channels, H, W), jnp.float32)
    params = init_params(k_p, in_channels, n_classes)

    out = jax.block_until_ready(fcn_net(x, params))
    ref = jax.block_until_ready(fcn_net_ref(x, params))

    assert out.shape == (N, n_classes), out.shape
    assert jnp.allclose(out, ref, atol=1e-2, rtol=1e-2), (out, ref)

    print("KERNEL_OK")
</pallas_src>

<mosaic_0001>
module attributes {stable_mosaic.version = 11 : i64} {
  func.func @kernel(%arg0: i32, %arg1: memref<256x28xbf16, #tpu.memory_space<vmem>>, %arg2: memref<28x128xbf16, #tpu.memory_space<vmem>>, %arg3: memref<1x128xf32, #tpu.memory_space<vmem>>, %arg4: memref<1x128xf32, #tpu.memory_space<vmem>>, %arg5: memref<5x128x256xbf16, #tpu.memory_space<vmem>>, %arg6: memref<1x256xf32, #tpu.memory_space<vmem>>, %arg7: memref<1x256xf32, #tpu.memory_space<vmem>>, %arg8: memref<3x256x128xbf16, #tpu.memory_space<vmem>>, %arg9: memref<1x128xf32, #tpu.memory_space<vmem>>, %arg10: memref<1x128xf32, #tpu.memory_space<vmem>>, %arg11: memref<16x256xf32, #tpu.memory_space<vmem>>, %arg12: memref<16x128xf32, #tpu.memory_space<vmem>>) attributes {dimension_semantics = [#tpu.dimension_semantics<parallel>], iteration_bounds = array<i64: 2>, scalar_prefetch = 0 : i64, scratch_operands = 0 : i64, tpu.core_type = #tpu.core_type<tc>, window_params = [{transform_indices = @transform_0, window_bounds = array<i64: 256, 28>}, {pipeline_mode = #tpu.pipeline_mode<synchronous>, transform_indices = @transform_1, window_bounds = array<i64: 28, 128>}, {pipeline_mode = #tpu.pipeline_mode<synchronous>, transform_indices = @transform_2, window_bounds = array<i64: 1, 128>}, {pipeline_mode = #tpu.pipeline_mode<synchronous>, transform_indices = @transform_3, window_bounds = array<i64: 1, 128>}, {pipeline_mode = #tpu.pipeline_mode<synchronous>, transform_indices = @transform_4, window_bounds = array<i64: 5, 128, 256>}, {pipeline_mode = #tpu.pipeline_mode<synchronous>, transform_indices = @transform_5, window_bounds = array<i64: 1, 256>}, {pipeline_mode = #tpu.pipeline_mode<synchronous>, transform_indices = @transform_6, window_bounds = array<i64: 1, 256>}, {pipeline_mode = #tpu.pipeline_mode<synchronous>, transform_indices = @transform_7, window_bounds = array<i64: 3, 256, 128>}, {pipeline_mode = #tpu.pipeline_mode<synchronous>, transform_indices = @transform_8, window_bounds = array<i64: 1, 128>}, {pipeline_mode = #tpu.pipeline_mode<synchronous>, transform_indices = @transform_9, window_bounds = array<i64: 1, 128>}, {pipeline_mode = #tpu.pipeline_mode<synchronous>, transform_indices = @transform_10, window_bounds = array<i64: 16, 256>}, {transform_indices = @transform_11, window_bounds = array<i64: 16, 128>}]} {
    %0 = tpu.iota {dimensions = array<i32: 0>} : vector<256x1xi32>
    %c16_i32 = arith.constant 16 : i32
    %c0_i32 = arith.constant 0 : i32
    %1 = arith.cmpi eq, %c16_i32, %c0_i32 : i32
    %c1_i32 = arith.constant 1 : i32
    %2 = arith.select %1, %c1_i32, %c16_i32 : i32
    %3 = vector.broadcast %2 : i32 to vector<256x1xi32>
    %4 = arith.remsi %0, %3 : vector<256x1xi32>
    %c0_i32_0 = arith.constant 0 : i32
    %5 = vector.broadcast %c0_i32_0 : i32 to vector<256x1xi32>
    %6 = arith.cmpi ne, %4, %5 : vector<256x1xi32>
    %c0_i32_1 = arith.constant 0 : i32
    %7 = vector.broadcast %c0_i32_1 : i32 to vector<256x1xi32>
    %8 = arith.cmpi slt, %4, %7 : vector<256x1xi32>
    %c0_i32_2 = arith.constant 0 : i32
    %9 = arith.cmpi slt, %2, %c0_i32_2 : i32
    %10 = vector.broadcast %9 : i1 to vector<256x1xi1>
    %11 = vector.broadcast %10 : vector<256x1xi1> to vector<256x1xi1>
    %12 = arith.xori %8, %11 : vector<256x1xi1>
    %13 = arith.andi %12, %6 : vector<256x1xi1>
    %14 = vector.broadcast %2 : i32 to vector<256x1xi32>
    %15 = arith.addi %4, %14 : vector<256x1xi32>
    %16 = arith.select %13, %15, %4 : vector<256x1xi1>, vector<256x1xi32>
    %c0 = arith.constant 0 : index
    %c0_3 = arith.constant 0 : index
    %17 = vector.load %arg1[%c0, %c0_3] : memref<256x28xbf16, #tpu.memory_space<vmem>>, vector<256x28xbf16>
    %c0_4 = arith.constant 0 : index
    %c0_5 = arith.constant 0 : index
    %18 = vector.load %arg2[%c0_4, %c0_5] : memref<28x128xbf16, #tpu.memory_space<vmem>>, vector<28x128xbf16>
    %cst = arith.constant dense<0.000000e+00> : vector<256x128xf32>
    %19 = tpu.matmul %17, %18, %cst {dimension_numbers = #tpu.dot_dimension_numbers<[1], [0], [0], [1], [0, 0, 1, 1], [], []>} : vector<256x28xbf16>, vector<28x128xbf16>, vector<256x128xf32> -> vector<256x128xf32>
    %c0_6 = arith.constant 0 : index
    %c0_7 = arith.constant 0 : index
    %20 = vector.load %arg3[%c0_6, %c0_7] : memref<1x128xf32, #tpu.memory_space<vmem>>, vector<1x128xf32>
    %21 = vector.broadcast %20 : vector<1x128xf32> to vector<256x128xf32>
    %22 = arith.mulf %19, %21 : vector<256x128xf32>
    %c0_8 = arith.constant 0 : index
    %c0_9 = arith.constant 0 : index
    %23 = vector.load %arg4[%c0_8, %c0_9] : memref<1x128xf32, #tpu.memory_space<vmem>>, vector<1x128xf32>
    %24 = vector.broadcast %23 : vector<1x128xf32> to vector<256x128xf32>
    %25 = arith.addf %22, %24 : vector<256x128xf32>
    %cst_10 = arith.constant 0.000000e+00 : f32
    %26 = vector.broadcast %cst_10 : f32 to vector<256x128xf32>
    %27 = arith.maximumf %25, %26 : vector<256x128xf32>
    %28 = arith.truncf %27 : vector<256x128xf32> to vector<256x128xbf16>
    %c2 = arith.constant 2 : index
    %c0_11 = arith.constant 0 : index
    %c0_12 = arith.constant 0 : index
    %29 = vector.load %arg5[%c2, %c0_11, %c0_12] : memref<5x128x256xbf16, #tpu.memory_space<vmem>>, vector<1x128x256xbf16>
    %30 = vector.shape_cast %29 : vector<1x128x256xbf16> to vector<128x256xbf16>
    %cst_13 = arith.constant dense<0.000000e+00> : vector<256x256xf32>
    %31 = tpu.matmul %28, %30, %cst_13 {dimension_numbers = #tpu.dot_dimension_numbers<[1], [0], [0], [1], [0, 0, 1, 1], [], []>} : vector<256x128xbf16>, vector<128x256xbf16>, vector<256x256xf32> -> vector<256x256xf32>
    %c2_i32 = arith.constant 2 : i32
    %32 = tpu.dynamic_rotate %27 by %c2_i32 dim 0 : vector<256x128xf32>, i32 -> vector<256x128xf32>
    %c2_i32_14 = arith.constant 2 : i32
    %33 = vector.broadcast %c2_i32_14 : i32 to vector<256x1xi32>
    %34 = arith.cmpi sge, %16, %33 : vector<256x1xi32>
    %c18_i32 = arith.constant 18 : i32
    %35 = vector.broadcast %c18_i32 : i32 to vector<256x1xi32>
    %36 = arith.cmpi slt, %16, %35 : vector<256x1xi32>
    %37 = arith.andi %34, %36 : vector<256x1xi1>
    %cst_15 = arith.constant 0.000000e+00 : f32
    %38 = vector.shape_cast %37 : vector<256x1xi1> to vector<256x1xi1>
    %39 = vector.broadcast %38 : vector<256x1xi1> to vector<256x128xi1>
    %40 = vector.broadcast %cst_15 : f32 to vector<256x128xf32>
    %41 = arith.select %39, %32, %40 : vector<256x128xi1>, vector<256x128xf32>
    %42 = arith.truncf %41 : vector<256x128xf32> to vector<256x128xbf16>
    %c0_16 = arith.constant 0 : index
    %c0_17 = arith.constant 0 : index
    %c0_18 = arith.constant 0 : index
    %43 = vector.load %arg5[%c0_16, %c0_17, %c0_18] : memref<5x128x256xbf16, #tpu.memory_space<vmem>>, vector<1x128x256xbf16>
    %44 = vector.shape_cast %43 : vector<1x128x256xbf16> to vector<128x256xbf16>
    %cst_19 = arith.constant dense<0.000000e+00> : vector<256x256xf32>
    %45 = tpu.matmul %42, %44, %cst_19 {dimension_numbers = #tpu.dot_dimension_numbers<[1], [0], [0], [1], [0, 0, 1, 1], [], []>} : vector<256x128xbf16>, vector<128x256xbf16>, vector<256x256xf32> -> vector<256x256xf32>
    %46 = arith.addf %31, %45 : vector<256x256xf32>
    %c1_i32_20 = arith.constant 1 : i32
    %47 = tpu.dynamic_rotate %27 by %c1_i32_20 dim 0 : vector<256x128xf32>, i32 -> vector<256x128xf32>
    %c1_i32_21 = arith.constant 1 : i32
    %48 = vector.broadcast %c1_i32_21 : i32 to vector<256x1xi32>
    %49 = arith.cmpi sge, %16, %48 : vector<256x1xi32>
    %c17_i32 = arith.constant 17 : i32
    %50 = vector.broadcast %c17_i32 : i32 to vector<256x1xi32>
    %51 = arith.cmpi slt, %16, %50 : vector<256x1xi32>
    %52 = arith.andi %49, %51 : vector<256x1xi1>
    %cst_22 = arith.constant 0.000000e+00 : f32
    %53 = vector.shape_cast %52 : vector<256x1xi1> to vector<256x1xi1>
    %54 = vector.broadcast %53 : vector<256x1xi1> to vector<256x128xi1>
    %55 = vector.broadcast %cst_22 : f32 to vector<256x128xf32>
    %56 = arith.select %54, %47, %55 : vector<256x128xi1>, vector<256x128xf32>
    %57 = arith.truncf %56 : vector<256x128xf32> to vector<256x128xbf16>
    %c1 = arith.constant 1 : index
    %c0_23 = arith.constant 0 : index
    %c0_24 = arith.constant 0 : index
    %58 = vector.load %arg5[%c1, %c0_23, %c0_24] : memref<5x128x256xbf16, #tpu.memory_space<vmem>>, vector<1x128x256xbf16>
    %59 = vector.shape_cast %58 : vector<1x128x256xbf16> to vector<128x256xbf16>
    %cst_25 = arith.constant dense<0.000000e+00> : vector<256x256xf32>
    %60 = tpu.matmul %57, %59, %cst_25 {dimension_numbers = #tpu.dot_dimension_numbers<[1], [0], [0], [1], [0, 0, 1, 1], [], []>} : vector<256x128xbf16>, vector<128x256xbf16>, vector<256x256xf32> -> vector<256x256xf32>
    %61 = arith.addf %46, %60 : vector<256x256xf32>
    %c255_i32 = arith.constant 255 : i32
    %62 = tpu.dynamic_rotate %27 by %c255_i32 dim 0 : vector<256x128xf32>, i32 -> vector<256x128xf32>
    %c-1_i32 = arith.constant -1 : i32
    %63 = vector.broadcast %c-1_i32 : i32 to vector<256x1xi32>
    %64 = arith.cmpi sge, %16, %63 : vector<256x1xi32>
    %c15_i32 = arith.constant 15 : i32
    %65 = vector.broadcast %c15_i32 : i32 to vector<256x1xi32>
    %66 = arith.cmpi slt, %16, %65 : vector<256x1xi32>
    %67 = arith.andi %64, %66 : vector<256x1xi1>
    %cst_26 = arith.constant 0.000000e+00 : f32
    %68 = vector.shape_cast %67 : vector<256x1xi1> to vector<256x1xi1>
    %69 = vector.broadcast %68 : vector<256x1xi1> to vector<256x128xi1>
    %70 = vector.broadcast %cst_26 : f32 to vector<256x128xf32>
    %71 = arith.select %69, %62, %70 : vector<256x128xi1>, vector<256x128xf32>
    %72 = arith.truncf %71 : vector<256x128xf32> to vector<256x128xbf16>
    %c3 = arith.constant 3 : index
    %c0_27 = arith.constant 0 : index
    %c0_28 = arith.constant 0 : index
    %73 = vector.load %arg5[%c3, %c0_27, %c0_28] : memref<5x128x256xbf16, #tpu.memory_space<vmem>>, vector<1x128x256xbf16>
    %74 = vector.shape_cast %73 : vector<1x128x256xbf16> to vector<128x256xbf16>
    %cst_29 = arith.constant dense<0.000000e+00> : vector<256x256xf32>
    %75 = tpu.matmul %72, %74, %cst_29 {dimension_numbers = #tpu.dot_dimension_numbers<[1], [0], [0], [1], [0, 0, 1, 1], [], []>} : vector<256x128xbf16>, vector<128x256xbf16>, vector<256x256xf32> -> vector<256x256xf32>
    %76 = arith.addf %61, %75 : vector<256x256xf32>
    %c254_i32 = arith.constant 254 : i32
    %77 = tpu.dynamic_rotate %27 by %c254_i32 dim 0 : vector<256x128xf32>, i32 -> vector<256x128xf32>
    %c-2_i32 = arith.constant -2 : i32
    %78 = vector.broadcast %c-2_i32 : i32 to vector<256x1xi32>
    %79 = arith.cmpi sge, %16, %78 : vector<256x1xi32>
    %c14_i32 = arith.constant 14 : i32
    %80 = vector.broadcast %c14_i32 : i32 to vector<256x1xi32>
    %81 = arith.cmpi slt, %16, %80 : vector<256x1xi32>
    %82 = arith.andi %79, %81 : vector<256x1xi1>
    %cst_30 = arith.constant 0.000000e+00 : f32
    %83 = vector.shape_cast %82 : vector<256x1xi1> to vector<256x1xi1>
    %84 = vector.broadcast %83 : vector<256x1xi1> to vector<256x128xi1>
    %85 = vector.broadcast %cst_30 : f32 to vector<256x128xf32>
    %86 = arith.select %84, %77, %85 : vector<256x128xi1>, vector<256x128xf32>
    %87 = arith.truncf %86 : vector<256x128xf32> to vector<256x128xbf16>
    %c4 = arith.constant 4 : index
    %c0_31 = arith.constant 0 : index
    %c0_32 = arith.constant 0 : index
    %88 = vector.load %arg5[%c4, %c0_31, %c0_32] : memref<5x128x256xbf16, #tpu.memory_space<vmem>>, vector<1x128x256xbf16>
    %89 = vector.shape_cast %88 : vector<1x128x256xbf16> to vector<128x256xbf16>
    %cst_33 = arith.constant dense<0.000000e+00> : vector<256x256xf32>
    %90 = tpu.matmul %87, %89, %cst_33 {dimension_numbers = #tpu.dot_dimension_numbers<[1], [0], [0], [1], [0, 0, 1, 1], [], []>} : vector<256x128xbf16>, vector<128x256xbf16>, vector<256x256xf32> -> vector<256x256xf32>
    %91 = arith.addf %76, %90 : vector<256x256xf32>
    %c0_34 = arith.constant 0 : index
    %c0_35 = arith.constant 0 : index
    %92 = vector.load %arg6[%c0_34, %c0_35] : memref<1x256xf32, #tpu.memory_space<vmem>>, vector<1x256xf32>
    %93 = vector.broadcast %92 : vector<1x256xf32> to vector<256x256xf32>
    %94 = arith.mulf %91, %93 : vector<256x256xf32>
    %c0_36 = arith.constant 0 : index
    %c0_37 = arith.constant 0 : index
    %95 = vector.load %arg7[%c0_36, %c0_37] : memref<1x256xf32, #tpu.memory_space<vmem>>, vector<1x256xf32>
    %96 = vector.broadcast %95 : vector<1x256xf32> to vector<256x256xf32>
    %97 = arith.addf %94, %96 : vector<256x256xf32>
    %cst_38 = arith.constant 0.000000e+00 : f32
    %98 = vector.broadcast %cst_38 : f32 to vector<256x256xf32>
    %99 = arith.maximumf %97, %98 : vector<256x256xf32>
    %100 = arith.truncf %99 : vector<256x256xf32> to vector<256x256xbf16>
    %c1_39 = arith.constant 1 : index
    %c0_40 = arith.constant 0 : index
    %c0_41 = arith.constant 0 : index
    %101 = vector.load %arg8[%c1_39, %c0_40, %c0_41] : memref<3x256x128xbf16, #tpu.memory_space<vmem>>, vector<1x256x128xbf16>
    %102 = vector.shape_cast %101 : vector<1x256x128xbf16> to vector<256x128xbf16>
    %cst_42 = arith.constant dense<0.000000e+00> : vector<256x128xf32>
    %103 = tpu.matmul %100, %102, %cst_42 {dimension_numbers = #tpu.dot_dimension_numbers<[1], [0], [0], [1], [0, 0, 1, 1], [], []>} : vector<256x256xbf16>, vector<256x128xbf16>, vector<256x128xf32> -> vector<256x128xf32>
    %c1_i32_43 = arith.constant 1 : i32
    %104 = tpu.dynamic_rotate %99 by %c1_i32_43 dim 0 : vector<256x256xf32>, i32 -> vector<256x256xf32>
    %c1_i32_44 = arith.constant 1 : i32
    %105 = vector.broadcast %c1_i32_44 : i32 to vector<256x1xi32>
    %106 = arith.cmpi sge, %16, %105 : vector<256x1xi32>
    %c17_i32_45 = arith.constant 17 : i32
    %107 = vector.broadcast %c17_i32_45 : i32 to vector<256x1xi32>
    %108 = arith.cmpi slt, %16, %107 : vector<256x1xi32>
    %109 = arith.andi %106, %108 : vector<256x1xi1>
    %cst_46 = arith.constant 0.000000e+00 : f32
    %110 = vector.shape_cast %109 : vector<256x1xi1> to vector<256x1xi1>
    %111 = vector.broadcast %110 : vector<256x1xi1> to vector<256x256xi1>
    %112 = vector.broadcast %cst_46 : f32 to vector<256x256xf32>
    %113 = arith.select %111, %104, %112 : vector<256x256xi1>, vector<256x256xf32>
    %114 = arith.truncf %113 : vector<256x256xf32> to vector<256x256xbf16>
    %c0_47 = arith.constant 0 : index
    %c0_48 = arith.constant 0 : index
    %c0_49 = arith.constant 0 : index
    %115 = vector.load %arg8[%c0_47, %c0_48, %c0_49] : memref<3x256x128xbf16, #tpu.memory_space<vmem>>, vector<1x256x128xbf16>
    %116 = vector.shape_cast %115 : vector<1x256x128xbf16> to vector<256x128xbf16>
    %cst_50 = arith.constant dense<0.000000e+00> : vector<256x128xf32>
    %117 = tpu.matmul %114, %116, %cst_50 {dimension_numbers = #tpu.dot_dimension_numbers<[1], [0], [0], [1], [0, 0, 1, 1], [], []>} : vector<256x256xbf16>, vector<256x128xbf16>, vector<256x128xf32> -> vector<256x128xf32>
    %118 = arith.addf %103, %117 : vector<256x128xf32>
    %c255_i32_51 = arith.constant 255 : i32
    %119 = tpu.dynamic_rotate %99 by %c255_i32_51 dim 0 : vector<256x256xf32>, i32 -> vector<256x256xf32>
    %c-1_i32_52 = arith.constant -1 : i32
    %120 = vector.broadcast %c-1_i32_52 : i32 to vector<256x1xi32>
    %121 = arith.cmpi sge, %16, %120 : vector<256x1xi32>
    %c15_i32_53 = arith.constant 15 : i32
    %122 = vector.broadcast %c15_i32_53 : i32 to vector<256x1xi32>
    %123 = arith.cmpi slt, %16, %122 : vector<256x1xi32>
    %124 = arith.andi %121, %123 : vector<256x1xi1>
    %cst_54 = arith.constant 0.000000e+00 : f32
    %125 = vector.shape_cast %124 : vector<256x1xi1> to vector<256x1xi1>
    %126 = vector.broadcast %125 : vector<256x1xi1> to vector<256x256xi1>
    %127 = vector.broadcast %cst_54 : f32 to vector<256x256xf32>
    %128 = arith.select %126, %119, %127 : vector<256x256xi1>, vector<256x256xf32>
    %129 = arith.truncf %128 : vector<256x256xf32> to vector<256x256xbf16>
    %c2_55 = arith.constant 2 : index
    %c0_56 = arith.constant 0 : index
    %c0_57 = arith.constant 0 : index
    %130 = vector.load %arg8[%c2_55, %c0_56, %c0_57] : memref<3x256x128xbf16, #tpu.memory_space<vmem>>, vector<1x256x128xbf16>
    %131 = vector.shape_cast %130 : vector<1x256x128xbf16> to vector<256x128xbf16>
    %cst_58 = arith.constant dense<0.000000e+00> : vector<256x128xf32>
    %132 = tpu.matmul %129, %131, %cst_58 {dimension_numbers = #tpu.dot_dimension_numbers<[1], [0], [0], [1], [0, 0, 1, 1], [], []>} : vector<256x256xbf16>, vector<256x128xbf16>, vector<256x128xf32> -> vector<256x128xf32>
    %133 = arith.addf %118, %132 : vector<256x128xf32>
    %c0_59 = arith.constant 0 : index
    %c0_60 = arith.constant 0 : index
    %134 = vector.load %arg9[%c0_59, %c0_60] : memref<1x128xf32, #tpu.memory_space<vmem>>, vector<1x128xf32>
    %135 = vector.broadcast %134 : vector<1x128xf32> to vector<256x128xf32>
    %136 = arith.mulf %133, %135 : vector<256x128xf32>
    %c0_61 = arith.constant 0 : index
    %c0_62 = arith.constant 0 : index
    %137 = vector.load %arg10[%c0_61, %c0_62] : memref<1x128xf32, #tpu.memory_space<vmem>>, vector<1x128xf32>
    %138 = vector.broadcast %137 : vector<1x128xf32> to vector<256x128xf32>
    %139 = arith.addf %136, %138 : vector<256x128xf32>
    %cst_63 = arith.constant 0.000000e+00 : f32
    %140 = vector.broadcast %cst_63 : f32 to vector<256x128xf32>
    %141 = arith.maximumf %139, %140 : vector<256x128xf32>
    %c0_64 = arith.constant 0 : index
    %c0_65 = arith.constant 0 : index
    %142 = vector.load %arg11[%c0_64, %c0_65] : memref<16x256xf32, #tpu.memory_space<vmem>>, vector<16x256xf32>
    %cst_66 = arith.constant dense<0.000000e+00> : vector<16x128xf32>
    %143 = tpu.matmul %142, %141, %cst_66 {dimension_numbers = #tpu.dot_dimension_numbers<[1], [0], [0], [1], [0, 0, 1, 1], [], []>} : vector<16x256xf32>, vector<256x128xf32>, vector<16x128xf32> -> vector<16x128xf32>
    %c0_67 = arith.constant 0 : index
    %c0_68 = arith.constant 0 : index
    %144 = vector.load %arg12[%c0_67, %c0_68] : memref<16x128xf32, #tpu.memory_space<vmem>>, vector<16x128xf32>
    tpu.vector_store %arg12[%c0_67, %c0_68], %143 {strides = array<i32>} : memref<16x128xf32, #tpu.memory_space<vmem>>, vector<16x128xf32>,
    return
  }
  func.func @transform_0(%arg0: i32) -> (i32, i32) {
    %c0_i32 = arith.constant 0 : i32
    %c0_i32_0 = arith.constant 0 : i32
    return %arg0, %c0_i32 : i32, i32
  }
  func.func @transform_1(%arg0: i32) -> (i32, i32) {
    %c0_i32 = arith.constant 0 : i32
    %c0_i32_0 = arith.constant 0 : i32
    %c0_i32_1 = arith.constant 0 : i32
    return %c0_i32, %c0_i32_0 : i32, i32
  }
  func.func @transform_2(%arg0: i32) -> (i32, i32) {
    %c0_i32 = arith.constant 0 : i32
    %c0_i32_0 = arith.constant 0 : i32
    %c0_i32_1 = arith.constant 0 : i32
    return %c0_i32, %c0_i32_0 : i32, i32
  }
  func.func @transform_3(%arg0: i32) -> (i32, i32) {
    %c0_i32 = arith.constant 0 : i32
    %c0_i32_0 = arith.constant 0 : i32
    %c0_i32_1 = arith.constant 0 : i32
    return %c0_i32, %c0_i32_0 : i32, i32
  }
  func.func @transform_4(%arg0: i32) -> (i32, i32, i32) {
    %c0_i32 = arith.constant 0 : i32
    %c0_i32_0 = arith.constant 0 : i32
    %c0_i32_1 = arith.constant 0 : i32
    %c0_i32_2 = arith.constant 0 : i32
    return %c0_i32, %c0_i32_0, %c0_i32_1 : i32, i32, i32
  }
  func.func @transform_5(%arg0: i32) -> (i32, i32) {
    %c0_i32 = arith.constant 0 : i32
    %c0_i32_0 = arith.constant 0 : i32
    %c0_i32_1 = arith.constant 0 : i32
    return %c0_i32, %c0_i32_0 : i32, i32
  }
  func.func @transform_6(%arg0: i32) -> (i32, i32) {
    %c0_i32 = arith.constant 0 : i32
    %c0_i32_0 = arith.constant 0 : i32
    %c0_i32_1 = arith.constant 0 : i32
    return %c0_i32, %c0_i32_0 : i32, i32
  }
  func.func @transform_7(%arg0: i32) -> (i32, i32, i32) {
    %c0_i32 = arith.constant 0 : i32
    %c0_i32_0 = arith.constant 0 : i32
    %c0_i32_1 = arith.constant 0 : i32
    %c0_i32_2 = arith.constant 0 : i32
    return %c0_i32, %c0_i32_0, %c0_i32_1 : i32, i32, i32
  }
  func.func @transform_8(%arg0: i32) -> (i32, i32) {
    %c0_i32 = arith.constant 0 : i32
    %c0_i32_0 = arith.constant 0 : i32
    %c0_i32_1 = arith.constant 0 : i32
    return %c0_i32, %c0_i32_0 : i32, i32
  }
  func.func @transform_9(%arg0: i32) -> (i32, i32) {
    %c0_i32 = arith.constant 0 : i32
    %c0_i32_0 = arith.constant 0 : i32
    %c0_i32_1 = arith.constant 0 : i32
    return %c0_i32, %c0_i32_0 : i32, i32
  }
  func.func @transform_10(%arg0: i32) -> (i32, i32) {
    %c0_i32 = arith.constant 0 : i32
    %c0_i32_0 = arith.constant 0 : i32
    %c0_i32_1 = arith.constant 0 : i32
    return %c0_i32, %c0_i32_0 : i32, i32
  }
  func.func @transform_11(%arg0: i32) -> (i32, i32) {
    %c0_i32 = arith.constant 0 : i32
    %c0_i32_0 = arith.constant 0 : i32
    return %arg0, %c0_i32 : i32, i32
  }
}

</mosaic_0001>

<bundles_post_ra>
// kernel: tpu_custom_call.1
= control target key start
LH: loop header
LB: loop body
LE: loop exit
PB: predicated region body
PF: predicated region fallthrough
CT: control target
= control target key end

     0   :  { %16 = vsyncpa [#allocation3], 0  ;;  %s11777_s0 = inlined_call_operand.vmem [shape: bf16[512,28], index: 0, kind: input, shape index: {}]   ;;  %s11778_s1 = inlined_call_operand.vmem [shape: bf16[28,128], index: 1, kind: input, shape index: {}]   ;;  %s11779_s2 = inlined_call_operand.vmem [shape: f32[1,128], index: 2, kind: input, shape index: {}]   ;;  %s11780_s3 = inlined_call_operand.vmem [shape: f32[1,128], index: 3, kind: input, shape index: {}]   ;;  %s11781_s4 = inlined_call_operand.hbm [shape: bf16[5,128,256], index: 4, kind: input, shape index: {}]   ;;  %s11782_s5 = inlined_call_operand.vmem [shape: f32[1,256], index: 5, kind: input, shape index: {}]   ;;  %s11783_s6 = inlined_call_operand.vmem [shape: f32[1,256], index: 6, kind: input, shape index: {}]   ;;  %s11784_s7 = inlined_call_operand.hbm [shape: bf16[3,256,128], index: 7, kind: input, shape index: {}]   ;;  %s11785_s8 = inlined_call_operand.vmem [shape: f32[1,128], index: 8, kind: input, shape index: {}]   ;;  %s11786_s9 = inlined_call_operand.vmem [shape: f32[1,128], index: 9, kind: input, shape index: {}]   ;;  %s11787_s10 = inlined_call_operand.vmem [shape: f32[16,256], index: 10, kind: input, shape index: {}]   ;;  %s11788_s11 = inlined_call_operand.hbm [shape: f32[32,128], index: 11, kind: output, shape index: {}]  }
   0x1   :  { %17 = vsyncpa [#allocation6], 0 }
   0x2   :  { %18 = vsyncpa [#allocation4], 0 }
   0x3   :  { %20 = vsyncpa [#allocation4 + $0x1], 0  ;;  %s7691_s17 = smov 0   ;;  %s7693_s18 = smov 0  }
   0x4   :  { %s7695_s19 = smov 0   ;;  %s7697_s20 = smov 0  }
   0x5 LB: > { %12173 = sst [smem:[#allocation11_spill]] %s7606_s17  ;;  %s7712_s21 = sadd.s32 4294967295, %s7618_s20   ;;  %s7618_s20 = sphi %s7697_s20, %s13337_s20   ;;  %s7614_s19 = sphi %s7695_s19, %s13339_s19   ;;  %s7610_s18 = sphi %s7693_s18, %s13341_s18   ;;  %s7606_s17 = sphi %s7691_s17, %s13340_s17  }
   0x6   : > { %12174 = sst [smem:[#allocation12_spill]] %s7614_s19  ;;  %s5922_s22 = sadd.s32 4294967294, %s7618_s20  }
   0x7   : > { %s7716_s23 = sadd.s32 1, %s7618_s20   ;;  %s269_s24 = sadd.s32 1, %s7614_s19 }
   0x8   : > { %12175 = sst [smem:[#allocation13_spill]] %s7716_s23  ;;  %s266_s25 = ssub.s32 %s7618_s20, %s7716_s23 }
   0x9   : > { %p279_p0 = scmp.ne.s32.totalorder %s7614_s19, %s7610_s18  ;;  %p267_p1 = scmp.eq.s32.totalorder %s266_s25, 0 }
   0xa   : > { %p280_p2 = scmp.eq.s32.totalorder %s7712_s21, 1  ;;  %p285_p3 = scmp.ne.s32.totalorder %s7610_s18, %s7606_s17 }
   0xb   : > { %p286_p4 = scmp.eq.s32.totalorder %s5922_s22, 1  ;;  %p5923_p7 = scmp.ge.s32.totalorder %s7618_s20, 1 }
   0xc   : > { %s7727_s26 = scalar_select %p267_p1, %s7614_s19, %s269_s24  }
   0xd   : > { %p7729_p5 = por %p280_p2, %p279_p0  ;;  %p7733_p6 = por %p286_p4, %p285_p3 }
   0xe   : > { %12176 = sst [smem:[#allocation14_spill]] %s7727_s26  ;;  %p293_p8 = scmp.lt.s32.totalorder %s7618_s20, 3 }
   0xf   : > { %s12177_s27 = scalar_select %p7729_p5, 1, 0 }
  0x10   : > { %s12178_s28 = scalar_select %p7733_p6, 1, 0 }
  0x11   : > { %p11790_p9 = scmp.eq.s32.totalorder %s7712_s21, 0  ;;  %p7740_p10 = pnand %p5923_p7, %p293_p8 }
  0x12   : > { %12179 = sst [smem:[#allocation15_spill]] %s12178_s28  ;;  %s7620_s30 = smov [#allocation2]  }
  0x13   : > { %s12180_s29 = scalar_select %p7740_p10, 1, 0 }
  0x14   : > { %s314_s12 = sshll.u32 %s7620_s30, 4  ;;  %p7232_p11 = pneg %p7740_p10  ;;  %s315_s12 = int_to_ptr.vmem [resolvable:$true] %s314_s12 }
  0x15   : > { %s7621_s14 = smov [#allocation5]   ;;  %s7492_s24 = scalar_lea.hbm %s11781_s4, 10240 }
  0x16   : > { %p7748_p12 = pnand %p11790_p9, %p7232_p11  ;;  %s333_s15 = sshll.u32 %s7621_s14, 4  ;;  %s7752_s15 = int_to_ptr.vmem [resolvable:$true] %s333_s15 }
  0x17   : > { %p7493_p13 = scmp.ne.s32.totalorder %s11781_s4, %s7492_s24  ;;  %p7499_p3 = scmp.lt.u32.totalorder %s7492_s24, %s11781_s4 }
  0x18   : > { %p7494_p0 = pneg %p7748_p12 }
  0x1a   : > { %p7495_p1 = pnand %p7494_p0, %p7493_p13 }
  0x1c   : > { %p7496_p2 = pneg %p7495_p1 }
  0x1e   : > { %p7501_p4 = pnand %p7499_p3, %p7496_p2 }
  0x20   : > { %7504 = shalt.err (!%p7501_p4)
}
  0x21   : > { %s7505_s14 = scalar_lea.vmem %s315_s12, 10240  ;;  %p7513_p9 = scmp.lt.s32.totalorder %s315_s12, %s315_s12 }
  0x22   : > { %p7506_p7 = scmp.ne.s32.totalorder %s315_s12, %s7505_s14  ;;  %p7514_p6 = scmp.lt.s32.totalorder %s7505_s14, %s7505_s14 }
  0x24   : > { %p7508_p8 = pnand %p7506_p7, %p7494_p0  ;;  %p7515_p5 = por %p7514_p6, %p7513_p9 }
  0x26   : > { %p7509_p11 = pneg %p7508_p8 }
  0x28   : > { %p7516_p10 = pnand %p7515_p5, %p7509_p11 }
  0x2a   : > { %7519 = shalt.err (!%p7516_p10)
}
  0x2b   : > { %s7622_s16 = smov 128   ;;  %s7623_s22 = smov 8  }
  0x2c   : > { %7235 = dma.hbm_to_vmem [thread:$0]  (!%p7748_p12), %s11781_s4, 10240, %s315_s12, [#allocation3], %s7622_s16, %s7622_s16, %s7623_s22  }
  0x2d   : > { %s7520_s30 = scalar_lea.hbm %s11784_s7, 6144 }
  0x2e   : > { %p7521_p13 = scmp.ne.s32.totalorder %s11784_s7, %s7520_s30  ;;  %p7527_p9 = scmp.lt.u32.totalorder %s7520_s30, %s11784_s7 }
  0x30   : > { %p7523_p5 = pnand %p7521_p13, %p7494_p0 }
  0x32   : > { %p7524_p6 = pneg %p7523_p5 }
  0x34   : > { %p7529_p10 = pnand %p7527_p9, %p7524_p6 }
  0x36   : > { %7532 = shalt.err (!%p7529_p10)
}
  0x37   : > { %s7533_s12 = scalar_lea.vmem %s7752_s15, 6144  ;;  %p7541_p4 = scmp.lt.s32.totalorder %s7752_s15, %s7752_s15 }
  0x38   : > { %p7534_p1 = scmp.ne.s32.totalorder %s7752_s15, %s7533_s12  ;;  %p7542_p7 = scmp.lt.s32.totalorder %s7533_s12, %s7533_s12 }
  0x3a   : > { %p7536_p2 = pnand %p7534_p1, %p7494_p0  ;;  %p7543_p8 = por %p7542_p7, %p7541_p4 }
  0x3c   : > { %p7537_p3 = pneg %p7536_p2 }
  0x3e   : > { %p7544_p11 = pnand %p7543_p8, %p7537_p3 }
  0x40   : > { %7547 = shalt.err (!%p7544_p11)
}
  0x41   : > { %s7624_s17 = smov 64   ;;  %s7625_s23 = smov 4  }
  0x42   : > { %7238 = dma.hbm_to_vmem [thread:$0]  (!%p7748_p12), %s11784_s7, 6144, %s7752_s15, [#allocation6], %s7624_s17, %s7624_s17, %s7625_s23  }
  0x43   : > { %p12182_p13 = scmp.ne.s32.totalorder %s12180_s29, 0 }
  0x45   : > { %367 = sbr.rel (%p12182_p13) target bundleno = 1994 (0x7ca), region = 64 }
  0x4c   : > { %p12183_p0 = scmp.eq.s32.totalorder %s7712_s21, 0 }
  0x4e   : > { %7593 = dma.done.wait (%p12183_p0), [#allocation3], 10240   ;;  %p12184_p5 = pmov %p12183_p0 }
  0x4f   : > { %p12185_p6 = pmov %p12183_p0 }
  0x50   : > { %7595 = vsyncadd (%p12184_p5), [#allocation3], 4294957056 }
  0x51   : > { %7597 = dma.done.wait (%p12185_p6), [#allocation6], 6144   ;;  %p12186_p9 = pmov %p12183_p0 }
  0x52   : > { %s5931_s13 = sshll.u32 %s7712_s21, 5  ;;  %vm1012_vm0 = vcmask 1045504   ;;  %v7290_v0 = vld [vmem:[%s11778_s1] sm:$0xff]   ;;  %vm963_vm1 = vcmask 228352   ;;  %v7291_v1 = vld [vmem:[%s11778_s1 + $0x8] sm:$0x3f]   ;;  %v419_v52 = vlaneseq }
  0x53   : > { %7599 = vsyncadd (%p12186_p9), [#allocation6], 4294961152  ;;  %p412_p10 = scmp.lt.s32.totalorder %s5931_s13, 63  ;;  %6881 = vmatprep.subr.bf16.mxu0 %v7290_v0  ;;  %v1014_v3 = vsel %vm1012_vm0, %v7291_v1, 0  ;;  %v7308_v8 = vld [vmem:[#allocation2 + $0x200] ss:$8 sps:$4 sm:$0xff]  }
  0x54   : > { %6882 = vmatpush3.bf16.msra.mxu0 %v7290_v0  ;;  %v7310_v9 = vld [vmem:[#allocation2 + $0x204] ss:$8 sps:$4 sm:$0xff]   ;;  %v7313_v10 = vld [vmem:[#allocation2 + $0x214] ss:$8 sps:$4 sm:$0xff]   ;;  %v7311_v13 = vld [vmem:[#allocation2 + $0x210] ss:$8 sps:$4 sm:$0xff]  }
  0x55   : > { %s13343_s13 = smov (!%p412_p10, %s5931_s13), 63  ;;  %7221 = vmatprep.subr.msk.bf16.mxu0 %vm1012_vm0, %v7291_v1  ;;  %v7316_v14 = vld [vmem:[#allocation2 + $0x224] ss:$8 sps:$4 sm:$0xff]   ;;  %v7314_v15 = vld [vmem:[#allocation2 + $0x220] ss:$8 sps:$4 sm:$0xff]   ;;  %v11809_v35 = vmov 0  }
  0x56   : > { %s5932_s15 = sshll.u32 %s13343_s13, 2  ;;  %v7319_v16 = vld [vmem:[#allocation2 + $0x234] ss:$8 sps:$4 sm:$0xff]   ;;  %v7317_v19 = vld [vmem:[#allocation2 + $0x230] ss:$8 sps:$4 sm:$0xff]   ;;  %1721 = vmatprep.mubr.bf16.mxu1 %v11809_v35  ;;  %v7857_v53 = vshrl.u32 %v419_v52, 7 }
  0x57   : > { %s7815_s19 = scalar_lea.vmem %s11777_s0, %s5932_s15  ;;  %v7322_v20 = vld [vmem:[#allocation2 + $0x244] ss:$8 sps:$4 sm:$0xff]   ;;  %v7320_v21 = vld [vmem:[#allocation2 + $0x240] ss:$8 sps:$4 sm:$0xff]   ;;  %v7325_v29 = vld [vmem:[#allocation2 + $0x254] ss:$8 sps:$4 sm:$0xff]  }
  0x58   : > { %v7292_v2 = vld [vmem:[%s7815_s19] sm:$0xff]   ;;  %v7293_v4 = vld [vmem:[%s7815_s19 + $0x8] sm:$0xff]   ;;  %6884 = vmatpush3.bf16.msra.mxu0 %v1014_v3  ;;  %v7294_v5 = vld [vmem:[%s7815_s19 + $0x10] sm:$0xff]   ;;  %v7871_v59 = vadd.s32 8, %v7857_v53  ;;  %vm3441_vm2 = vcmp.lt.s32.totalorder %v7857_v53, 6  ;;  %vm1352_vm4 = vcmp.lt.s32.totalorder %v7857_v53, 2 }
  0x59   : > { %6885 = vmatprep.mubr.msk.bf16.mxu0 %vm963_vm1, %v7292_v2  ;;  %v7295_v6 = vld [vmem:[%s7815_s19 + $0x18] sm:$0xff]   ;;  %v7296_v7 = vld [vmem:[%s7815_s19 + $0x20] sm:$0xff]   ;;  %v7297_v11 = vld [vmem:[%s7815_s19 + $0x28] sm:$0xff]   ;;  %3779 = vmatprep.subr.bf16.mxu0 %v7310_v9  ;;  %vm11906_vm5 = vmmov 1   ;;  %s408_s16 = sand.u32 1, %s7610_s18   ;;  %s6488_s22 = sshll.u32 %s7712_s21, 8 }
  0x5a   : > { %v7298_v12 = vld [vmem:[%s7815_s19 + $0x30] sm:$0xff]   ;;  %v7299_v17 = vld [vmem:[%s7815_s19 + $0x38] sm:$0xff]   ;;  %v7300_v18 = vld [vmem:[%s7815_s19 + $0x40] sm:$0xff]   ;;  %12187 = vst [vmem:[#allocation16_spill] sm:$0xff] %v7871_v59  ;;  %v11802_v3 = vand.u32 15, %v7871_v59  ;;  %s5930_s13 = sshll.u32 %s408_s16, 4  ;;  %s11734_s24 = scalar_lea.hbm %s11788_s11, %s6488_s22 }
  0x5b   : > { %6886 = vmatmul.mubr.msk.bf16.vlgmr.msra.gmra.mrb[0].mxu0 %vm963_vm1, %v7293_v4  ;;  %v7301_v22 = vld [vmem:[%s7815_s19 + $0x48] sm:$0xff]   ;;  %v7302_v23 = vld [vmem:[%s7815_s19 + $0x50] sm:$0xff]   ;;  %v7303_v24 = vld [vmem:[%s7815_s19 + $0x58] sm:$0xff]   ;;  %s410_s15 = scalar_lea.vmem [#allocation7], %s5930_s13  ;;  %s11736_s25 = scalar_lea.sflag [#allocation4], %s408_s16 }
  0x5c   : > { %6889 = vmatprep.mubr.msk.bf16.mxu0 %vm963_vm1, %v7294_v5  ;;  %3780 = vmatpush1.bf16.msra.mxu0 %v7308_v8  ;;  %v7304_v25 = vld [vmem:[%s7815_s19 + $0x60] sm:$0xff]   ;;  %v7305_v26 = vld [vmem:[%s7815_s19 + $0x68] sm:$0xff]   ;;  %v7306_v27 = vld [vmem:[%s7815_s19 + $0x70] sm:$0xff]   ;;  %vm7890_vm3 = vcmp.lt.s32.totalorder %v11802_v3, 14  ;;  %s5838_s29 = sshll.u32 %s410_s15, 4  ;;  %p13333_p1 = scmp.ne.s32.totalorder %s12177_s27, 0  ;;  %s11729_s29 = int_to_ptr.vmem [resolvable:$true] %s5838_s29 }
  0x5d   : > { %3781 = vmatprep.subr.bf16.mxu0 %v7313_v10  ;;  %v7307_v28 = vld [vmem:[%s7815_s19 + $0x78] sm:$0xff]   ;;  %v7328_v31 = vld [vmem:[#allocation2 + $0x264] ss:$8 sps:$4 sm:$0xff]   ;;  %v7326_v32 = vld [vmem:[#allocation2 + $0x260] ss:$8 sps:$4 sm:$0xff]   ;;  %s7548_s30 = scalar_lea.vmem %s11729_s29, 256 }
  0x5e   : > { %v7323_v30 = vld [vmem:[#allocation2 + $0x250] ss:$8 sps:$4 sm:$0xff]   ;;  %v7331_v33 = vld [vmem:[#allocation2 + $0x274] ss:$8 sps:$4 sm:$0xff]   ;;  %v7332_v36 = vld [vmem:[#allocation2 + $0x4] ss:$8 sps:$4 sm:$0xff]   ;;  %p7549_p12 = scmp.ne.s32.totalorder %s11729_s29, %s7548_s30 }
  0x5f   : > { %v7329_v34 = vld [vmem:[#allocation2 + $0x270] ss:$8 sps:$4 sm:$0xff]   ;;  %v7334_v37 = vld [vmem:[#allocation2] ss:$8 sps:$4 sm:$0xff]   ;;  %1689 = vmatprep.subr.bf16.mxu1 %v7332_v36  ;;  %v7335_v38 = vld [vmem:[#allocation2 + $0x14] ss:$8 sps:$4 sm:$0xff]  }
  0x60   : > { %3782 = vmatpush1.bf16.msra.mxu0 %v7311_v13  ;;  %1690 = vmatpush1.bf16.msra.mxu1 %v7334_v37  ;;  %v7337_v39 = vld [vmem:[#allocation2 + $0x10] ss:$8 sps:$4 sm:$0xff]   ;;  %v7338_v40 = vld [vmem:[#allocation2 + $0x24] ss:$8 sps:$4 sm:$0xff]   ;;  %v7340_v41 = vld [vmem:[#allocation2 + $0x20] ss:$8 sps:$4 sm:$0xff]   ;;  %p7550_p2 = pnand %p7549_p12, %p13333_p1 }
  0x61   : > { %3783 = vmatprep.subr.bf16.mxu0 %v7316_v14  ;;  %1691 = vmatprep.subr.bf16.mxu1 %v7335_v38  ;;  %v7341_v42 = vld [vmem:[#allocation2 + $0x34] ss:$8 sps:$4 sm:$0xff]   ;;  %v7343_v43 = vld [vmem:[#allocation2 + $0x30] ss:$8 sps:$4 sm:$0xff]   ;;  %v7344_v44 = vld [vmem:[#allocation2 + $0x44] ss:$8 sps:$4 sm:$0xff]  }
  0x62   : > { %v7346_v45 = vld [vmem:[#allocation2 + $0x40] ss:$8 sps:$4 sm:$0xff]   ;;  %v7347_v46 = vld [vmem:[#allocation2 + $0x54] ss:$8 sps:$4 sm:$0xff]   ;;  %v7349_v47 = vld [vmem:[#allocation2 + $0x50] ss:$8 sps:$4 sm:$0xff]   ;;  %p7551_p3 = pneg %p7550_p2 }
  0x63   : > { %6890 = vmatmul.mubr.msk.bf16.gmra.mrb[4].mxu0 %vm963_vm1, %v7295_v6  ;;  %v7350_v48 = vld [vmem:[#allocation2 + $0x64] ss:$8 sps:$4 sm:$0xff]   ;;  %v7352_v49 = vld [vmem:[#allocation2 + $0x60] ss:$8 sps:$4 sm:$0xff]   ;;  %v7353_v50 = vld [vmem:[#allocation2 + $0x74] ss:$8 sps:$4 sm:$0xff]  }
  0x64   : > { %6893 = vmatprep.mubr.msk.bf16.mxu0 %vm963_vm1, %v7296_v7  ;;  %3784 = vmatpush1.bf16.msra.mxu0 %v7314_v15  ;;  %v7355_v51 = vld [vmem:[#allocation2 + $0x70] ss:$8 sps:$4 sm:$0xff]   ;;  %v7862_v54 = vld [vmem:[%s11779_s2] ss:$0 sm:$0xff]  ;;  %v7358_v7 = vld [vmem:[#allocation2 + $0x104] ss:$8 sps:$4 sm:$0xff]  }
  0x65   : > { %3785 = vmatprep.subr.bf16.mxu0 %v7319_v16  ;;  %1692 = vmatpush1.bf16.msra.mxu1 %v7337_v39  ;;  %v7867_v56 = vld [vmem:[%s11780_s3] ss:$0 sm:$0xff]  ;;  %v7895_v13 = vadd.s32 24, %v7857_v53  ;;  %vm6193_vm6 = vmpackc.low %vm7890_vm3, %vm11906_vm5  ;;  %v7935_v38 = vadd.s32 40, %v7857_v53  ;;  %s7628_s21 = smov [#allocation7]  }
  0x66   : > { %1693 = vmatprep.subr.bf16.mxu1 %v7338_v40  ;;  %s7552_s14 = sshll.u32 %s7628_s21, 4  ;;  %s7553_s14 = int_to_ptr.vmem [resolvable:$false] %s7552_s14 }
  0x67   : > { %12190 = vst [vmem:[#allocation17_spill] sm:$0xff] %v7895_v13  ;;  %12192 = vst [vmem:[#allocation19_spill] sm:$0xff] %v7935_v38  ;;  %s7554_s12 = scalar_lea.vmem %s7553_s14, 512  ;;  %p7555_p4 = scmp.lt.s32.totalorder %s11729_s29, %s7553_s14 }
  0x68   : > { %3786 = vmatpush1.bf16.msra.mxu0 %v7317_v19  ;;  %p7556_p7 = scmp.lt.s32.totalorder %s7554_s12, %s7548_s30 }
  0x69   : > { %3787 = vmatprep.subr.bf16.mxu0 %v7322_v20  ;;  %1694 = vmatpush1.bf16.msra.mxu1 %v7340_v41 }
  0x6a   : > { %1695 = vmatprep.subr.bf16.mxu1 %v7341_v42  ;;  %p7557_p8 = por %p7556_p7, %p7555_p4 }
  0x6b   : > { %6894 = vmatmul.mubr.msk.bf16.gmra.mrb[8].mxu0 %vm963_vm1, %v7297_v11 }
  0x6c   : > { %6897 = vmatprep.mubr.msk.bf16.mxu0 %vm963_vm1, %v7298_v12  ;;  %3788 = vmatpush1.bf16.msra.mxu0 %v7320_v21  ;;  %p7558_p11 = pnand %p7557_p8, %p7551_p3 }
  0x6d   : > { %3789 = vmatprep.subr.bf16.mxu0 %v7325_v29  ;;  %1696 = vmatpush1.bf16.msra.mxu1 %v7343_v43  ;;  %v11801_v29 = vand.u32 15, %v7895_v13 }
  0x6e   : > { %1697 = vmatprep.subr.bf16.mxu1 %v7344_v44 }
  0x6f   : > { %vm3509_vm7 = vcmp.lt.s32.totalorder %v11801_v29, 14 }
  0x70   : > { %3790 = vmatpush1.bf16.msra.mxu0 %v7323_v30  ;;  %vm6196_vm8 = vmpackc.low %vm3509_vm7, %vm11906_vm5 }
  0x71   : > { %3791 = vmatprep.subr.bf16.mxu0 %v7328_v31  ;;  %1698 = vmatpush1.bf16.msra.mxu1 %v7346_v45 }
  0x72   : > { %1699 = vmatprep.subr.bf16.mxu1 %v7347_v46 }
  0x73   : > { %6898 = vmatmul.mubr.msk.bf16.gmra.mrb[12].mxu0 %vm963_vm1, %v7299_v17 }
  0x74   : > { %6901 = vmatprep.mubr.msk.bf16.mxu0 %vm963_vm1, %v7300_v18  ;;  %3792 = vmatpush1.bf16.msra.mxu0 %v7326_v32 }
  0x75   : > { %3793 = vmatprep.subr.bf16.mxu0 %v7331_v33  ;;  %1700 = vmatpush1.bf16.msra.mxu1 %v7349_v47 }
  0x76   : > { %1701 = vmatprep.subr.bf16.mxu1 %v7350_v48 }
  0x78   : > { %3794 = vmatpush1.bf16.msra.mxu0 %v7329_v34 }
  0x79   : > { %1702 = vmatpush1.bf16.msra.mxu1 %v7352_v49 }
  0x7a   : > { %1703 = vmatprep.subr.bf16.mxu1 %v7353_v50  ;;  %v11800_v50 = vand.u32 15, %v7935_v38 }
  0x7b   : > { %6902 = vmatmul.mubr.msk.bf16.gmra.mrb[16].mxu0 %vm963_vm1, %v7301_v22 }
  0x7c   : > { %6905 = vmatprep.mubr.msk.bf16.mxu0 %vm963_vm1, %v7302_v23  ;;  %vm7966_vm9 = vcmp.lt.s32.totalorder %v11800_v50, 14 }
  0x7d   : > { %1704 = vmatpush1.bf16.msra.mxu1 %v7355_v51  ;;  %vm6199_vm10 = vmpackc.low %vm7966_vm9, %vm11906_vm5  ;;  %vm11896_vm9 = vcmp.lt.s32.totalorder %v7857_v53, 1 }
  0x7e   : > { %1962 = vmatprep.subr.bf16.mxu1 %v7358_v7 }
  0x83   : > { %6906 = vmatmul.mubr.msk.bf16.gmra.mrb[20].mxu0 %vm963_vm1, %v7303_v24 }
  0x84   : > { %6909 = vmatprep.mubr.msk.bf16.mxu0 %vm963_vm1, %v7304_v25 }
  0x8b   : > { %6910 = vmatmul.mubr.msk.bf16.gmra.mrb[24].mxu0 %vm963_vm1, %v7305_v26 }
  0x8c   : > { %6913 = vmatprep.mubr.msk.bf16.mxu0 %vm963_vm1, %v7306_v27 }
  0x93   : > { %6914 = vmatmul.mubr.msk.bf16.gmra.mrb[28].mxu0 %vm963_vm1, %v7307_v28 }
  0x94   : > { %3811 = vmatprep.mubr.bf16.mxu0 %v11809_v35 }
 0x12e   : > { %v6887_v55 = vpop.f32.mrb[0].mxu0 }
 0x12f   : > { %v1186_v57 = vmul.f32 %v6887_v55, %v7862_v54  ;;  %v1050_v58 = vpop.f32.mrb[1].mxu0 }
 0x130   : > { %v1184_v60 = vmul.f32 %v7862_v54, %v1050_v58  ;;  %v6888_v61 = vpop.f32.mrb[2].mxu0 }
 0x131   : > { %v1225_v62 = vadd.f32 %v7867_v56, %v1186_v57  ;;  %v1187_v63 = vmul.f32 %v6888_v61, %v7862_v54  ;;  %v1053_v0 = vpop.f32.mrb[3].mxu0 }
 0x132   : > { %v1223_v1 = vadd.f32 %v7867_v56, %v1184_v60  ;;  %v1185_v2 = vmul.f32 %v7862_v54, %v1053_v0 }
 0x133   : > { %v7879_v4 = vmax.f32 %v1225_v62, 0.0  ;;  %v1226_v8 = vadd.f32 %v7867_v56, %v1187_v63  ;;  %v7960_v62 = vadd.s32 56, %v7857_v53 }
 0x134   : > { %v7881_v5 = vmax.f32 %v1223_v1, 0.0  ;;  %v1224_v6 = vadd.f32 %v7867_v56, %v1185_v2 }
 0x135   : > { %v3411_v14 = vrot.slane %v7879_v4, 2  ;;  %v7902_v19 = vmax.f32 %v1226_v8, 0.0  ;;  %12195 = vst [vmem:[#allocation22_spill] sm:$0xff] %v7960_v62 }
 0x136   : > { %v7885_v9 = vmax.f32 %v1224_v6, 0.0  ;;  %v6891_v10 = vpop.f32.mrb[4].mxu0  ;;  %v11803_v15 = vrot.slane %v7881_v5, 2  ;;  %v11805_v22 = vrot.slane %v7881_v5, 6 }
 0x137   : > { %v1066_v11 = vpop.f32.mrb[5].mxu0  ;;  %v1190_v20 = vmul.f32 %v6891_v10, %v7862_v54  ;;  %v3412_v36 = vrot.slane %v7902_v19, 2  ;;  %v7977_v10 = vadd.s32 72, %v7857_v53 }
 0x138   : > { %v3410_v16 = vrot.slane %v7885_v9, 2  ;;  %v1188_v17 = vmul.f32 %v7862_v54, %v1066_v11  ;;  %v6892_v18 = vpop.f32.mrb[6].mxu0  ;;  %v11804_v23 = vrot.slane %v7885_v9, 6 }
 0x139   : > { %v1069_v21 = vpop.f32.mrb[7].mxu0  ;;  %v1229_v33 = vadd.f32 %v7867_v56, %v1190_v20  ;;  %v1191_v39 = vmul.f32 %v6892_v18, %v7862_v54  ;;  %v3470_v49 = vsel %vm3441_vm2, %v3411_v14, %v3412_v36  ;;  %12198 = vst [vmem:[#allocation23_spill] sm:$0xff] %v7977_v10 }
 0x13a   : > { %v1227_v24 = vadd.f32 %v7867_v56, %v1188_v17  ;;  %v1189_v25 = vmul.f32 %v7862_v54, %v1069_v21  ;;  %v3471_v26 = vsel %vm3441_vm2, %v3410_v16, %v3411_v14  ;;  %v3472_v27 = vsel %vm3441_vm2, %v11803_v15, %v3410_v16 }
 0x13b   : > { %v6194_v28 = vpack.c.bf16 %v3471_v26, %v3472_v27  ;;  %v7925_v30 = vsel %vm1352_vm4, %v11805_v22, %v11804_v23  ;;  %v7945_v45 = vmax.f32 %v1229_v33, 0.0  ;;  %v1230_v51 = vadd.f32 %v7867_v56, %v1191_v39 }
 0x13c   : > { %v7927_v31 = vmax.f32 %v1227_v24, 0.0  ;;  %v1228_v32 = vadd.f32 %v7867_v56, %v1189_v25  ;;  %v11799_v21 = vand.u32 15, %v7960_v62  ;;  %v7988_v24 = vadd.s32 88, %v7857_v53 }
 0x13d   : > { %6195 = vmatmul.mubr.msk.bf16.vlgmr.msra.gmra.mrb[32].mxu0 %vm6193_vm6, %v6194_v28  ;;  %12194 = vst [vmem:[#allocation21_spill] sm:$0xff] %v7945_v45  ;;  %v3415_v61 = vrot.slane %v7945_v45, 2  ;;  %v7970_v2 = vmax.f32 %v1230_v51, 0.0  ;;  %v7991_v25 = vadd.s32 104, %v7857_v53  ;;  %v12223_v62 = vmov 0  }
 0x13e   : > { %12191 = vst [vmem:[#allocation18_spill] sm:$0xff] %v7927_v31  ;;  %v6895_v34 = vpop.f32.mrb[8].mxu0  ;;  %3821 = vmatprep.mubr.bf16.mxu0 %v11809_v35  ;;  %v3413_v37 = vrot.slane %v7927_v31, 2  ;;  %v7938_v40 = vmax.f32 %v1228_v32, 0.0  ;;  %12199 = vst [vmem:[#allocation24_spill] sm:$0xff] %v7988_v24  ;;  %vm8010_vm11 = vcmp.lt.s32.totalorder %v11799_v21, 14 }
 0x13f   : > { %v1082_v41 = vpop.f32.mrb[9].mxu0  ;;  %v1194_v47 = vmul.f32 %v6895_v34, %v7862_v54  ;;  %12200 = vst [vmem:[#allocation25_spill] sm:$0xff] %v7991_v25  ;;  %v3416_v34 = vrot.slane %v7970_v2, 2  ;;  %vm6202_vm13 = vmpackc.low %vm8010_vm11, %vm11906_vm5 }
 0x140   : > { %12193 = vst [vmem:[#allocation20_spill] sm:$0xff] %v7938_v40  ;;  %v1192_v42 = vmul.f32 %v7862_v54, %v1082_v41  ;;  %v6896_v43 = vpop.f32.mrb[10].mxu0  ;;  %v3469_v44 = vsel %vm3441_vm2, %v3412_v36, %v3413_v37  ;;  %v3414_v55 = vrot.slane %v7938_v40, 2  ;;  %v11797_v36 = vand.u32 15, %v7977_v10 }
 0x141   : > { %v1085_v46 = vpop.f32.mrb[11].mxu0  ;;  %v6197_v52 = vpack.c.bf16 %v3469_v44, %v3470_v49  ;;  %v1195_v58 = vmul.f32 %v6896_v43, %v7862_v54  ;;  %v1233_v63 = vadd.f32 %v7867_v56, %v1194_v47  ;;  %v11798_v44 = vand.u32 15, %v7988_v24 }
 0x142   : > { %v1193_v48 = vmul.f32 %v7862_v54, %v1085_v46  ;;  %v1231_v57 = vadd.f32 %v7867_v56, %v1192_v42  ;;  %v3467_v7 = vsel %vm3441_vm2, %v3414_v55, %v3415_v61  ;;  %v3468_v8 = vsel %vm3441_vm2, %v3413_v37, %v3414_v55 }
 0x143   : > { %v1234_v12 = vadd.f32 %v7867_v56, %v1195_v58  ;;  %v7993_v26 = vmax.f32 %v1233_v63, 0.0  ;;  %v6200_v33 = vpack.c.bf16 %v3467_v7, %v3468_v8  ;;  %v11808_v46 = vand.u32 15, %v7991_v25 }
 0x144   : > { %v1232_v60 = vadd.f32 %v7867_v56, %v1193_v48  ;;  %v7979_v11 = vmax.f32 %v1231_v57, 0.0  ;;  %vm8030_vm12 = vcmp.lt.s32.totalorder %v11797_v36, 14  ;;  %vm8088_vm14 = vcmp.lt.s32.totalorder %v11798_v44, 14 }
 0x145   : > { %6198 = vmatmul.mubr.msk.bf16.gmra.mrb[36].mxu0 %vm6196_vm8, %v6197_v52  ;;  %v8003_v37 = vmax.f32 %v1234_v12, 0.0  ;;  %v3419_v51 = vrot.slane %v7993_v26, 2  ;;  %v8022_v52 = vadd.s32 120, %v7857_v53  ;;  %vm6205_vm15 = vmpackc.low %vm8030_vm12, %vm11906_vm5  ;;  %vm8162_vm0 = vcmp.lt.s32.totalorder %v11808_v46, 14 }
 0x146   : > { %v6899_v0 = vpop.f32.mrb[12].mxu0  ;;  %3831 = vmatprep.mubr.bf16.mxu0 %v11809_v35  ;;  %v7982_v14 = vmax.f32 %v1232_v60, 0.0  ;;  %v3417_v39 = vrot.slane %v7979_v11, 2  ;;  %v3466_v60 = vsel %vm3441_vm2, %v3415_v61, %v3416_v34  ;;  %vm6208_vm1 = vmpackc.low %vm8088_vm14, %vm11906_vm5 }
 0x147   : > { %v1098_v6 = vpop.f32.mrb[13].mxu0  ;;  %v1198_v18 = vmul.f32 %v6899_v0, %v7862_v54  ;;  %12204 = vst [vmem:[#allocation27_spill] sm:$0xff] %v8022_v52  ;;  %v8035_v0 = vadd.s32 16, %v7857_v53  ;;  %v3420_v61 = vrot.slane %v8003_v37, 2  ;;  %vm6211_vm3 = vmpackc.low %vm8162_vm0, %vm11906_vm5 }
 0x148   : > { %v1196_v16 = vmul.f32 %v7862_v54, %v1098_v6  ;;  %v6900_v17 = vpop.f32.mrb[14].mxu0  ;;  %v3418_v41 = vrot.slane %v7982_v14, 2  ;;  %v3465_v7 = vsel %vm3441_vm2, %v3416_v34, %v3417_v39 }
 0x149   : > { %v1101_v20 = vpop.f32.mrb[15].mxu0  ;;  %v1199_v28 = vmul.f32 %v6900_v17, %v7862_v54  ;;  %v1237_v42 = vadd.f32 %v7867_v56, %v1198_v18  ;;  %12207 = vst [vmem:[#allocation28_spill] sm:$0xff] %v8035_v0 }
 0x14a   : > { %v1235_v27 = vadd.f32 %v7867_v56, %v1196_v16  ;;  %v1197_v32 = vmul.f32 %v7862_v54, %v1101_v20  ;;  %v3463_v8 = vsel %vm3441_vm2, %v3418_v41, %v3419_v51  ;;  %v3464_v20 = vsel %vm3441_vm2, %v3417_v39, %v3418_v41 }
 0x14b   : > { %v1238_v48 = vadd.f32 %v7867_v56, %v1199_v28  ;;  %v8043_v12 = vmax.f32 %v1237_v42, 0.0  ;;  %v6206_v43 = vpack.c.bf16 %v3463_v8, %v3464_v20 }
 0x14c   : > { %v8016_v47 = vmax.f32 %v1235_v27, 0.0  ;;  %v1236_v55 = vadd.f32 %v7867_v56, %v1197_v32 }
 0x14d   : > { %6201 = vmatmul.mubr.msk.bf16.gmra.mrb[40].mxu0 %vm6199_vm10, %v6200_v33  ;;  %v8049_v27 = vmax.f32 %v1238_v48, 0.0 }
 0x14e   : > { %12203 = vst [vmem:[#allocation26_spill] sm:$0xff] %v8016_v47  ;;  %v6903_v49 = vpop.f32.mrb[16].mxu0  ;;  %3841 = vmatprep.mubr.bf16.mxu0 %v11809_v35  ;;  %v11811_v33 = vrot.slane %v8016_v47, 2  ;;  %v8057_v34 = vmax.f32 %v1236_v55, 0.0  ;;  %v8071_v55 = vsel %vm3441_vm2, %v3419_v51, %v3420_v61 }
 0x14f   : > { %v1202_v57 = vmul.f32 %v6903_v49, %v7862_v54  ;;  %v1114_v58 = vpop.f32.mrb[17].mxu0  ;;  %v11807_v8 = vrot.slane %v8049_v27, 6 }
 0x150   : > { %v1200_v1 = vmul.f32 %v7862_v54, %v1114_v58  ;;  %v6904_v6 = vpop.f32.mrb[18].mxu0 }
 0x151   : > { %v1241_v16 = vadd.f32 %v7867_v56, %v1202_v57  ;;  %v1203_v17 = vmul.f32 %v6904_v6, %v7862_v54  ;;  %v1117_v18 = vpop.f32.mrb[19].mxu0  ;;  %v6203_v57 = vpack.c.bf16 %v3465_v7, %v3466_v60  ;;  %v8081_v7 = vsel %vm3441_vm2, %v3420_v61, %v11811_v33 }
 0x152   : > { %v1239_v28 = vadd.f32 %v7867_v56, %v1200_v1  ;;  %v1201_v32 = vmul.f32 %v7862_v54, %v1117_v18 }
 0x153   : > { %v8059_v42 = vmax.f32 %v1241_v16, 0.0  ;;  %v1242_v49 = vadd.f32 %v7867_v56, %v1203_v17 }
 0x154   : > { %v8062_v39 = vmax.f32 %v1239_v28, 0.0  ;;  %v1240_v41 = vadd.f32 %v7867_v56, %v1201_v32 }
 0x155   : > { %v8067_v1 = vmax.f32 %v1242_v49, 0.0  ;;  %6204 = vmatmul.mubr.msk.bf16.gmra.mrb[44].mxu0 %vm6202_vm13, %v6203_v57  ;;  %v3427_v61 = vrot.slane %v8059_v42, 2  ;;  %v1338_v3 = vrot.slane %v8059_v42, 6 }
 0x156   : > { %v8074_v16 = vmax.f32 %v1240_v41, 0.0  ;;  %v6907_v60 = vpop.f32.mrb[20].mxu0  ;;  %3851 = vmatprep.mubr.bf16.mxu0 %v11809_v35  ;;  %v11806_v32 = vrot.slane %v8062_v39, 2 }
 0x157   : > { %v1206_v51 = vmul.f32 %v6907_v60, %v7862_v54  ;;  %v1130_v18 = vpop.f32.mrb[21].mxu0  ;;  %v1336_v60 = vrot.slane %v8062_v39, 6  ;;  %v3428_v29 = vrot.slane %v8067_v1, 2 }
 0x158   : > { %v1204_v49 = vmul.f32 %v7862_v54, %v1130_v18  ;;  %v6908_v57 = vpop.f32.mrb[22].mxu0  ;;  %v3426_v41 = vrot.slane %v8074_v16, 2  ;;  %v1337_v36 = vrot.slane %v8074_v16, 6 }
 0x159   : > { %v1245_v44 = vadd.f32 %v7867_v56, %v1206_v51  ;;  %v1207_v21 = vmul.f32 %v6908_v57, %v7862_v54  ;;  %v1133_v50 = vpop.f32.mrb[23].mxu0 }
 0x15a   : > { %v1243_v15 = vadd.f32 %v7867_v56, %v1204_v49  ;;  %v1205_v18 = vmul.f32 %v7862_v54, %v1133_v50  ;;  %v8110_v23 = vsel %vm3441_vm2, %v3426_v41, %v3427_v61  ;;  %v8116_v51 = vsel %vm3441_vm2, %v11806_v32, %v3426_v41 }
 0x15b   : > { %v8118_v57 = vmax.f32 %v1245_v44, 0.0  ;;  %v1246_v49 = vadd.f32 %v7867_v56, %v1207_v21  ;;  %v8125_v63 = vsel %vm1352_vm4, %v1336_v60, %v1337_v36  ;;  %v8134_v41 = vsel %vm1352_vm4, %v11807_v8, %v1336_v60 }
 0x15c   : > { %12210 = vst [vmem:[#allocation29_spill] sm:$0xff] %v8125_v63  ;;  %v8127_v22 = vmax.f32 %v1243_v15, 0.0  ;;  %v1244_v6 = vadd.f32 %v7867_v56, %v1205_v18  ;;  %12211 = vst [vmem:[#allocation30_spill] sm:$0xff] %v8134_v41  ;;  %v1339_v44 = vrot.slane %v8067_v1, 6  ;;  %v6209_v50 = vpack.c.bf16 %v8081_v7, %v8071_v55 }
 0x15d   : > { %v8137_v21 = vmax.f32 %v1246_v49, 0.0  ;;  %6207 = vmatmul.mubr.msk.bf16.gmra.mrb[48].mxu0 %vm6205_vm15, %v6206_v43  ;;  %v8145_v18 = vsel %vm1352_vm4, %v1337_v36, %v1338_v3  ;;  %v8153_v43 = vsel %vm3441_vm2, %v3427_v61, %v3428_v29  ;;  %v12238_v41 = vrot.slane %v8062_v39, 2 }
 0x15e   : > { %12212 = vst [vmem:[#allocation31_spill] sm:$0xff] %v8145_v18  ;;  %v8147_v32 = vmax.f32 %v1244_v6, 0.0  ;;  %v6911_v58 = vpop.f32.mrb[24].mxu0  ;;  %3861 = vmatprep.mubr.bf16.mxu0 %v11809_v35  ;;  %v3429_v60 = vrot.slane %v8127_v22, 2  ;;  %v8157_v55 = vsel %vm1352_vm4, %v1338_v3, %v1339_v44  ;;  %v3431_v6 = vrot.slane %v8118_v57, 2 }
 0x15f   : > { %12213 = vst [vmem:[#allocation32_spill] sm:$0xff] %v8157_v55  ;;  %v1210_v7 = vmul.f32 %v6911_v58, %v7862_v54  ;;  %v1146_v49 = vpop.f32.mrb[25].mxu0  ;;  %v3432_v15 = vrot.slane %v8137_v21, 2  ;;  %v1340_v46 = vrot.slane %v8127_v22, 6 }
 0x160   : > { %v1208_v8 = vmul.f32 %v7862_v54, %v1146_v49  ;;  %v6912_v3 = vpop.f32.mrb[26].mxu0  ;;  %v8173_v58 = vsel %vm3441_vm2, %v3428_v29, %v3429_v60  ;;  %v3430_v48 = vrot.slane %v8147_v32, 2 }
 0x161   : > { %v1249_v35 = vadd.f32 %v7867_v56, %v1210_v7  ;;  %v1211_v33 = vmul.f32 %v6912_v3, %v7862_v54  ;;  %v1149_v28 = vpop.f32.mrb[27].mxu0  ;;  %v8183_v49 = vsel %vm3441_vm2, %v3431_v6, %v3432_v15 }
 0x162   : > { %v1247_v61 = vadd.f32 %v7867_v56, %v1208_v8  ;;  %v1209_v29 = vmul.f32 %v7862_v54, %v1149_v28  ;;  %v8192_v7 = vsel %vm3441_vm2, %v3430_v48, %v3431_v6  ;;  %v8196_v3 = vsel %vm3441_vm2, %v3429_v60, %v3430_v48 }
 0x163   : > { %v8198_v17 = vmax.f32 %v1249_v35, 0.0  ;;  %v1250_v25 = vadd.f32 %v7867_v56, %v1211_v33  ;;  %v1341_v28 = vrot.slane %v8147_v32, 6  ;;  %v8208_v6 = vadd.s32 136, %v7857_v53 }
 0x164   : > { %v8204_v24 = vmax.f32 %v1247_v61, 0.0  ;;  %v1248_v20 = vadd.f32 %v7867_v56, %v1209_v29  ;;  %v8212_v48 = vsel %vm1352_vm4, %v1339_v44, %v1340_v46  ;;  %v12218_v33 = vrot.slane %v8043_v12, 2 }
 0x165   : > { %12216 = vst [vmem:[#allocation33_spill] sm:$0xff] %v8208_v6  ;;  %12217 = vst [vmem:[#allocation34_spill] sm:$0xff] %v8212_v48  ;;  %v8214_v35 = vmax.f32 %v1250_v25, 0.0  ;;  %6210 = vmatmul.mubr.msk.bf16.gmra.mrb[52].mxu0 %vm6208_vm1, %v6209_v50  ;;  %v12219_v60 = vrot.slane %v8057_v34, 2  ;;  %v12221_v29 = vrot.slane %v8016_v47, 2  ;;  %v8230_v44 = vsel %vm1352_vm4, %v1340_v46, %v1341_v28 }
 0x166   : > { %12222 = vst [vmem:[#allocation35_spill] sm:$0xff] %v8230_v44  ;;  %v8232_v25 = vmax.f32 %v1248_v20, 0.0  ;;  %v6915_v50 = vpop.f32.mrb[28].mxu0  ;;  %3871 = vmatprep.mubr.bf16.mxu0 %v12223_v62  ;;  %v3433_v38 = vrot.slane %v8204_v24, 2  ;;  %v3435_v46 = vrot.slane %v8198_v17, 2  ;;  %v1343_v20 = vrot.slane %v8137_v21, 6 }
 0x167   : > { %v3459_v61 = vsel %vm3441_vm2, %v12219_v60, %v12218_v33  ;;  %v12220_v8 = vmov %v12219_v60  ;;  %v1342_v60 = vrot.slane %v8118_v57, 6 }
 0x168   : > { %v3460_v10 = vsel %vm3441_vm2, %v12221_v29, %v12220_v8  ;;  %v1214_v8 = vmul.f32 %v6915_v50, %v7862_v54  ;;  %v1162_v29 = vpop.f32.mrb[29].mxu0  ;;  %v8246_v55 = vsel %vm3441_vm2, %v3432_v15, %v3433_v38  ;;  %v3434_v33 = vrot.slane %v8232_v25, 2 }
 0x169   : > { %v1212_v59 = vmul.f32 %v7862_v54, %v1162_v29  ;;  %v6916_v18 = vpop.f32.mrb[30].mxu0  ;;  %v8251_v48 = vsel %vm1352_vm4, %v1341_v28, %v1342_v60  ;;  %v12225_v29 = vrot.slane %v8214_v35, 2 }
 0x16a   : > { %12224 = vst [vmem:[#allocation36_spill] sm:$0xff] %v8251_v48  ;;  %v1253_v50 = vadd.f32 %v7867_v56, %v1214_v8  ;;  %v1215_v13 = vmul.f32 %v6916_v18, %v7862_v54  ;;  %v1165_v44 = vpop.f32.mrb[31].mxu0  ;;  %v8270_v18 = vsel %vm3441_vm2, %v3434_v33, %v3435_v46  ;;  %v8274_v28 = vsel %vm3441_vm2, %v3433_v38, %v3434_v33 }
 0x16b   : > { %v8261_v15 = vsel %vm3441_vm2, %v3435_v46, %v12225_v29  ;;  %v1251_v63 = vadd.f32 %v7867_v56, %v1212_v59  ;;  %v1213_v47 = vmul.f32 %v7862_v54, %v1165_v44  ;;  %12227 = vst [vmem:[#allocation38_spill] sm:$0xff] %v8274_v28  ;;  %v6212_v29 = vpack.c.bf16 %v3459_v61, %v3460_v10  ;;  %v7356_v46 = vld [vmem:[#allocation2 + $0x100] ss:$8 sps:$4 sm:$0xff]  }
 0x16c   : > { %12226 = vst [vmem:[#allocation37_spill] sm:$0xff] %v8261_v15  ;;  %v1254_v8 = vadd.f32 %v7867_v56, %v1215_v13  ;;  %v8281_v54 = vsel %vm1352_vm4, %v1342_v60, %v1343_v20  ;;  %v12229_v44 = vand.u32 15, %v7857_v53  ;;  %v12232_v38 = vand.u32 15, %v8022_v52 }
 0x16d   : > { %12228 = vst [vmem:[#allocation39_spill] sm:$0xff] %v8281_v54  ;;  %v1252_v36 = vadd.f32 %v7867_v56, %v1213_v47  ;;  %6213 = vmatmul.mubr.msk.bf16.gmra.mrb[56].mxu0 %vm6211_vm3, %v6212_v29  ;;  %v3424_v56 = vrot.slane %v8049_v27, 2  ;;  %v1344_v47 = vrot.slane %v8204_v24, 6  ;;  %v1345_v33 = vrot.slane %v8232_v25, 6 }
 0x16e   : > { %vm8286_vm6 = vcmp.ge.s32.totalorder %v12229_v44, 2  ;;  %vm8292_vm7 = vcmp.lt.s32.totalorder %v12232_v38, 14  ;;  %v8298_v61 = vmax.f32 %v1254_v8, 0.0  ;;  %v8303_v60 = vmax.f32 %v1251_v63, 0.0  ;;  %3881 = vmatprep.mubr.bf16.mxu0 %v12223_v62  ;;  %v7362_v38 = vld [vmem:[#allocation2 + $0x120] ss:$8 sps:$4 sm:$0xff]  }
 0x16f   : > { %v12235_v44 = vand.u32 15, %v8035_v0  ;;  %v1346_v29 = vrot.slane %v8198_v17, 6  ;;  %v8314_v10 = vmax.f32 %v1252_v36, 0.0  ;;  %v3457_v63 = vsel %vm3441_vm2, %v3424_v56, %v12238_v41  ;;  %vm5985_vm10 = vmpackc.low %vm11906_vm5, %vm8286_vm6 }
 0x170   : > { %v1351_v59 = vrot.slane %v8298_v61, 6  ;;  %v8323_v52 = vsel %vm1352_vm4, %v1344_v47, %v1345_v33  ;;  %v8330_v8 = vsel %vm1352_vm4, %v1343_v20, %v1344_v47  ;;  %v1347_v36 = vrot.slane %v8214_v35, 6  ;;  %vm6214_vm11 = vmpackc.low %vm8292_vm7, %vm11906_vm5 }
 0x171   : > { %vm8308_vm8 = vcmp.ge.s32.totalorder %v12235_v44, 2  ;;  %v8326_v44 = vmax.f32 %v1253_v50, 0.0  ;;  %v8335_v0 = vsel %vm1352_vm4, %v1345_v33, %v1346_v29  ;;  %v12240_v41 = vrot.slane %v7881_v5, 6 }
 0x172   : > { %12239 = vst [vmem:[#allocation40_spill] sm:$0xff] %v8335_v0  ;;  %v8346_v20 = vadd.s32 32, %v7857_v53  ;;  %v12242_v54 = vrot.slane %v8043_v12, 2  ;;  %v1348_v50 = vrot.slane %v8303_v60, 6  ;;  %v1322_v47 = vrot.slane %v7879_v4, 6  ;;  %vm8424_vm13 = vmpackc.low %vm11906_vm5, %vm8308_vm8 }
 0x173   : > { %v1384_v48 = vsel %vm1352_vm4, %v1351_v59, %v12240_v41  ;;  %v8360_v41 = vsel %vm1352_vm4, %v1346_v29, %v1347_v36  ;;  %v12244_v13 = vand.u32 15, %v8208_v6  ;;  %vm11897_vm7 = vcmp.lt.s32.totalorder %v7857_v53, 7 }
 0x174   : > { %12241 = vst [vmem:[#allocation41_spill] sm:$0xff] %v8346_v20  ;;  %v5986_v33 = vpack.c.bf16 %v7925_v30, %v1384_v48  ;;  %v3458_v15 = vsel %vm3441_vm2, %v12242_v54, %v3424_v56  ;;  %12243 = vst [vmem:[#allocation42_spill] sm:$0xff] %v8360_v41  ;;  %v7361_v30 = vld [vmem:[#allocation2 + $0x114] ss:$8 sps:$4 sm:$0xff]   ;;  %v1349_v54 = vrot.slane %v8314_v10, 6  ;;  %v8375_v29 = vsel %vm1352_vm4, %v1347_v36, %v1348_v50 }
 0x175   : > { %v6215_v28 = vpack.c.bf16 %v3457_v63, %v3458_v15  ;;  %vm8369_vm12 = vcmp.lt.s32.totalorder %v12244_v13, 14  ;;  %12247 = vst [vmem:[#allocation43_spill] sm:$0xff] %v8375_v29  ;;  %v1350_v15 = vrot.slane %v8326_v44, 6  ;;  %v12249_v48 = vrot.slane %v7885_v9, 6  ;;  %v7359_v63 = vld [vmem:[#allocation2 + $0x110] ss:$8 sps:$4 sm:$0xff]  }
 0x176   : > { %5987 = vmatmul.mubr.msk.bf16.vlgmr.msra.gmra.mrb[0].mxu1 %vm5985_vm10, %v5986_v33  ;;  %v12248_v33 = vrot.slane %v7902_v19, 6  ;;  %v8392_v0 = vsel %vm1352_vm4, %v1348_v50, %v1349_v54  ;;  %v8411_v36 = vadd.s32 48, %v7857_v53  ;;  %v8417_v29 = vadd.s32 168, %v7857_v53  ;;  %vm6217_vm14 = vmpackc.low %vm8369_vm12, %vm11906_vm5 }
 0x177   : > { %6216 = vmatmul.mubr.msk.bf16.gmra.mrb[60].mxu0 %vm6214_vm11, %v6215_v28  ;;  %1731 = vmatprep.mubr.bf16.mxu1 %v12223_v62  ;;  %v1382_v6 = vsel %vm1352_vm4, %v12249_v48, %v1322_v47  ;;  %v8400_v41 = vsel %vm1352_vm4, %v1350_v15, %v1351_v59  ;;  %v8408_v48 = vadd.s32 152, %v7857_v53  ;;  %v2155_v59 = vrot.slane %v7881_v5, 7 }
 0x178   : > { %v1381_v13 = vsel %vm1352_vm4, %v1322_v47, %v12248_v33  ;;  %3891 = vmatprep.mubr.bf16.mxu0 %v12223_v62  ;;  %1963 = vmatpush1.bf16.msra.mxu1 %v7356_v46  ;;  %v8404_v47 = vsel %vm1352_vm4, %v1349_v54, %v1350_v15  ;;  %12251 = vst [vmem:[#allocation45_spill] sm:$0xff] %v8411_v36  ;;  %v7364_v46 = vld [vmem:[#allocation2 + $0x124] ss:$8 sps:$4 sm:$0xff]   ;;  %12252 = vst [vmem:[#allocation46_spill] sm:$0xff] %v8417_v29  ;;  %v1324_v33 = vrot.slane %v7927_v31, 6 }
 0x179   : > { %12250 = vst [vmem:[#allocation44_spill] sm:$0xff] %v8408_v48  ;;  %1964 = vmatprep.subr.bf16.mxu1 %v7361_v30  ;;  %v5989_v28 = vpack.c.bf16 %v1381_v13, %v1382_v6  ;;  %v1325_v30 = vrot.slane %v7938_v40, 6  ;;  %v12255_v6 = vrot.slane %v7885_v9, 7  ;;  %v12257_v40 = vrot.slane %v8298_v61, 7 }
 0x17a   : > { %v12261_v15 = vand.u32 15, %v8346_v20  ;;  %v12264_v56 = vrot.slane %v7902_v19, 6  ;;  %v2173_v31 = vrot.slane %v8059_v42, 7 }
 0x17b   : > { %v8448_v13 = vsel %vm11896_vm9, %v2155_v59, %v12255_v6  ;;  %v8455_v54 = vsel %vm11896_vm9, %v12257_v40, %v2155_v59  ;;  %v8470_v59 = vadd.s32 64, %v7857_v53  ;;  %v8481_v6 = vadd.s32 184, %v7857_v53  ;;  %v7370_v40 = vld [vmem:[#allocation2 + $0x144] ss:$8 sps:$4 sm:$0xff]  }
 0x17c   : > { %1965 = vmatpush1.bf16.msra.mxu1 %v7359_v63  ;;  %12256 = vst [vmem:[#allocation47_spill] sm:$0xff] %v8448_v13  ;;  %v7367_v63 = vld [vmem:[#allocation2 + $0x134] ss:$8 sps:$4 sm:$0xff]   ;;  %12258 = vst [vmem:[#allocation48_spill] sm:$0xff] %v8455_v54  ;;  %vm1389_vm15 = vcmp.ge.s32.totalorder %v12261_v15, 2  ;;  %v1380_v50 = vsel %vm1352_vm4, %v12264_v56, %v1324_v33  ;;  %v12265_v15 = vand.u32 15, %v8411_v36 }
 0x17d   : > { %1966 = vmatprep.subr.bf16.mxu1 %v7364_v46  ;;  %v12259_v46 = vpack.c.bf16 %v8110_v23, %v8116_v51  ;;  %12260 = vst [vmem:[#allocation49_spill] sm:$0xff] %v8470_v59  ;;  %v7365_v23 = vld [vmem:[#allocation2 + $0x130] ss:$8 sps:$4 sm:$0xff]   ;;  %v12262_v51 = vand.u32 15, %v8408_v48  ;;  %12263 = vst [vmem:[#allocation50_spill] sm:$0xff] %v8481_v6  ;;  %v8525_v13 = vadd.s32 80, %v7857_v53 }
 0x17e   : > { %5990 = vmatmul.mubr.msk.bf16.gmra.mrb[4].mxu1 %vm8424_vm13, %v5989_v28  ;;  %v1379_v28 = vsel %vm1352_vm4, %v1324_v33, %v1325_v30  ;;  %vm8489_vm1 = vcmp.ge.s32.totalorder %v12265_v15, 2  ;;  %vm8494_vm3 = vmpackc.low %vm11906_vm5, %vm1389_vm15  ;;  %v12271_v33 = vand.u32 15, %v8417_v29  ;;  %v2172_v29 = vrot.slane %v8074_v16, 7  ;;  %v7371_v36 = vld [vmem:[#allocation2 + $0x150] ss:$8 sps:$4 sm:$0xff]  }
 0x17f   : > { %6219 = vmatmul.mubr.msk.bf16.gmra.mrb[64].mxu0 %vm6217_vm14, %v12259_v46  ;;  %1741 = vmatprep.mubr.bf16.mxu1 %v12223_v62  ;;  %vm3525_vm0 = vcmp.lt.s32.totalorder %v12262_v51, 14  ;;  %v1326_v46 = vrot.slane %v7945_v45, 6  ;;  %v5992_v48 = vpack.c.bf16 %v1379_v28, %v1380_v50  ;;  %v7368_v28 = vld [vmem:[#allocation2 + $0x140] ss:$8 sps:$4 sm:$0xff]   ;;  %v7373_v45 = vld [vmem:[#allocation2 + $0x154] ss:$8 sps:$4 sm:$0xff]   ;;  %vm8597_vm12 = vmpackc.low %vm11906_vm5, %vm8489_vm1 }
 0x180   : > { %3901 = vmatprep.mubr.bf16.mxu0 %v12223_v62  ;;  %1967 = vmatpush1.bf16.msra.mxu1 %v7362_v38  ;;  %vm8506_vm6 = vcmp.lt.s32.totalorder %v12271_v33, 14  ;;  %vm8513_vm8 = vmpackc.low %vm3525_vm0, %vm11906_vm5  ;;  %v2171_v33 = vrot.slane %v8062_v39, 7  ;;  %v8554_v54 = vsel %vm11896_vm9, %v2172_v29, %v2173_v31  ;;  %v1329_v56 = vrot.slane %v7982_v14, 6 }
 0x181   : > { %1968 = vmatprep.subr.bf16.mxu1 %v7367_v63  ;;  %v12270_v63 = vrot.slane %v7970_v2, 6  ;;  %v1378_v50 = vsel %vm1352_vm4, %v1325_v30, %v1326_v46  ;;  %v2174_v30 = vrot.slane %v8067_v1, 7  ;;  %12279 = vst [vmem:[#allocation53_spill] sm:$0xff] %v8554_v54  ;;  %vm8618_vm13 = vmpackc.low %vm8506_vm6, %vm11906_vm5  ;;  %v12308_v51 = vand.u32 15, %v8525_v13 }
 0x183   : > { %v8502_v20 = vsel %vm1352_vm4, %v1326_v46, %v12270_v63  ;;  %v11849_v63 = vrot.slane %v8049_v27, 7  ;;  %v8534_v46 = vsel %vm11896_vm9, %v2171_v33, %v2172_v29  ;;  %v12283_v29 = vand.u32 15, %v8481_v6 }
 0x184   : > { %1969 = vmatpush1.bf16.msra.mxu1 %v7365_v23  ;;  %v2783_v23 = vrot.slane %v7885_v9, 1  ;;  %12276 = vst [vmem:[#allocation51_spill] sm:$0xff] %v8534_v46  ;;  %v2181_v46 = vrot.slane %v8198_v17, 7  ;;  %v12300_v6 = vpack.c.bf16 %v8192_v7, %v8196_v3  ;;  %v8675_v7 = vadd.s32 96, %v7857_v53  ;;  %v7377_v3 = vld [vmem:[#allocation2 + $0x170] ss:$8 sps:$4 sm:$0xff]  }
 0x185   : > { %1970 = vmatprep.subr.bf16.mxu1 %v7370_v40  ;;  %v8540_v15 = vsel %vm11896_vm9, %v11849_v63, %v2171_v33  ;;  %v12278_v40 = vpack.c.bf16 %v8173_v58, %v8153_v43  ;;  %v12280_v43 = vand.u32 15, %v8470_v59  ;;  %v2177_v33 = vrot.slane %v8118_v57, 7  ;;  %v7374_v59 = vld [vmem:[#allocation2 + $0x160] ss:$8 sps:$4 sm:$0xff]  }
 0x186   : > { %5993 = vmatmul.mubr.msk.bf16.gmra.mrb[8].mxu1 %vm8494_vm3, %v5992_v48  ;;  %12277 = vst [vmem:[#allocation52_spill] sm:$0xff] %v8540_v15  ;;  %v5995_v48 = vpack.c.bf16 %v8502_v20, %v1378_v50  ;;  %v2175_v20 = vrot.slane %v8127_v22, 7  ;;  %v2176_v50 = vrot.slane %v8147_v32, 7  ;;  %vm8569_vm11 = vcmp.lt.s32.totalorder %v12283_v29, 14 }
 0x187   : > { %6222 = vmatmul.mubr.msk.bf16.gmra.mrb[68].mxu0 %vm8513_vm8, %v12278_v40  ;;  %1751 = vmatprep.mubr.bf16.mxu1 %v12223_v62  ;;  %vm8559_vm10 = vcmp.ge.s32.totalorder %v12280_v43, 2  ;;  %v2178_v40 = vrot.slane %v8137_v21, 7  ;;  %v7376_v43 = vld [vmem:[#allocation2 + $0x164] ss:$8 sps:$4 sm:$0xff]   ;;  %v2179_v63 = vrot.slane %v8204_v24, 7  ;;  %v2180_v15 = vrot.slane %v8232_v25, 7  ;;  %vm6226_vm15 = vmpackc.low %vm8569_vm11, %vm11906_vm5 }
 0x188   : > { %3911 = vmatprep.mubr.bf16.mxu0 %v12223_v62  ;;  %1971 = vmatpush1.bf16.msra.mxu1 %v7368_v28  ;;  %v8575_v28 = vsel %vm11896_vm9, %v2173_v31, %v2174_v30  ;;  %v8584_v29 = vsel %vm11896_vm9, %v2175_v20, %v2176_v50  ;;  %v8605_v54 = vsel %vm11896_vm9, %v2176_v50, %v2177_v33  ;;  %v2184_v50 = vrot.slane %v8314_v10, 7  ;;  %vm5997_vm14 = vmpackc.low %vm11906_vm5, %vm8559_vm10 }
 0x189   : > { %1972 = vmatprep.subr.bf16.mxu1 %v7373_v45  ;;  %12286 = vst [vmem:[#allocation54_spill] sm:$0xff] %v8584_v29  ;;  %v8588_v45 = vsel %vm11896_vm9, %v2174_v30, %v2175_v20  ;;  %v8592_v31 = vsel %vm11896_vm9, %v2177_v33, %v2178_v40  ;;  %12290 = vst [vmem:[#allocation56_spill] sm:$0xff] %v8605_v54  ;;  %v8609_v30 = vsel %vm11896_vm9, %v2179_v63, %v2180_v15 }
 0x18a   : > { %12287 = vst [vmem:[#allocation55_spill] sm:$0xff] %v8588_v45  ;;  %12291 = vst [vmem:[#allocation57_spill] sm:$0xff] %v8609_v30  ;;  %v8613_v20 = vsel %vm11896_vm9, %v2178_v40, %v2179_v63  ;;  %v2182_v45 = vrot.slane %v8214_v35, 7  ;;  %v8629_v63 = vsel %vm11896_vm9, %v2180_v15, %v2181_v46  ;;  %v8633_v40 = vadd.s32 200, %v7857_v53 }
 0x18b   : > { %12292 = vst [vmem:[#allocation58_spill] sm:$0xff] %v8613_v20  ;;  %v2183_v29 = vrot.slane %v8303_v60, 7  ;;  %v2185_v15 = vrot.slane %v8326_v44, 7  ;;  %v12296_v20 = vrot.slane %v7879_v4, 1  ;;  %v11862_v38 = vand.u32 15, %v8675_v7 }
 0x18c   : > { %1973 = vmatpush1.bf16.msra.mxu1 %v7371_v36  ;;  %12295 = vst [vmem:[#allocation59_spill] sm:$0xff] %v8633_v40  ;;  %v7379_v36 = vld [vmem:[#allocation2 + $0x174] ss:$8 sps:$4 sm:$0xff]   ;;  %v8641_v33 = vsel %vm11896_vm9, %v2181_v46, %v2182_v45  ;;  %v1328_v46 = vrot.slane %v7979_v11, 6  ;;  %vm8725_vm0 = vcmp.ge.s32.totalorder %v12308_v51, 2  ;;  %v2800_v51 = vrot.slane %v8059_v42, 1 }
 0x18d   : > { %1974 = vmatprep.subr.bf16.mxu1 %v7376_v43  ;;  %v8648_v30 = vsel %vm11897_vm7, %v2783_v23, %v12296_v20  ;;  %v12298_v43 = vrot.slane %v7881_v5, 1  ;;  %v8667_v20 = vsel %vm11896_vm9, %v2183_v29, %v2184_v50  ;;  %vm8739_vm3 = vcmp.ge.s32.totalorder %v11862_v38, 2  ;;  %vm6000_vm6 = vmpackc.low %vm11906_vm5, %vm8725_vm0 }
 0x18e   : > { %5996 = vmatmul.mubr.msk.bf16.gmra.mrb[12].mxu1 %vm8597_vm12, %v5995_v48  ;;  %12297 = vst [vmem:[#allocation60_spill] sm:$0xff] %v8648_v30  ;;  %v1331_v48 = vrot.slane %v8003_v37, 6  ;;  %v2803_v38 = vrot.slane %v8147_v32, 1  ;;  %v3437_v30 = vrot.slane %v8303_v60, 2  ;;  %vm6003_vm10 = vmpackc.low %vm11906_vm5, %vm8739_vm3 }
 0x18f   : > { %v8654_v54 = vsel %vm11897_vm7, %v12298_v43, %v2783_v23  ;;  %6225 = vmatmul.mubr.msk.bf16.gmra.mrb[72].mxu0 %vm8618_vm13, %v12300_v6  ;;  %1761 = vmatprep.mubr.bf16.mxu1 %v12223_v62  ;;  %v8671_v23 = vsel %vm11896_vm9, %v2182_v45, %v2183_v29  ;;  %v12302_v43 = vrot.slane %v8298_v61, 7  ;;  %v8687_v29 = vsel %vm11896_vm9, %v2184_v50, %v2185_v15 }
 0x190   : > { %12299 = vst [vmem:[#allocation61_spill] sm:$0xff] %v8654_v54  ;;  %12301 = vst [vmem:[#allocation62_spill] sm:$0xff] %v8671_v23  ;;  %3921 = vmatprep.mubr.bf16.mxu0 %v12223_v62  ;;  %1975 = vmatpush1.bf16.msra.mxu1 %v7374_v59  ;;  %v1375_v45 = vsel %vm1352_vm4, %v1328_v46, %v1329_v56  ;;  %v8707_v59 = vadd.s32 112, %v7857_v53 }
 0x191   : > { %v8683_v6 = vsel %vm11896_vm9, %v2185_v15, %v12302_v43  ;;  %12304 = vst [vmem:[#allocation64_spill] sm:$0xff] %v8687_v29  ;;  %1976 = vmatprep.subr.bf16.mxu1 %v7379_v36  ;;  %v12305_v43 = vrot.slane %v7970_v2, 6  ;;  %v1330_v15 = vrot.slane %v7993_v26, 6  ;;  %v12306_v36 = vld [vmem:[#allocation26_spill] sm:$0xff] }
 0x192   : > { %12303 = vst [vmem:[#allocation63_spill] sm:$0xff] %v8683_v6  ;;  %v1332_v23 = vrot.slane %v12306_v36, 6 }
 0x193   : > { %v1376_v50 = vsel %vm1352_vm4, %v12305_v43, %v1328_v46  ;;  %v1373_v58 = vsel %vm1352_vm4, %v1330_v15, %v1331_v48  ;;  %v1374_v46 = vsel %vm1352_vm4, %v1329_v56, %v1330_v15  ;;  %v11865_v43 = vrot.slane %v8057_v34, 6 }
 0x194   : > { %v5998_v29 = vpack.c.bf16 %v1375_v45, %v1376_v50  ;;  %1977 = vmatpush1.bf16.msra.mxu1 %v7377_v3  ;;  %v12307_v45 = vpack.c.bf16 %v8246_v55, %v8183_v49  ;;  %v12311_v50 = vand.u32 15, %v8633_v40  ;;  %v6001_v15 = vpack.c.bf16 %v1373_v58, %v1374_v46 }
 0x195   : > { %v2801_v58 = vrot.slane %v8067_v1, 1  ;;  %v2802_v46 = vrot.slane %v8127_v22, 1  ;;  %v12316_v40 = vrot.slane %v8062_v39, 1  ;;  %v2807_v56 = vrot.slane %v8232_v25, 1 }
 0x196   : > { %5999 = vmatmul.mubr.msk.bf16.gmra.mrb[16].mxu1 %vm5997_vm14, %v5998_v29  ;;  %vm8731_vm1 = vcmp.lt.s32.totalorder %v12311_v50, 14  ;;  %v1371_v50 = vsel %vm1352_vm4, %v1332_v23, %v11865_v43  ;;  %v1372_v29 = vsel %vm1352_vm4, %v1331_v48, %v1332_v23  ;;  %v2804_v43 = vrot.slane %v8118_v57, 1 }
 0x197   : > { %6228 = vmatmul.mubr.msk.bf16.gmra.mrb[76].mxu0 %vm6226_vm15, %v12307_v45  ;;  %1771 = vmatprep.mubr.bf16.mxu1 %v12223_v62  ;;  %v2799_v45 = vrot.slane %v8074_v16, 1  ;;  %v8774_v23 = vsel %vm11897_vm7, %v2801_v58, %v2802_v46  ;;  %v8778_v6 = vsel %vm11897_vm7, %v2800_v51, %v2801_v58  ;;  %vm6229_vm8 = vmpackc.low %vm8731_vm1, %vm11906_vm5  ;;  %v2805_v48 = vrot.slane %v8137_v21, 1 }
 0x198   : > { %3931 = vmatprep.mubr.bf16.mxu0 %v12223_v62  ;;  %12318 = vst [vmem:[#allocation65_spill] sm:$0xff] %v8774_v23  ;;  %12319 = vst [vmem:[#allocation66_spill] sm:$0xff] %v8778_v6  ;;  %v8787_v3 = vsel %vm11897_vm7, %v2803_v38, %v2804_v43  ;;  %v2806_v58 = vrot.slane %v8204_v24, 1  ;;  %v2809_v6 = vrot.slane %v8214_v35, 1  ;;  %v12322_v23 = vld [vmem:[#allocation38_spill] sm:$0xff] }
 0x199   : > { %v8757_v49 = vsel %vm11897_vm7, %v2799_v45, %v2800_v51  ;;  %v8763_v54 = vsel %vm11897_vm7, %v12316_v40, %v2799_v45  ;;  %12320 = vst [vmem:[#allocation67_spill] sm:$0xff] %v8787_v3  ;;  %v8791_v45 = vsel %vm11897_vm7, %v2802_v46, %v2803_v38  ;;  %v8801_v40 = vsel %vm11897_vm7, %v2804_v43, %v2805_v48 }
 0x19a   : > { %12317 = vst [vmem:[#allocation26_spill] sm:$0xff] %v8763_v54  ;;  %12321 = vst [vmem:[#allocation68_spill] sm:$0xff] %v8791_v45  ;;  %v2808_v54 = vrot.slane %v8198_v17, 1  ;;  %v2810_v38 = vrot.slane %v8303_v60, 1  ;;  %v2811_v46 = vrot.slane %v8314_v10, 1  ;;  %v12323_v51 = vpack.c.bf16 %v8270_v18, %v12322_v23 }
 0x19b   : > { %v8812_v45 = vsel %vm11897_vm7, %v2805_v48, %v2806_v58  ;;  %v2812_v3 = vrot.slane %v8326_v44, 1  ;;  %v2813_v23 = vrot.slane %v8298_v61, 1 }
 0x19c   : > { %v8816_v43 = vsel %vm11897_vm7, %v2807_v56, %v2808_v54  ;;  %v8829_v48 = vsel %vm11897_vm7, %v2809_v6, %v2810_v38  ;;  %v8843_v18 = vsel %vm11897_vm7, %v2810_v38, %v2811_v46 }
 0x19d   : > { %12324 = vst [vmem:[#allocation38_spill] sm:$0xff] %v8816_v43  ;;  %12326 = vst [vmem:[#allocation70_spill] sm:$0xff] %v8829_v48  ;;  %v12330_v43 = vrot.slane %v8214_v35, 2  ;;  %v8861_v38 = vsel %vm11897_vm7, %v2812_v3, %v2813_v23 }
 0x19e   : > { %6002 = vmatmul.mubr.msk.bf16.gmra.mrb[20].mxu1 %vm6000_vm6, %v6001_v15  ;;  %v8820_v15 = vsel %vm11897_vm7, %v2806_v58, %v2807_v56  ;;  %v8839_v56 = vsel %vm11897_vm7, %v2811_v46, %v2812_v3  ;;  %12329 = vst [vmem:[#allocation73_spill] sm:$0xff] %v8843_v18  ;;  %v3439_v58 = vrot.slane %v8326_v44, 2  ;;  %v12332_v46 = vrot.slane %v7881_v5, 1 }
 0x19f   : > { %6231 = vmatmul.mubr.msk.bf16.gmra.mrb[80].mxu0 %vm6229_vm8, %v12323_v51  ;;  %1781 = vmatprep.mubr.bf16.mxu1 %v12223_v62  ;;  %12325 = vst [vmem:[#allocation69_spill] sm:$0xff] %v8820_v15  ;;  %v8833_v51 = vsel %vm11897_vm7, %v2808_v54, %v2809_v6  ;;  %12328 = vst [vmem:[#allocation72_spill] sm:$0xff] %v8839_v56  ;;  %v8852_v54 = vsel %vm3441_vm2, %v12330_v43, %v3437_v30  ;;  %v3438_v6 = vrot.slane %v8314_v10, 2  ;;  %v7398_v43 = vld [vmem:[#allocation2 + $0xe0] ss:$8 sps:$4 sm:$0xff]  }
 0x1a0   : > { %12327 = vst [vmem:[#allocation71_spill] sm:$0xff] %v8833_v51  ;;  %12331 = vst [vmem:[#allocation74_spill] sm:$0xff] %v8852_v54  ;;  %v8867_v15 = vsel %vm11897_vm7, %v2813_v23, %v12332_v46  ;;  %v3440_v56 = vrot.slane %v8298_v61, 2  ;;  %v6004_v51 = vpack.c.bf16 %v1371_v50, %v1372_v29  ;;  %v12337_v29 = vrot.slane %v7881_v5, 2 }
 0x1a1   : > { %v8876_v48 = vsel %vm3441_vm2, %v3438_v6, %v3439_v58  ;;  %v8880_v3 = vsel %vm3441_vm2, %v3437_v30, %v3438_v6  ;;  %v1334_v30 = vrot.slane %v8043_v12, 6  ;;  %v12339_v6 = vand.u32 15, %v8707_v59 }
 0x1a2   : > { %12334 = vst [vmem:[#allocation75_spill] sm:$0xff] %v8876_v48  ;;  %12335 = vst [vmem:[#allocation76_spill] sm:$0xff] %v8880_v3  ;;  %v8886_v46 = vsel %vm3441_vm2, %v3439_v58, %v3440_v56  ;;  %v8892_v50 = vsel %vm3441_vm2, %v3440_v56, %v12337_v29  ;;  %v8901_v58 = vadd.s32 128, %v7857_v53  ;;  %v12340_v23 = vrot.slane %v8049_v27, 6 }
 0x1a3   : > { %12336 = vst [vmem:[#allocation77_spill] sm:$0xff] %v8886_v46  ;;  %12338 = vst [vmem:[#allocation78_spill] sm:$0xff] %v8892_v50  ;;  %vm1399_vm11 = vcmp.ge.s32.totalorder %v12339_v6, 2  ;;  %v8917_v6 = vadd.s32 144, %v7857_v53  ;;  %v12342_v46 = vld [vmem:[#allocation29_spill] sm:$0xff]  ;;  %v12346_v50 = vld [vmem:[#allocation31_spill] sm:$0xff] }
 0x1a4   : > { %v1369_v56 = vsel %vm1352_vm4, %v1334_v30, %v12340_v23  ;;  %vm6006_vm2 = vmpackc.low %vm11906_vm5, %vm1399_vm11  ;;  %v11880_v55 = vand.u32 15, %v8901_v58 }
 0x1a5   : > { %v11883_v23 = vand.u32 15, %v8917_v6 }
 0x1a6   : > { %6005 = vmatmul.mubr.msk.bf16.gmra.mrb[24].mxu1 %vm6003_vm10, %v6004_v51  ;;  %v12341_v51 = vrot.slane %v8057_v34, 6  ;;  %vm1401_vm12 = vcmp.ge.s32.totalorder %v11880_v55, 2  ;;  %v12345_v55 = vld [vmem:[#allocation32_spill] sm:$0xff] }
 0x1a7   : > { %1791 = vmatprep.mubr.bf16.mxu1 %v12223_v62  ;;  %vm6009_vm13 = vmpackc.low %vm11906_vm5, %vm1401_vm12  ;;  %v12347_v3 = vpack.c.bf16 %v12345_v55, %v12346_v50  ;;  %v8950_v55 = vadd.s32 192, %v7857_v53  ;;  %v12351_v50 = vld [vmem:[#allocation39_spill] sm:$0xff] }
 0x1a8   : > { %v1370_v29 = vsel %vm1352_vm4, %v12341_v51, %v1334_v30  ;;  %v12343_v30 = vld [vmem:[#allocation30_spill] sm:$0xff]  ;;  %vm1403_vm4 = vcmp.ge.s32.totalorder %v11883_v23, 2 }
 0x1a9   : > { %v6007_v18 = vpack.c.bf16 %v1369_v56, %v1370_v29  ;;  %v12344_v51 = vpack.c.bf16 %v12342_v46, %v12343_v30  ;;  %v7382_v56 = vld [vmem:[#allocation2 + $0x84] ss:$8 sps:$4 sm:$0xff]   ;;  %vm6012_vm14 = vmpackc.low %vm11906_vm5, %vm1403_vm4  ;;  %v8939_v46 = vadd.s32 176, %v7857_v53 }
 0x1aa   : > { %2525 = vmatprep.subr.bf16.mxu1 %v7382_v56  ;;  %v12349_v56 = vld [vmem:[#allocation34_spill] sm:$0xff] }
 0x1ab   : > { %v11887_v30 = vand.u32 15, %v8939_v46 }
 0x1ad   : > { %vm1407_vm1 = vcmp.ge.s32.totalorder %v11887_v30, 2 }
 0x1ae   : > { %6008 = vmatmul.mubr.msk.bf16.gmra.mrb[28].mxu1 %vm6006_vm2, %v6007_v18  ;;  %v8928_v18 = vadd.s32 160, %v7857_v53  ;;  %vm6018_vm3 = vmpackc.low %vm11906_vm5, %vm1407_vm1 }
 0x1af   : > { %1801 = vmatprep.mubr.bf16.mxu1 %v12223_v62 }
 0x1b0   : > { %v11884_v29 = vand.u32 15, %v8928_v18 }
 0x1b2   : > { %vm1405_vm15 = vcmp.ge.s32.totalorder %v11884_v29, 2  ;;  %v12352_v29 = vld [vmem:[#allocation36_spill] sm:$0xff] }
 0x1b3   : > { %vm6015_vm0 = vmpackc.low %vm11906_vm5, %vm1405_vm15  ;;  %v12353_v48 = vpack.c.bf16 %v12351_v50, %v12352_v29  ;;  %v12355_v50 = vld [vmem:[#allocation42_spill] sm:$0xff] }
 0x1b6   : > { %6011 = vmatmul.mubr.msk.bf16.gmra.mrb[32].mxu1 %vm6009_vm13, %v12344_v51  ;;  %v12348_v51 = vld [vmem:[#allocation35_spill] sm:$0xff] }
 0x1b7   : > { %1811 = vmatprep.mubr.bf16.mxu1 %v12223_v62  ;;  %v12350_v23 = vpack.c.bf16 %v12348_v51, %v12349_v56  ;;  %v12354_v56 = vpack.c.bf16 %v8323_v52, %v8330_v8  ;;  %v8983_v52 = vadd.s32 240, %v7857_v53 }
 0x1b9   : > { %v11890_v8 = vand.u32 15, %v8983_v52 }
 0x1bb   : > { %vm1415_vm13 = vcmp.ge.s32.totalorder %v11890_v8, 2  ;;  %v12363_v8 = vld [vmem:[#allocation20_spill] sm:$0xff] }
 0x1bc   : > { %vm6030_vm4 = vmpackc.low %vm11906_vm5, %vm1415_vm13 }
 0x1be   : > { %6014 = vmatmul.mubr.msk.bf16.gmra.mrb[36].mxu1 %vm6012_vm14, %v12347_v3  ;;  %v11886_v3 = vand.u32 15, %v8950_v55 }
 0x1bf   : > { %1821 = vmatprep.mubr.bf16.mxu1 %v12223_v62 }
 0x1c0   : > { %vm1409_vm6 = vcmp.ge.s32.totalorder %v11886_v3, 2  ;;  %v12356_v3 = vld [vmem:[#allocation40_spill] sm:$0xff] }
 0x1c1   : > { %vm6021_vm8 = vmpackc.low %vm11906_vm5, %vm1409_vm6  ;;  %v12357_v30 = vpack.c.bf16 %v12355_v50, %v12356_v3  ;;  %v7380_v3 = vld [vmem:[#allocation2 + $0x80] ss:$8 sps:$4 sm:$0xff]   ;;  %v7385_v50 = vld [vmem:[#allocation2 + $0x94] ss:$8 sps:$4 sm:$0xff]  }
 0x1c6   : > { %6017 = vmatmul.mubr.msk.bf16.gmra.mrb[40].mxu1 %vm6015_vm0, %v12350_v23  ;;  %v8961_v23 = vadd.s32 208, %v7857_v53 }
 0x1c7   : > { %1831 = vmatprep.mubr.bf16.mxu1 %v12223_v62 }
 0x1c8   : > { %v11888_v51 = vand.u32 15, %v8961_v23 }
 0x1ca   : > { %vm1411_vm10 = vcmp.ge.s32.totalorder %v11888_v51, 2 }
 0x1cb   : > { %vm6024_vm11 = vmpackc.low %vm11906_vm5, %vm1411_vm10 }
 0x1ce   : > { %6020 = vmatmul.mubr.msk.bf16.gmra.mrb[44].mxu1 %vm6018_vm3, %v12353_v48  ;;  %v8972_v48 = vadd.s32 224, %v7857_v53 }
 0x1cf   : > { %1841 = vmatprep.mubr.bf16.mxu1 %v12223_v62 }
 0x1d0   : > { %v11889_v29 = vand.u32 15, %v8972_v48 }
 0x1d2   : > { %vm1413_vm2 = vcmp.ge.s32.totalorder %v11889_v29, 2  ;;  %v12361_v29 = vpack.c.bf16 %v7885_v9, %v7881_v5  ;;  %v7394_v5 = vld [vmem:[#allocation2 + $0xc4] ss:$8 sps:$4 sm:$0xff]  }
 0x1d3   : > { %vm6027_vm12 = vmpackc.low %vm11906_vm5, %vm1413_vm2 }
 0x1d6   : > { %6023 = vmatmul.mubr.msk.bf16.gmra.mrb[48].mxu1 %vm6021_vm8, %v12354_v56  ;;  %v12358_v56 = vld [vmem:[#allocation43_spill] sm:$0xff] }
 0x1d7   : > { %1851 = vmatprep.mubr.bf16.mxu1 %v12223_v62  ;;  %v12359_v51 = vpack.c.bf16 %v8392_v0, %v12358_v56  ;;  %v7383_v0 = vld [vmem:[#allocation2 + $0x90] ss:$8 sps:$4 sm:$0xff]   ;;  %v7386_v56 = vld [vmem:[#allocation2 + $0xa0] ss:$8 sps:$4 sm:$0xff]  }
 0x1de   : > { %6026 = vmatmul.mubr.msk.bf16.gmra.mrb[52].mxu1 %vm6024_vm11, %v12357_v30  ;;  %v12360_v30 = vpack.c.bf16 %v8400_v41, %v8404_v47  ;;  %v1288_v41 = vpack.c.bf16 %v7902_v19, %v7879_v4  ;;  %v7391_v47 = vld [vmem:[#allocation2 + $0xb4] ss:$8 sps:$4 sm:$0xff]  }
 0x1df   : > { %1861 = vmatprep.mubr.bf16.mxu1 %v12223_v62 }
 0x1e6   : > { %6029 = vmatmul.mubr.msk.bf16.gmra.mrb[56].mxu1 %vm6027_vm12, %v12359_v51  ;;  %v7388_v51 = vld [vmem:[#allocation2 + $0xa4] ss:$8 sps:$4 sm:$0xff]  }
 0x1e7   : > { %1871 = vmatprep.mubr.bf16.mxu1 %v12223_v62 }
 0x1ee   : > { %6032 = vmatmul.mubr.msk.bf16.gmra.mrb[60].mxu1 %vm6030_vm4, %v12360_v30  ;;  %v7389_v30 = vld [vmem:[#allocation2 + $0xb0] ss:$8 sps:$4 sm:$0xff]  }
 0x1ef   : > { %1994 = vmatprep.mubr.bf16.mxu1 %v12223_v62 }
 0x1f6   : > { %1995 = vmatmul.mubr.bf16.vlgmr.msra.gmra.mrb[0].mxu1 %v12361_v29  ;;  %v7392_v29 = vld [vmem:[#allocation2 + $0xc0] ss:$8 sps:$4 sm:$0xff]  }
 0x1f7   : > { %2004 = vmatprep.mubr.bf16.mxu1 %v12223_v62  ;;  %2526 = vmatpush1.bf16.msra.mxu1 %v7380_v3  ;;  %v12362_v3 = vld [vmem:[#allocation18_spill] sm:$0xff] }
 0x1f8   : > { %2527 = vmatprep.subr.bf16.mxu1 %v7385_v50  ;;  %v1289_v50 = vpack.c.bf16 %v12363_v8, %v12362_v3 }
 0x1fb   : > { %2528 = vmatpush1.bf16.msra.mxu1 %v7383_v0  ;;  %v7397_v0 = vld [vmem:[#allocation2 + $0xd4] ss:$8 sps:$4 sm:$0xff]  }
 0x1fc   : > { %2529 = vmatprep.subr.bf16.mxu1 %v7388_v51  ;;  %v7395_v51 = vld [vmem:[#allocation2 + $0xd0] ss:$8 sps:$4 sm:$0xff]  }
 0x1fe   : > { %2005 = vmatmul.mubr.bf16.gmra.mrb[4].mxu1 %v1288_v41  ;;  %v7400_v41 = vld [vmem:[#allocation2 + $0xe4] ss:$8 sps:$4 sm:$0xff]  }
 0x1ff   : > { %2014 = vmatprep.mubr.bf16.mxu1 %v12223_v62  ;;  %2530 = vmatpush1.bf16.msra.mxu1 %v7386_v56  ;;  %v12364_v56 = vld [vmem:[#allocation21_spill] sm:$0xff] }
 0x200   : > { %2531 = vmatprep.subr.bf16.mxu1 %v7391_v47  ;;  %v1290_v47 = vpack.c.bf16 %v7970_v2, %v12364_v56 }
 0x203   : > { %2532 = vmatpush1.bf16.msra.mxu1 %v7389_v30  ;;  %v7403_v30 = vld [vmem:[#allocation2 + $0xf4] ss:$8 sps:$4 sm:$0xff]  }
 0x204   : > { %2533 = vmatprep.subr.bf16.mxu1 %v7394_v5  ;;  %v7401_v5 = vld [vmem:[#allocation2 + $0xf0] ss:$8 sps:$4 sm:$0xff]  }
 0x206   : > { %2015 = vmatmul.mubr.bf16.gmra.mrb[8].mxu1 %v1289_v50 }
 0x207   : > { %2024 = vmatprep.mubr.bf16.mxu1 %v12223_v62  ;;  %2534 = vmatpush1.bf16.msra.mxu1 %v7392_v29 }
 0x208   : > { %2535 = vmatprep.subr.bf16.mxu1 %v7397_v0  ;;  %v1291_v0 = vpack.c.bf16 %v7982_v14, %v7979_v11 }
 0x20b   : > { %2536 = vmatpush1.bf16.msra.mxu1 %v7395_v51 }
 0x20c   : > { %2537 = vmatprep.subr.bf16.mxu1 %v7400_v41 }
 0x20e   : > { %2025 = vmatmul.mubr.bf16.gmra.mrb[12].mxu1 %v1290_v47 }
 0x20f   : > { %2034 = vmatprep.mubr.bf16.mxu1 %v12223_v62  ;;  %2538 = vmatpush1.bf16.msra.mxu1 %v7398_v43 }
 0x210   : > { %2539 = vmatprep.subr.bf16.mxu1 %v7403_v30  ;;  %v9011_v50 = vpop.f32.mrb[32].mxu0  ;;  %v1292_v30 = vpack.c.bf16 %v8003_v37, %v7993_v26 }
 0x211   : > { %v9013_v54 = vpop.f32.mrb[33].mxu0 }
 0x212   : > { %12365 = vst [vmem:[#allocation29_spill] sm:$0xff] %v9013_v54  ;;  %v9015_v29 = vpop.f32.mrb[34].mxu0 }
 0x213   : > { %2540 = vmatpush1.bf16.msra.mxu1 %v7401_v5  ;;  %12366 = vst [vmem:[#allocation30_spill] sm:$0xff] %v9015_v29  ;;  %v9019_v51 = vpop.f32.mrb[35].mxu0 }
 0x214   : > { %12367 = vst [vmem:[#allocation32_spill] sm:$0xff] %v9019_v51 }
 0x216   : > { %2035 = vmatmul.mubr.bf16.gmra.mrb[16].mxu1 %v1291_v0 }
 0x217   : > { %2044 = vmatprep.mubr.bf16.mxu1 %v12223_v62 }
 0x218   : > { %v9022_v41 = vpop.f32.mrb[36].mxu0 }
 0x219   : > { %12368 = vst [vmem:[#allocation31_spill] sm:$0xff] %v9022_v41  ;;  %v9024_v43 = vpop.f32.mrb[37].mxu0  ;;  %v1293_v41 = vpack.c.bf16 %v8057_v34, %v12306_v36 }
 0x21a   : > { %12369 = vst [vmem:[#allocation35_spill] sm:$0xff] %v9024_v43  ;;  %v9026_v47 = vpop.f32.mrb[38].mxu0 }
 0x21b   : > { %12370 = vst [vmem:[#allocation34_spill] sm:$0xff] %v9026_v47  ;;  %v9030_v5 = vpop.f32.mrb[39].mxu0 }
 0x21c   : > { %12371 = vst [vmem:[#allocation39_spill] sm:$0xff] %v9030_v5 }
 0x21e   : > { %2045 = vmatmul.mubr.bf16.gmra.mrb[20].mxu1 %v1292_v30 }
 0x21f   : > { %2054 = vmatprep.mubr.bf16.mxu1 %v12223_v62 }
 0x220   : > { %v9033_v29 = vpop.f32.mrb[40].mxu0 }
 0x221   : > { %12372 = vst [vmem:[#allocation36_spill] sm:$0xff] %v9033_v29  ;;  %v9035_v51 = vpop.f32.mrb[41].mxu0  ;;  %v1294_v29 = vpack.c.bf16 %v8049_v27, %v8043_v12 }
 0x222   : > { %12373 = vst [vmem:[#allocation42_spill] sm:$0xff] %v9035_v51  ;;  %v9037_v0 = vpop.f32.mrb[42].mxu0 }
 0x223   : > { %12374 = vst [vmem:[#allocation40_spill] sm:$0xff] %v9037_v0  ;;  %v9041_v43 = vpop.f32.mrb[43].mxu0 }
 0x224   : > { %12375 = vst [vmem:[#allocation43_spill] sm:$0xff] %v9041_v43 }
 0x226   : > { %2055 = vmatmul.mubr.bf16.gmra.mrb[24].mxu1 %v1293_v41 }
 0x227   : > { %2064 = vmatprep.mubr.bf16.mxu1 %v12223_v62 }
 0x228   : > { %v9044_v47 = vpop.f32.mrb[44].mxu0 }
 0x229   : > { %12376 = vst [vmem:[#allocation18_spill] sm:$0xff] %v9044_v47  ;;  %v9046_v5 = vpop.f32.mrb[45].mxu0 }
 0x22a   : > { %12377 = vst [vmem:[#allocation20_spill] sm:$0xff] %v9046_v5  ;;  %v9048_v30 = vpop.f32.mrb[46].mxu0  ;;  %v12383_v5 = vpack.c.bf16 %v8074_v16, %v8062_v39 }
 0x22b   : > { %12378 = vst [vmem:[#allocation21_spill] sm:$0xff] %v9048_v30  ;;  %v9052_v51 = vpop.f32.mrb[47].mxu0  ;;  %v7406_v30 = vld [vmem:[#allocation2 + $0x184] ss:$8 sps:$4 sm:$0xff]  }
 0x22c   : > { %12379 = vst [vmem:[#allocation79_spill] sm:$0xff] %v9052_v51  ;;  %3152 = vmatprep.subr.bf16.mxu1 %v7406_v30 }
 0x22e   : > { %2065 = vmatmul.mubr.bf16.gmra.mrb[28].mxu1 %v1294_v29 }
 0x22f   : > { %2074 = vmatprep.mubr.bf16.mxu1 %v12223_v62 }
 0x230   : > { %v9055_v0 = vpop.f32.mrb[48].mxu0 }
 0x231   : > { %v9057_v43 = vpop.f32.mrb[49].mxu0 }
 0x232   : > { %12380 = vst [vmem:[#allocation80_spill] sm:$0xff] %v9057_v43  ;;  %v9059_v41 = vpop.f32.mrb[50].mxu0  ;;  %v1296_v43 = vpack.c.bf16 %v8067_v1, %v8059_v42 }
 0x233   : > { %12381 = vst [vmem:[#allocation81_spill] sm:$0xff] %v9059_v41  ;;  %v9061_v54 = vpop.f32.mrb[51].mxu0 }
 0x234   : > { %12382 = vst [vmem:[#allocation82_spill] sm:$0xff] %v9061_v54 }
 0x236   : > { %2075 = vmatmul.mubr.bf16.gmra.mrb[32].mxu1 %v12383_v5 }
 0x237   : > { %2084 = vmatprep.mubr.bf16.mxu1 %v12223_v62 }
 0x238   : > { %v9067_v51 = vpop.f32.mrb[52].mxu0 }
 0x239   : > { %v9069_v29 = vpop.f32.mrb[53].mxu0 }
 0x23a   : > { %12384 = vst [vmem:[#allocation83_spill] sm:$0xff] %v9069_v29  ;;  %v9071_v47 = vpop.f32.mrb[54].mxu0  ;;  %v12388_v29 = vpack.c.bf16 %v8147_v32, %v8127_v22 }
 0x23b   : > { %v9075_v41 = vpop.f32.mrb[55].mxu0 }
 0x23c   : > { %12385 = vst [vmem:[#allocation84_spill] sm:$0xff] %v9075_v41 }
 0x23e   : > { %2085 = vmatmul.mubr.bf16.gmra.mrb[36].mxu1 %v1296_v43 }
 0x23f   : > { %2094 = vmatprep.mubr.bf16.mxu1 %v12223_v62 }
 0x240   : > { %v9078_v16 = vpop.f32.mrb[56].mxu0 }
 0x241   : > { %v9080_v5 = vpop.f32.mrb[57].mxu0 }
 0x242   : > { %12386 = vst [vmem:[#allocation85_spill] sm:$0xff] %v9080_v5  ;;  %v9082_v54 = vpop.f32.mrb[58].mxu0  ;;  %v12391_v5 = vpack.c.bf16 %v8137_v21, %v8118_v57 }
 0x243   : > { %v9084_v30 = vpop.f32.mrb[59].mxu0 }
 0x244   : > { %12387 = vst [vmem:[#allocation86_spill] sm:$0xff] %v9084_v30 }
 0x246   : > { %2095 = vmatmul.mubr.bf16.gmra.mrb[40].mxu1 %v12388_v29 }
 0x247   : > { %2104 = vmatprep.mubr.bf16.mxu1 %v12223_v62 }
 0x24a   : > { %v9090_v42 = vpop.f32.mrb[60].mxu0 }
 0x24b   : > { %v9092_v1 = vpop.f32.mrb[61].mxu0 }
 0x24c   : > { %12389 = vst [vmem:[#allocation87_spill] sm:$0xff] %v9092_v1  ;;  %v9094_v43 = vpop.f32.mrb[62].mxu0  ;;  %v12394_v1 = vpack.c.bf16 %v8232_v25, %v8204_v24 }
 0x24d   : > { %v9096_v41 = vpop.f32.mrb[63].mxu0 }
 0x24e   : > { %12390 = vst [vmem:[#allocation88_spill] sm:$0xff] %v9096_v41  ;;  %2105 = vmatmul.mubr.bf16.gmra.mrb[44].mxu1 %v12391_v5 }
 0x24f   : > { %2114 = vmatprep.mubr.bf16.mxu1 %v12223_v62 }
 0x252   : > { %v9102_v30 = vpop.f32.mrb[64].mxu0 }
 0x253   : > { %v9104_v22 = vpop.f32.mrb[65].mxu0 }
 0x254   : > { %12392 = vst [vmem:[#allocation89_spill] sm:$0xff] %v9104_v22  ;;  %v9106_v32 = vpop.f32.mrb[66].mxu0  ;;  %v12398_v22 = vpack.c.bf16 %v8214_v35, %v8198_v17 }
 0x255   : > { %v9108_v29 = vpop.f32.mrb[67].mxu0 }
 0x256   : > { %12393 = vst [vmem:[#allocation90_spill] sm:$0xff] %v9108_v29  ;;  %2115 = vmatmul.mubr.bf16.gmra.mrb[48].mxu1 %v12394_v1 }
 0x257   : > { %2124 = vmatprep.mubr.bf16.mxu1 %v12223_v62 }
 0x25a   : > { %v9114_v41 = vpop.f32.mrb[68].mxu0 }
 0x25b   : > { %v9116_v57 = vpop.f32.mrb[69].mxu0 }
 0x25c   : > { %12395 = vst [vmem:[#allocation91_spill] sm:$0xff] %v9116_v57  ;;  %v9118_v21 = vpop.f32.mrb[70].mxu0  ;;  %v12403_v57 = vpack.c.bf16 %v8314_v10, %v8303_v60 }
 0x25d   : > { %12396 = vst [vmem:[#allocation92_spill] sm:$0xff] %v9118_v21  ;;  %v9120_v5 = vpop.f32.mrb[71].mxu0  ;;  %v12422_v21 = vrot.slane %v7885_v9, 7  ;;  %v2159_v9 = vrot.slane %v12362_v3, 7 }
 0x25e   : > { %12397 = vst [vmem:[#allocation93_spill] sm:$0xff] %v9120_v5  ;;  %2125 = vmatmul.mubr.bf16.gmra.mrb[52].mxu1 %v12398_v22 }
 0x25f   : > { %2134 = vmatprep.mubr.bf16.mxu1 %v12223_v62 }
 0x262   : > { %v9126_v29 = vpop.f32.mrb[72].mxu0 }
 0x263   : > { %12399 = vst [vmem:[#allocation94_spill] sm:$0xff] %v9126_v29  ;;  %v9128_v24 = vpop.f32.mrb[73].mxu0 }
 0x264   : > { %12400 = vst [vmem:[#allocation95_spill] sm:$0xff] %v9128_v24  ;;  %v9130_v25 = vpop.f32.mrb[74].mxu0  ;;  %v12408_v24 = vpack.c.bf16 %v8298_v61, %v8326_v44  ;;  %v2158_v44 = vrot.slane %v7902_v19, 7 }
 0x265   : > { %12401 = vst [vmem:[#allocation96_spill] sm:$0xff] %v9130_v25  ;;  %v9132_v1 = vpop.f32.mrb[75].mxu0  ;;  %v12420_v25 = vld [vmem:[#allocation28_spill] sm:$0xff] }
 0x266   : > { %12402 = vst [vmem:[#allocation97_spill] sm:$0xff] %v9132_v1  ;;  %2135 = vmatmul.mubr.bf16.gmra.mrb[56].mxu1 %v12403_v57  ;;  %v12409_v1 = vand.u32 15, %v7857_v53  ;;  %v12412_v57 = vmov 0  ;;  %v12421_v29 = vand.u32 15, %v12420_v25  ;;  %v2160_v25 = vrot.slane %v12363_v8, 7 }
 0x267   : > { %2144 = vmatprep.mubr.bf16.mxu1 %v12223_v62 }
 0x268   : > { %vm2220_vm14 = vcmp.ge.s32.totalorder %v12409_v1, 1  ;;  %vm2222_vm0 = vcmp.ge.s32.totalorder %v12421_v29, 1  ;;  %v7415_v29 = vld [vmem:[#allocation2 + $0x1b4] ss:$8 sps:$4 sm:$0xff]  }
 0x269   : > { %vm9157_vm15 = vmpackc.low %vm11906_vm5, %vm2220_vm14 }
 0x26a   : > { %v9138_v5 = vpop.f32.mrb[76].mxu0  ;;  %v12413_v57 = vsel %vm9157_vm15, 4294967295, %v12412_v57  ;;  %vm9182_vm1 = vmpackc.low %vm11906_vm5, %vm2222_vm0 }
 0x26b   : > { %12404 = vst [vmem:[#allocation98_spill] sm:$0xff] %v9138_v5  ;;  %v9140_v17 = vpop.f32.mrb[77].mxu0  ;;  %12414 = vst [vmem:[#allocation104_spill] sm:$0xff] %v12413_v57  ;;  %v12418_v5 = vld [vmem:[#allocation48_spill] sm:$0xff] }
 0x26c   : > { %12405 = vst [vmem:[#allocation99_spill] sm:$0xff] %v9140_v17  ;;  %v9142_v35 = vpop.f32.mrb[78].mxu0  ;;  %v7409_v17 = vld [vmem:[#allocation2 + $0x194] ss:$8 sps:$4 sm:$0xff]  }
 0x26d   : > { %12406 = vst [vmem:[#allocation100_spill] sm:$0xff] %v9142_v35  ;;  %v9144_v22 = vpop.f32.mrb[79].mxu0  ;;  %v7404_v35 = vld [vmem:[#allocation2 + $0x180] ss:$8 sps:$4 sm:$0xff]  }
 0x26e   : > { %12407 = vst [vmem:[#allocation101_spill] sm:$0xff] %v9144_v22  ;;  %2145 = vmatmul.mubr.bf16.gmra.mrb[60].mxu1 %v12408_v24  ;;  %v12417_v24 = vld [vmem:[#allocation47_spill] sm:$0xff] }
 0x26f   : > { %2557 = vmatprep.mubr.bf16.mxu1 %v12223_v62  ;;  %v12419_v1 = vpack.c.bf16 %v12417_v24, %v12418_v5  ;;  %v12423_v24 = vmov 0 }
 0x270   : > { %v12424_v24 = vsel %vm9182_vm1, 4294967295, %v12423_v24 }
 0x271   : > { %12425 = vst [vmem:[#allocation47_spill] sm:$0xff] %v12424_v24  ;;  %v7421_v24 = vld [vmem:[#allocation2 + $0x1d4] ss:$8 sps:$4 sm:$0xff]  }
 0x272   : > { %v9152_v10 = vpop.f32.mrb[80].mxu0 }
 0x273   : > { %12410 = vst [vmem:[#allocation102_spill] sm:$0xff] %v9152_v10  ;;  %v9154_v60 = vpop.f32.mrb[81].mxu0  ;;  %v7407_v10 = vld [vmem:[#allocation2 + $0x190] ss:$8 sps:$4 sm:$0xff]  }
 0x274   : > { %12411 = vst [vmem:[#allocation103_spill] sm:$0xff] %v9154_v60  ;;  %v9161_v22 = vpop.f32.mrb[82].mxu0  ;;  %v2157_v60 = vrot.slane %v7879_v4, 7 }
 0x275   : > { %12415 = vst [vmem:[#allocation105_spill] sm:$0xff] %v9161_v22  ;;  %v9163_v61 = vpop.f32.mrb[83].mxu0  ;;  %v7412_v22 = vld [vmem:[#allocation2 + $0x1a4] ss:$8 sps:$4 sm:$0xff]  }
 0x276   : > { %12416 = vst [vmem:[#allocation106_spill] sm:$0xff] %v9163_v61  ;;  %6067 = vmatmul.mubr.msk.bf16.vlgmr.msra.gmra.mrb[0].mxu1 %vm9157_vm15, %v12419_v1  ;;  %v2216_v61 = vsel %vm11896_vm9, %v2157_v60, %v2158_v44  ;;  %v2217_v5 = vsel %vm11896_vm9, %v12422_v21, %v2157_v60  ;;  %v7413_v21 = vld [vmem:[#allocation2 + $0x1b0] ss:$8 sps:$4 sm:$0xff]  }
 0x277   : > { %2567 = vmatprep.mubr.bf16.mxu1 %v12223_v62  ;;  %3153 = vmatpush1.bf16.msra.mxu1 %v7404_v35  ;;  %v7410_v35 = vld [vmem:[#allocation2 + $0x1a0] ss:$8 sps:$4 sm:$0xff]   ;;  %v6069_v1 = vpack.c.bf16 %v2216_v61, %v2217_v5  ;;  %v2215_v61 = vsel %vm11896_vm9, %v2158_v44, %v2159_v9  ;;  %v12428_v5 = vmov 0  ;;  %v7419_v44 = vld [vmem:[#allocation2 + $0x1d0] ss:$8 sps:$4 sm:$0xff]  }
 0x278   : > { %3154 = vmatprep.subr.bf16.mxu1 %v7409_v17  ;;  %v12426_v17 = vld [vmem:[#allocation41_spill] sm:$0xff] }
 0x279   : > { %v12427_v60 = vand.u32 15, %v12426_v17  ;;  %v2162_v17 = vrot.slane %v7970_v2, 7 }
 0x27b   : > { %3155 = vmatpush1.bf16.msra.mxu1 %v7407_v10  ;;  %vm2224_vm3 = vcmp.ge.s32.totalorder %v12427_v60, 1  ;;  %v7418_v10 = vld [vmem:[#allocation2 + $0x1c4] ss:$8 sps:$4 sm:$0xff]  }
 0x27c   : > { %3156 = vmatprep.subr.bf16.mxu1 %v7412_v22  ;;  %v2214_v22 = vsel %vm11896_vm9, %v2159_v9, %v2160_v25  ;;  %vm9198_vm6 = vmpackc.low %vm11906_vm5, %vm2224_vm3  ;;  %v12431_v9 = vld [vmem:[#allocation45_spill] sm:$0xff] }
 0x27d   : > { %v12429_v5 = vsel %vm9198_vm6, 4294967295, %v12428_v5  ;;  %v12432_v60 = vand.u32 15, %v12431_v9  ;;  %v2164_v9 = vrot.slane %v7982_v14, 7 }
 0x27e   : > { %6070 = vmatmul.mubr.msk.bf16.gmra.mrb[4].mxu1 %vm9182_vm1, %v6069_v1  ;;  %12430 = vst [vmem:[#allocation48_spill] sm:$0xff] %v12429_v5  ;;  %v7416_v1 = vld [vmem:[#allocation2 + $0x1c0] ss:$8 sps:$4 sm:$0xff]   ;;  %v7427_v5 = vld [vmem:[#allocation2 + $0x1f4] ss:$8 sps:$4 sm:$0xff]  }
 0x27f   : > { %2577 = vmatprep.mubr.bf16.mxu1 %v12223_v62  ;;  %3157 = vmatpush1.bf16.msra.mxu1 %v7410_v35  ;;  %v6072_v35 = vpack.c.bf16 %v2214_v22, %v2215_v61  ;;  %vm2226_vm8 = vcmp.ge.s32.totalorder %v12432_v60, 1  ;;  %v12433_v61 = vmov 0 }
 0x280   : > { %3158 = vmatprep.subr.bf16.mxu1 %v7415_v29  ;;  %v2161_v29 = vrot.slane %v12364_v56, 7  ;;  %vm9214_vm10 = vmpackc.low %vm11906_vm5, %vm2226_vm8 }
 0x281   : > { %v12434_v61 = vsel %vm9214_vm10, 4294967295, %v12433_v61 }
 0x282   : > { %v2213_v22 = vsel %vm11896_vm9, %v2160_v25, %v2161_v29  ;;  %12435 = vst [vmem:[#allocation28_spill] sm:$0xff] %v12434_v61  ;;  %v7425_v25 = vld [vmem:[#allocation2 + $0x1f0] ss:$8 sps:$4 sm:$0xff]  }
 0x283   : > { %3159 = vmatpush1.bf16.msra.mxu1 %v7413_v21  ;;  %v7424_v21 = vld [vmem:[#allocation2 + $0x1e4] ss:$8 sps:$4 sm:$0xff]  }
 0x284   : > { %3160 = vmatprep.subr.bf16.mxu1 %v7418_v10  ;;  %v2212_v10 = vsel %vm11896_vm9, %v2161_v29, %v2162_v17  ;;  %v12436_v29 = vld [vmem:[#allocation49_spill] sm:$0xff] }
 0x285   : > { %v12437_v60 = vand.u32 15, %v12436_v29  ;;  %v12442_v29 = vmov 0 }
 0x286   : > { %6073 = vmatmul.mubr.msk.bf16.gmra.mrb[8].mxu1 %vm9198_vm6, %v6072_v35  ;;  %v7422_v35 = vld [vmem:[#allocation2 + $0x1e0] ss:$8 sps:$4 sm:$0xff]  }
 0x287   : > { %2587 = vmatprep.mubr.bf16.mxu1 %v12223_v62  ;;  %3161 = vmatpush1.bf16.msra.mxu1 %v7416_v1  ;;  %v6075_v1 = vpack.c.bf16 %v2212_v10, %v2213_v22  ;;  %vm2228_vm11 = vcmp.ge.s32.totalorder %v12437_v60, 1  ;;  %v12438_v10 = vmov 0 }
 0x288   : > { %3162 = vmatprep.subr.bf16.mxu1 %v7421_v24  ;;  %v2163_v24 = vrot.slane %v7979_v11, 7  ;;  %vm9230_vm2 = vmpackc.low %vm11906_vm5, %vm2228_vm11 }
 0x289   : > { %v12439_v10 = vsel %vm9230_vm2, 4294967295, %v12438_v10 }
 0x28a   : > { %12440 = vst [vmem:[#allocation41_spill] sm:$0xff] %v12439_v10  ;;  %v7443_v10 = vld [vmem:[#allocation5 + $0x38] sm:$0xff]  }
 0x28b   : > { %3163 = vmatpush1.bf16.msra.mxu1 %v7419_v44  ;;  %v2210_v44 = vsel %vm11896_vm9, %v2163_v24, %v2164_v9 }
 0x28c   : > { %3164 = vmatprep.subr.bf16.mxu1 %v7424_v21  ;;  %v2211_v21 = vsel %vm11896_vm9, %v2162_v17, %v2163_v24  ;;  %v12441_v17 = vand.u32 15, %v8525_v13  ;;  %v2167_v13 = vrot.slane %v12306_v36, 7 }
 0x28d   : > { %v6078_v22 = vpack.c.bf16 %v2210_v44, %v2211_v21  ;;  %v2168_v44 = vrot.slane %v8057_v34, 7  ;;  %v12445_v21 = vand.u32 15, %v8675_v7  ;;  %v2169_v7 = vrot.slane %v8043_v12, 7 }
 0x28e   : > { %6076 = vmatmul.mubr.msk.bf16.gmra.mrb[12].mxu1 %vm9214_vm10, %v6075_v1  ;;  %v7476_v1 = vld [vmem:[#allocation2 + $0x204] ss:$8 sps:$4 sm:$0xff]   ;;  %vm2230_vm12 = vcmp.ge.s32.totalorder %v12441_v17, 1  ;;  %v12449_v17 = vand.u32 15, %v8707_v59  ;;  %v12454_v59 = vand.u32 15, %v8901_v58  ;;  %v12462_v58 = vmov 0 }
 0x28f   : > { %2597 = vmatprep.mubr.bf16.mxu1 %v12223_v62  ;;  %3165 = vmatpush1.bf16.msra.mxu1 %v7422_v35  ;;  %v2166_v35 = vrot.slane %v8003_v37, 7  ;;  %vm9246_vm13 = vmpackc.low %vm11906_vm5, %vm2230_vm12  ;;  %vm2232_vm4 = vcmp.ge.s32.totalorder %v12445_v21, 1  ;;  %v12455_v21 = vmov 0 }
 0x290   : > { %3166 = vmatprep.subr.bf16.mxu1 %v7427_v5  ;;  %v2165_v5 = vrot.slane %v7993_v26, 7  ;;  %v12443_v29 = vsel %vm9246_vm13, 4294967295, %v12442_v29  ;;  %vm9262_vm14 = vmpackc.low %vm11906_vm5, %vm2232_vm4  ;;  %vm2234_vm0 = vcmp.ge.s32.totalorder %v12449_v17, 1  ;;  %vm2236_vm8 = vcmp.ge.s32.totalorder %v12454_v59, 1  ;;  %v12478_v59 = vld [vmem:[#allocation56_spill] sm:$0xff] }
 0x291   : > { %12444 = vst [vmem:[#allocation45_spill] sm:$0xff] %v12443_v29  ;;  %vm9279_vm3 = vmpackc.low %vm11906_vm5, %vm2234_vm0  ;;  %v12674_v29 = vld [vmem:[#allocation82_spill] sm:$0xff] }
 0x292   : > { %v2208_v24 = vsel %vm11896_vm9, %v2165_v5, %v2166_v35  ;;  %vm9289_vm11 = vmpackc.low %vm11906_vm5, %vm2236_vm8 }
 0x293   : > { %3167 = vmatpush1.bf16.msra.mxu1 %v7425_v25  ;;  %v2209_v25 = vsel %vm11896_vm9, %v2164_v9, %v2165_v5  ;;  %v2206_v9 = vsel %vm11896_vm9, %v2167_v13, %v2168_v44  ;;  %v12456_v21 = vsel %vm9289_vm11, 4294967295, %v12455_v21 }
 0x294   : > { %6949 = vmatprep.subr.bf16.mxu1 %v7476_v1  ;;  %v6081_v60 = vpack.c.bf16 %v2208_v24, %v2209_v25  ;;  %v12446_v1 = vmov 0  ;;  %v12450_v24 = vrot.slane %v8049_v27, 7  ;;  %v2205_v25 = vsel %vm11896_vm9, %v2168_v44, %v2169_v7  ;;  %12457 = vst [vmem:[#allocation108_spill] sm:$0xff] %v12456_v21  ;;  %v12458_v44 = vld [vmem:[#allocation51_spill] sm:$0xff] }
 0x295   : > { %v12447_v1 = vsel %vm9262_vm14, 4294967295, %v12446_v1  ;;  %v7442_v21 = vld [vmem:[#allocation5 + $0x78] sm:$0xff]  }
 0x296   : > { %6079 = vmatmul.mubr.msk.bf16.gmra.mrb[16].mxu1 %vm9230_vm2, %v6078_v22  ;;  %v2207_v22 = vsel %vm11896_vm9, %v2166_v35, %v2167_v13  ;;  %12448 = vst [vmem:[#allocation49_spill] sm:$0xff] %v12447_v1  ;;  %v2204_v35 = vsel %vm11896_vm9, %v2169_v7, %v12450_v24  ;;  %v12465_v7 = vld [vmem:[#allocation53_spill] sm:$0xff]  ;;  %v12467_v24 = vand.u32 15, %v8928_v18  ;;  %v12475_v18 = vmov 0 }
 0x297   : > { %2607 = vmatprep.mubr.bf16.mxu1 %v12223_v62  ;;  %v6084_v5 = vpack.c.bf16 %v2206_v9, %v2207_v22  ;;  %v6087_v13 = vpack.c.bf16 %v2204_v35, %v2205_v25  ;;  %v12459_v9 = vld [vmem:[#allocation52_spill] sm:$0xff]  ;;  %v12466_v17 = vpack.c.bf16 %v8575_v28, %v12465_v7  ;;  %v12471_v35 = vld [vmem:[#allocation54_spill] sm:$0xff]  ;;  %v12472_v25 = vld [vmem:[#allocation55_spill] sm:$0xff]  ;;  %v12474_v28 = vand.u32 15, %v8939_v46 }
 0x298   : > { %v12460_v22 = vpack.c.bf16 %v12458_v44, %v12459_v9  ;;  %vm2240_vm0 = vcmp.ge.s32.totalorder %v12467_v24, 1  ;;  %v12479_v44 = vpack.c.bf16 %v8592_v31, %v12478_v59  ;;  %v12480_v9 = vand.u32 15, %v8950_v55 }
 0x299   : > { %vm9315_vm8 = vmpackc.low %vm11906_vm5, %vm2240_vm0  ;;  %v12481_v46 = vmov 0  ;;  %v12487_v31 = vand.u32 15, %v8961_v23  ;;  %v12488_v55 = vmov 0  ;;  %v12492_v24 = vand.u32 15, %v8972_v48  ;;  %v12502_v48 = vld [vmem:[#allocation63_spill] sm:$0xff] }
 0x29a   : > { %vm2244_vm0 = vcmp.ge.s32.totalorder %v12480_v9, 1  ;;  %v12493_v23 = vmov 0  ;;  %v12510_v9 = vld [vmem:[#allocation60_spill] sm:$0xff] }
 0x29b   : > { %vm9341_vm7 = vmpackc.low %vm11906_vm5, %vm2244_vm0  ;;  %vm2248_vm0 = vcmp.ge.s32.totalorder %v12492_v24, 1 }
 0x29c   : > { %v12482_v46 = vsel %vm9341_vm7, 4294967295, %v12481_v46 }
 0x29d   : > { %12483 = vst [vmem:[#allocation54_spill] sm:$0xff] %v12482_v46  ;;  %v12662_v46 = vld [vmem:[#allocation79_spill] sm:$0xff] }
 0x29e   : > { %6082 = vmatmul.mubr.msk.bf16.gmra.mrb[20].mxu1 %vm9246_vm13, %v6081_v60  ;;  %v12451_v60 = vmov 0 }
 0x29f   : > { %2617 = vmatprep.mubr.bf16.mxu1 %v12223_v62  ;;  %v12452_v60 = vsel %vm9279_vm3, 4294967295, %v12451_v60 }
 0x2a0   : > { %12453 = vst [vmem:[#allocation107_spill] sm:$0xff] %v12452_v60 }
 0x2a6   : > { %6085 = vmatmul.mubr.msk.bf16.gmra.mrb[24].mxu1 %vm9262_vm14, %v6084_v5  ;;  %v12461_v5 = vand.u32 15, %v8917_v6  ;;  %v12468_v6 = vmov 0 }
 0x2a7   : > { %2627 = vmatprep.mubr.bf16.mxu1 %v12223_v62  ;;  %v12469_v6 = vsel %vm9315_vm8, 4294967295, %v12468_v6 }
 0x2a8   : > { %vm2238_vm12 = vcmp.ge.s32.totalorder %v12461_v5, 1  ;;  %12470 = vst [vmem:[#allocation52_spill] sm:$0xff] %v12469_v6  ;;  %v12485_v5 = vld [vmem:[#allocation58_spill] sm:$0xff]  ;;  %v12672_v6 = vld [vmem:[#allocation80_spill] sm:$0xff] }
 0x2a9   : > { %vm9302_vm4 = vmpackc.low %vm11906_vm5, %vm2238_vm12  ;;  %vm2242_vm12 = vcmp.ge.s32.totalorder %v12474_v28, 1 }
 0x2aa   : > { %v12463_v58 = vsel %vm9302_vm4, 4294967295, %v12462_v58  ;;  %vm9328_vm9 = vmpackc.low %vm11906_vm5, %vm2242_vm12  ;;  %vm2246_vm12 = vcmp.ge.s32.totalorder %v12487_v31, 1  ;;  %v7477_v31 = vld [vmem:[#allocation2 + $0x200] ss:$8 sps:$4 sm:$0xff]  }
 0x2ab   : > { %12464 = vst [vmem:[#allocation51_spill] sm:$0xff] %v12463_v58  ;;  %v12476_v18 = vsel %vm9328_vm9, 4294967295, %v12475_v18 }
 0x2ac   : > { %12477 = vst [vmem:[#allocation53_spill] sm:$0xff] %v12476_v18 }
 0x2ae   : > { %6088 = vmatmul.mubr.msk.bf16.gmra.mrb[28].mxu1 %vm9279_vm3, %v6087_v13  ;;  %v12473_v13 = vpack.c.bf16 %v12471_v35, %v12472_v25  ;;  %v12496_v35 = vld [vmem:[#allocation62_spill] sm:$0xff] }
 0x2af   : > { %2637 = vmatprep.mubr.bf16.mxu1 %v12223_v62  ;;  %v12497_v25 = vpack.c.bf16 %v8667_v20, %v12496_v35  ;;  %v12505_v20 = vld [vmem:[#allocation16_spill] sm:$0xff]  ;;  %v7478_v35 = vld [vmem:[#allocation2 + $0x214] ss:$8 sps:$4 sm:$0xff]  }
 0x2b0   : > { %v12506_v59 = vand.u32 15, %v12505_v20  ;;  %v2787_v20 = vrot.slane %v12363_v8, 1 }
 0x2b6   : > { %6091 = vmatmul.mubr.msk.bf16.gmra.mrb[32].mxu1 %vm9289_vm11, %v12460_v22  ;;  %v12484_v22 = vld [vmem:[#allocation57_spill] sm:$0xff] }
 0x2b7   : > { %2647 = vmatprep.mubr.bf16.mxu1 %v12223_v62  ;;  %v12486_v7 = vpack.c.bf16 %v12484_v22, %v12485_v5  ;;  %v12511_v22 = vld [vmem:[#allocation61_spill] sm:$0xff] }
 0x2b8   : > { %v12512_v5 = vpack.c.bf16 %v12510_v9, %v12511_v22  ;;  %v12522_v9 = vld [vmem:[#allocation19_spill] sm:$0xff] }
 0x2b9   : > { %v12523_v22 = vand.u32 15, %v12522_v9  ;;  %v2791_v9 = vrot.slane %v7982_v14, 1 }
 0x2be   : > { %6094 = vmatmul.mubr.msk.bf16.gmra.mrb[36].mxu1 %vm9302_vm4, %v12466_v17  ;;  %v12491_v17 = vpack.c.bf16 %v8641_v33, %v8629_v63  ;;  %v12498_v33 = vand.u32 15, %v8983_v52  ;;  %v12499_v63 = vmov 0  ;;  %v12507_v52 = vmov 0 }
 0x2bf   : > { %2657 = vmatprep.mubr.bf16.mxu1 %v12223_v62 }
 0x2c6   : > { %6097 = vmatmul.mubr.msk.bf16.gmra.mrb[40].mxu1 %vm9315_vm8, %v12473_v13  ;;  %v12503_v13 = vld [vmem:[#allocation64_spill] sm:$0xff] }
 0x2c7   : > { %2667 = vmatprep.mubr.bf16.mxu1 %v12223_v62  ;;  %v12504_v28 = vpack.c.bf16 %v12502_v48, %v12503_v13  ;;  %v12519_v48 = vmov 0 }
 0x2ce   : > { %6100 = vmatmul.mubr.msk.bf16.gmra.mrb[44].mxu1 %vm9328_vm9, %v12479_v44  ;;  %vm9354_vm9 = vmpackc.low %vm11906_vm5, %vm2246_vm12  ;;  %vm2250_vm12 = vcmp.ge.s32.totalorder %v12498_v33, 1  ;;  %v2786_v44 = vrot.slane %v12362_v3, 1 }
 0x2cf   : > { %2677 = vmatprep.mubr.bf16.mxu1 %v12223_v62  ;;  %v12489_v55 = vsel %vm9354_vm9, 4294967295, %v12488_v55 }
 0x2d0   : > { %12490 = vst [vmem:[#allocation55_spill] sm:$0xff] %v12489_v55 }
 0x2d6   : > { %6103 = vmatmul.mubr.msk.bf16.gmra.mrb[48].mxu1 %vm9341_vm7, %v12486_v7  ;;  %vm9367_vm7 = vmpackc.low %vm11906_vm5, %vm2248_vm0  ;;  %vm2880_vm0 = vcmp.lt.s32.totalorder %v12506_v59, 15  ;;  %v2785_v7 = vrot.slane %v7902_v19, 1  ;;  %v7479_v19 = vld [vmem:[#allocation2 + $0x210] ss:$8 sps:$4 sm:$0xff]   ;;  %v7481_v59 = vld [vmem:[#allocation2 + $0x220] ss:$8 sps:$4 sm:$0xff]  }
 0x2d7   : > { %2687 = vmatprep.mubr.bf16.mxu1 %v12223_v62  ;;  %v12494_v23 = vsel %vm9367_vm7, 4294967295, %v12493_v23 }
 0x2d8   : > { %12495 = vst [vmem:[#allocation56_spill] sm:$0xff] %v12494_v23 }
 0x2de   : > { %6106 = vmatmul.mubr.msk.bf16.gmra.mrb[52].mxu1 %vm9354_vm9, %v12491_v17  ;;  %vm9380_vm9 = vmpackc.low %vm11906_vm5, %vm2250_vm12  ;;  %v12513_v17 = vld [vmem:[#allocation17_spill] sm:$0xff] }
 0x2df   : > { %2697 = vmatprep.mubr.bf16.mxu1 %v12223_v62  ;;  %v12500_v63 = vsel %vm9380_vm9, 4294967295, %v12499_v63  ;;  %v12514_v24 = vand.u32 15, %v12513_v17  ;;  %v7483_v17 = vld [vmem:[#allocation2 + $0x230] ss:$8 sps:$4 sm:$0xff]  }
 0x2e0   : > { %12501 = vst [vmem:[#allocation57_spill] sm:$0xff] %v12500_v63  ;;  %v7437_v63 = vld [vmem:[#allocation5 + $0x20] sm:$0xff]  }
 0x2e1   : > { %vm2882_vm12 = vcmp.lt.s32.totalorder %v12514_v24, 15  ;;  %v7484_v24 = vld [vmem:[#allocation2 + $0x244] ss:$8 sps:$4 sm:$0xff]  }
 0x2e6   : > { %6109 = vmatmul.mubr.msk.bf16.gmra.mrb[56].mxu1 %vm9367_vm7, %v12497_v25  ;;  %vm9393_vm7 = vmpackc.low %vm2880_vm0, %vm11906_vm5  ;;  %vm12515_vm0 = vcmp.lt.s32.totalorder %v7857_v53, 7  ;;  %v12516_v25 = vrot.slane %v7879_v4, 1  ;;  %v2788_v4 = vrot.slane %v12364_v56, 1 }
 0x2e7   : > { %2707 = vmatprep.mubr.bf16.mxu1 %v12223_v62  ;;  %v12508_v52 = vsel %vm9393_vm7, 4294967295, %v12507_v52  ;;  %v2842_v3 = vsel %vm12515_vm0, %v2785_v7, %v2786_v44  ;;  %vm12517_vm5 = vmmov %vm12515_vm0  ;;  %v2841_v8 = vsel %vm12515_vm0, %v2786_v44, %v2787_v20  ;;  %v7485_v44 = vld [vmem:[#allocation2 + $0x240] ss:$8 sps:$4 sm:$0xff]  }
 0x2e8   : > { %12509 = vst [vmem:[#allocation58_spill] sm:$0xff] %v12508_v52  ;;  %v2843_v33 = vsel %vm12517_vm5, %v12516_v25, %v2785_v7  ;;  %vm2884_vm5 = vcmp.lt.s32.totalorder %v12523_v22, 15  ;;  %v12528_v25 = vld [vmem:[#allocation22_spill] sm:$0xff]  ;;  %v2792_v22 = vrot.slane %v7993_v26, 1 }
 0x2e9   : > { %v6133_v13 = vpack.c.bf16 %v2842_v3, %v2843_v33  ;;  %v2789_v3 = vrot.slane %v7970_v2, 1  ;;  %v12529_v33 = vand.u32 15, %v12528_v25  ;;  %v12540_v25 = vld [vmem:[#allocation24_spill] sm:$0xff] }
 0x2ee   : > { %6112 = vmatmul.mubr.msk.bf16.gmra.mrb[60].mxu1 %vm9380_vm9, %v12504_v28  ;;  %v7480_v28 = vld [vmem:[#allocation2 + $0x224] ss:$8 sps:$4 sm:$0xff]  }
 0x2ef   : > { %3184 = vmatprep.mubr.bf16.mxu1 %v12223_v62 }
 0x2f6   : > { %6131 = vmatmul.mubr.msk.bf16.vlgmr.msra.gmra.mrb[0].mxu1 %vm9393_vm7, %v12512_v5  ;;  %vm12518_vm7 = vmmov 1   ;;  %v7482_v5 = vld [vmem:[#allocation2 + $0x234] ss:$8 sps:$4 sm:$0xff]  }
 0x2f7   : > { %3194 = vmatprep.mubr.bf16.mxu1 %v12223_v62  ;;  %6957 = vmatpush1.bf16.msra.mxu1 %v7477_v31  ;;  %vm9414_vm9 = vmpackc.low %vm2882_vm12, %vm12518_vm7  ;;  %v12525_v31 = vmov 0 }
 0x2f8   : > { %6950 = vmatprep.subr.bf16.mxu1 %v7478_v35  ;;  %v12520_v48 = vsel %vm9414_vm9, 4294967295, %v12519_v48  ;;  %vm12524_vm12 = vmmov %vm12515_vm0  ;;  %v2790_v35 = vrot.slane %v7979_v11, 1  ;;  %v2839_v11 = vsel %vm12515_vm0, %v2788_v4, %v2789_v3 }
 0x2f9   : > { %12521 = vst [vmem:[#allocation62_spill] sm:$0xff] %v12520_v48  ;;  %v2840_v7 = vsel %vm12524_vm12, %v2787_v20, %v2788_v4  ;;  %vm9430_vm8 = vmpackc.low %vm2884_vm5, %vm12518_vm7  ;;  %vm2886_vm5 = vcmp.lt.s32.totalorder %v12529_v33, 15  ;;  %v7487_v20 = vld [vmem:[#allocation2 + $0x250] ss:$8 sps:$4 sm:$0xff]   ;;  %v7489_v4 = vld [vmem:[#allocation2 + $0x260] ss:$8 sps:$4 sm:$0xff]  }
 0x2fa   : > { %v12526_v31 = vsel %vm9430_vm8, 4294967295, %v12525_v31  ;;  %v6136_v56 = vpack.c.bf16 %v2840_v7, %v2841_v8  ;;  %vm12530_vm12 = vmmov %vm12515_vm0  ;;  %v7490_v8 = vld [vmem:[#allocation2 + $0x274] ss:$8 sps:$4 sm:$0xff]   ;;  %v2837_v14 = vsel %vm12515_vm0, %v2790_v35, %v2791_v9  ;;  %v12541_v33 = vand.u32 15, %v12540_v25  ;;  %v12566_v25 = vld [vmem:[#allocation44_spill] sm:$0xff] }
 0x2fb   : > { %6958 = vmatpush1.bf16.msra.mxu1 %v7479_v19  ;;  %12527 = vst [vmem:[#allocation63_spill] sm:$0xff] %v12526_v31  ;;  %v7486_v19 = vld [vmem:[#allocation2 + $0x254] ss:$8 sps:$4 sm:$0xff]  }
 0x2fc   : > { %6951 = vmatprep.subr.bf16.mxu1 %v7480_v28  ;;  %v12531_v28 = vmov 0 }
 0x2fe   : > { %6134 = vmatmul.mubr.msk.bf16.gmra.mrb[4].mxu1 %vm9414_vm9, %v6133_v13  ;;  %v2838_v13 = vsel %vm12530_vm12, %v2789_v3, %v2790_v35  ;;  %vm9446_vm9 = vmpackc.low %vm2886_vm5, %vm12518_vm7  ;;  %v2794_v3 = vrot.slane %v12306_v36, 1 }
 0x2ff   : > { %3204 = vmatprep.mubr.bf16.mxu1 %v12223_v62  ;;  %6959 = vmatpush1.bf16.msra.mxu1 %v7481_v59  ;;  %v12532_v28 = vsel %vm9446_vm9, 4294967295, %v12531_v28  ;;  %v6139_v2 = vpack.c.bf16 %v2838_v13, %v2839_v11  ;;  %v7488_v59 = vld [vmem:[#allocation2 + $0x264] ss:$8 sps:$4 sm:$0xff]   ;;  %vm12536_vm12 = vmmov %vm12515_vm0  ;;  %v12543_v13 = vmov 0  ;;  %v2795_v11 = vrot.slane %v8057_v34, 1 }
 0x300   : > { %6952 = vmatprep.subr.bf16.mxu1 %v7482_v5  ;;  %12533 = vst [vmem:[#allocation64_spill] sm:$0xff] %v12532_v28  ;;  %v12534_v5 = vld [vmem:[#allocation23_spill] sm:$0xff] }
 0x301   : > { %v12535_v7 = vand.u32 15, %v12534_v5 }
 0x303   : > { %6960 = vmatpush1.bf16.msra.mxu1 %v7483_v17  ;;  %vm2888_vm5 = vcmp.lt.s32.totalorder %v12535_v7, 15  ;;  %v2836_v17 = vsel %vm12536_vm12, %v2791_v9, %v2792_v22  ;;  %vm2890_vm12 = vcmp.lt.s32.totalorder %v12541_v33, 15  ;;  %v12554_v7 = vrot.slane %v8062_v39, 1 }
 0x304   : > { %6953 = vmatprep.subr.bf16.mxu1 %v7484_v24  ;;  %v7491_v24 = vld [vmem:[#allocation2 + $0x270] ss:$8 sps:$4 sm:$0xff]   ;;  %v6142_v26 = vpack.c.bf16 %v2836_v17, %v2837_v14  ;;  %v12556_v14 = vmov 0  ;;  %v12561_v39 = vmov 0  ;;  %v12567_v33 = vand.u32 15, %v12566_v25 }
 0x306   : > { %6137 = vmatmul.mubr.msk.bf16.gmra.mrb[8].mxu1 %vm9430_vm8, %v6136_v56  ;;  %vm9462_vm8 = vmpackc.low %vm2888_vm5, %vm12518_vm7  ;;  %v12537_v56 = vmov 0 }
 0x307   : > { %3214 = vmatprep.mubr.bf16.mxu1 %v12223_v62  ;;  %6961 = vmatpush1.bf16.msra.mxu1 %v7485_v44  ;;  %v12538_v56 = vsel %vm9462_vm8, 4294967295, %v12537_v56  ;;  %v2793_v44 = vrot.slane %v8003_v37, 1  ;;  %vm12542_vm5 = vmmov %vm12515_vm0  ;;  %v2796_v37 = vrot.slane %v8043_v12, 1  ;;  %v2797_v12 = vrot.slane %v8049_v27, 1  ;;  %v12559_v27 = vld [vmem:[#allocation33_spill] sm:$0xff] }
 0x308   : > { %6954 = vmatprep.subr.bf16.mxu1 %v7486_v19  ;;  %12539 = vst [vmem:[#allocation16_spill] sm:$0xff] %v12538_v56 }
 0x309   : > { %v2834_v35 = vsel %vm12542_vm5, %v2793_v44, %v2794_v3  ;;  %v2835_v19 = vsel %vm12515_vm0, %v2792_v22, %v2793_v44  ;;  %v12549_v22 = vmov 0 }
 0x30a   : > { %v6145_v36 = vpack.c.bf16 %v2834_v35, %v2835_v19  ;;  %v12568_v35 = vmov 0  ;;  %v12571_v19 = vld [vmem:[#allocation65_spill] sm:$0xff] }
 0x30b   : > { %6962 = vmatpush1.bf16.msra.mxu1 %v7487_v20  ;;  %v12546_v20 = vld [vmem:[#allocation25_spill] sm:$0xff] }
 0x30c   : > { %6955 = vmatprep.subr.bf16.mxu1 %v7488_v59  ;;  %v2832_v59 = vsel %vm12515_vm0, %v2795_v11, %v2796_v37 }
 0x30e   : > { %6140 = vmatmul.mubr.msk.bf16.gmra.mrb[12].mxu1 %vm9446_vm9, %v6139_v2  ;;  %vm9478_vm9 = vmpackc.low %vm2890_vm12, %vm12518_vm7  ;;  %v12547_v2 = vand.u32 15, %v12546_v20  ;;  %v12576_v20 = vmov 0 }
 0x30f   : > { %3224 = vmatprep.mubr.bf16.mxu1 %v12223_v62  ;;  %6963 = vmatpush1.bf16.msra.mxu1 %v7489_v4  ;;  %v12544_v13 = vsel %vm9478_vm9, 4294967295, %v12543_v13  ;;  %vm12548_vm12 = vmmov %vm12515_vm0  ;;  %v12552_v4 = vld [vmem:[#allocation27_spill] sm:$0xff] }
 0x310   : > { %6956 = vmatprep.subr.bf16.mxu1 %v7490_v8  ;;  %12545 = vst [vmem:[#allocation60_spill] sm:$0xff] %v12544_v13  ;;  %vm2892_vm5 = vcmp.lt.s32.totalorder %v12547_v2, 15  ;;  %v2833_v9 = vsel %vm12548_vm12, %v2794_v3, %v2795_v11  ;;  %v12553_v5 = vand.u32 15, %v12552_v4  ;;  %v2830_v8 = vsel %vm12515_vm0, %v2797_v12, %v12554_v7  ;;  %v12564_v3 = vld [vmem:[#allocation26_spill] sm:$0xff]  ;;  %v12579_v2 = vld [vmem:[#allocation67_spill] sm:$0xff] }
 0x311   : > { %v6148_v34 = vpack.c.bf16 %v2832_v59, %v2833_v9  ;;  %v12565_v44 = vpack.c.bf16 %v8757_v49, %v12564_v3  ;;  %v12574_v49 = vld [vmem:[#allocation46_spill] sm:$0xff]  ;;  %v12580_v59 = vld [vmem:[#allocation68_spill] sm:$0xff]  ;;  %v12584_v4 = vmov 0  ;;  %v12588_v7 = vld [vmem:[#allocation59_spill] sm:$0xff] }
 0x312   : > { %v12581_v9 = vpack.c.bf16 %v12579_v2, %v12580_v59  ;;  %v12594_v3 = vld [vmem:[#allocation69_spill] sm:$0xff]  ;;  %v12605_v2 = vld [vmem:[#allocation72_spill] sm:$0xff] }
 0x313   : > { %6964 = vmatpush1.bf16.msra.mxu1 %v7491_v24  ;;  %v12606_v59 = vld [vmem:[#allocation73_spill] sm:$0xff] }
 0x316   : > { %6143 = vmatmul.mubr.msk.bf16.gmra.mrb[16].mxu1 %vm9462_vm8, %v6142_v26  ;;  %vm9494_vm8 = vmpackc.low %vm2892_vm5, %vm12518_vm7  ;;  %v12560_v26 = vand.u32 15, %v12559_v27 }
 0x317   : > { %3234 = vmatprep.mubr.bf16.mxu1 %v12223_v62  ;;  %v12550_v22 = vsel %vm9494_vm8, 4294967295, %v12549_v22  ;;  %vm12555_vm5 = vmmov %vm12515_vm0 }
 0x318   : > { %12551 = vst [vmem:[#allocation61_spill] sm:$0xff] %v12550_v22  ;;  %v2831_v17 = vsel %vm12555_vm5, %v2796_v37, %v2797_v12  ;;  %v12575_v37 = vand.u32 15, %v12574_v49  ;;  %v12602_v49 = vmov 0 }
 0x319   : > { %v6151_v24 = vpack.c.bf16 %v2830_v8, %v2831_v17  ;;  %v12589_v8 = vand.u32 15, %v12588_v7  ;;  %v447_v17 = vadd.s32 216, %v7857_v53  ;;  %v12613_v7 = vld [vmem:[#allocation37_spill] sm:$0xff] }
 0x31b   : > { %v645_v27 = vand.u32 15, %v447_v17  ;;  %v12615_v17 = vld [vmem:[#allocation75_spill] sm:$0xff] }
 0x31e   : > { %6146 = vmatmul.mubr.msk.bf16.gmra.mrb[20].mxu1 %vm9478_vm9, %v6145_v36  ;;  %vm2894_vm9 = vcmp.lt.s32.totalorder %v12553_v5, 15  ;;  %v12572_v36 = vld [vmem:[#allocation66_spill] sm:$0xff]  ;;  %v12587_v5 = vpack.c.bf16 %v8812_v45, %v8801_v40  ;;  %v449_v40 = vadd.s32 232, %v7857_v53  ;;  %v12596_v45 = vmov 0 }
 0x31f   : > { %3244 = vmatprep.mubr.bf16.mxu1 %v12223_v62  ;;  %vm9511_vm12 = vmpackc.low %vm2894_vm9, %vm12518_vm7  ;;  %vm2898_vm9 = vcmp.lt.s32.totalorder %v12567_v33, 15  ;;  %v12573_v11 = vpack.c.bf16 %v12571_v19, %v12572_v36  ;;  %v12599_v33 = vld [vmem:[#allocation70_spill] sm:$0xff]  ;;  %v12600_v19 = vld [vmem:[#allocation71_spill] sm:$0xff] }
 0x320   : > { %v12557_v14 = vsel %vm9511_vm12, 4294967295, %v12556_v14  ;;  %vm9534_vm0 = vmpackc.low %vm2898_vm9, %vm12518_vm7  ;;  %v659_v25 = vand.u32 15, %v449_v40  ;;  %v12601_v36 = vpack.c.bf16 %v12599_v33, %v12600_v19  ;;  %v7429_v40 = vld [vmem:[#allocation5] sm:$0xff]   ;;  %v4044_v19 = vsub.s32 1, %v7857_v53 }
 0x321   : > { %12558 = vst [vmem:[#allocation17_spill] sm:$0xff] %v12557_v14  ;;  %v12569_v35 = vsel %vm9534_vm0, 4294967295, %v12568_v35  ;;  %v4036_v33 = vld [vmem:[%s11782_s5] sm:$0x3] }
 0x322   : > { %12570 = vst [vmem:[#allocation22_spill] sm:$0xff] %v12569_v35 }
 0x326   : > { %6149 = vmatmul.mubr.msk.bf16.gmra.mrb[24].mxu1 %vm9494_vm8, %v6148_v34  ;;  %vm2896_vm8 = vcmp.lt.s32.totalorder %v12560_v26, 15  ;;  %v12582_v34 = vld [vmem:[#allocation50_spill] sm:$0xff] }
 0x327   : > { %3254 = vmatprep.mubr.bf16.mxu1 %v12223_v62  ;;  %vm9521_vm4 = vmpackc.low %vm2896_vm8, %vm12518_vm7  ;;  %vm2900_vm8 = vcmp.lt.s32.totalorder %v12575_v37, 15  ;;  %v12583_v12 = vand.u32 15, %v12582_v34  ;;  %v12593_v26 = vld [vmem:[#allocation38_spill] sm:$0xff]  ;;  %v12608_v34 = vmov 0 }
 0x328   : > { %v12562_v39 = vsel %vm9521_vm4, 4294967295, %v12561_v39  ;;  %vm9547_vm5 = vmpackc.low %vm2900_vm8, %vm12518_vm7  ;;  %vm2904_vm8 = vcmp.lt.s32.totalorder %v12589_v8, 15 }
 0x329   : > { %12563 = vst [vmem:[#allocation19_spill] sm:$0xff] %v12562_v39  ;;  %v12577_v20 = vsel %vm9547_vm5, 4294967295, %v12576_v20  ;;  %vm2902_vm9 = vcmp.lt.s32.totalorder %v12583_v12, 15  ;;  %v12611_v12 = vpack.c.bf16 %v8867_v15, %v8861_v38  ;;  %v12618_v38 = vld [vmem:[#allocation78_spill] sm:$0xff] }
 0x32a   : > { %12578 = vst [vmem:[#allocation23_spill] sm:$0xff] %v12577_v20  ;;  %v12646_v39 = vld [vmem:[#allocation42_spill] sm:$0xff] }
 0x32e   : > { %6152 = vmatmul.mubr.msk.bf16.gmra.mrb[28].mxu1 %vm9511_vm12, %v6151_v24  ;;  %v12590_v24 = vmov 0 }
 0x32f   : > { %3264 = vmatprep.mubr.bf16.mxu1 %v12223_v62 }
 0x336   : > { %6155 = vmatmul.mubr.msk.bf16.gmra.mrb[32].mxu1 %vm9521_vm4, %v12565_v44  ;;  %v12595_v44 = vpack.c.bf16 %v12593_v26, %v12594_v3  ;;  %v12616_v26 = vld [vmem:[#allocation76_spill] sm:$0xff] }
 0x337   : > { %3274 = vmatprep.mubr.bf16.mxu1 %v12223_v62  ;;  %v12617_v15 = vpack.c.bf16 %v12615_v17, %v12616_v26  ;;  %v12623_v26 = vld [vmem:[#allocation30_spill] sm:$0xff] }
 0x33e   : > { %6158 = vmatmul.mubr.msk.bf16.gmra.mrb[36].mxu1 %vm9534_vm0, %v12573_v11  ;;  %vm9560_vm0 = vmpackc.low %vm2902_vm9, %vm12518_vm7  ;;  %vm2906_vm9 = vcmp.lt.s32.totalorder %v645_v27, 15  ;;  %v451_v11 = vadd.s32 248, %v7857_v53 }
 0x33f   : > { %3284 = vmatprep.mubr.bf16.mxu1 %v12223_v62  ;;  %v12585_v4 = vsel %vm9560_vm0, 4294967295, %v12584_v4 }
 0x340   : > { %12586 = vst [vmem:[#allocation24_spill] sm:$0xff] %v12585_v4  ;;  %v673_v37 = vand.u32 15, %v451_v11 }
 0x346   : > { %6161 = vmatmul.mubr.msk.bf16.gmra.mrb[40].mxu1 %vm9547_vm5, %v12581_v9  ;;  %vm9574_vm5 = vmpackc.low %vm2904_vm8, %vm12518_vm7  ;;  %vm2908_vm8 = vcmp.lt.s32.totalorder %v659_v25, 15  ;;  %v12607_v9 = vpack.c.bf16 %v12605_v2, %v12606_v59 }
 0x347   : > { %3294 = vmatprep.mubr.bf16.mxu1 %v12223_v62  ;;  %v12591_v24 = vsel %vm9574_vm5, 4294967295, %v12590_v24 }
 0x348   : > { %12592 = vst [vmem:[#allocation25_spill] sm:$0xff] %v12591_v24 }
 0x34e   : > { %6164 = vmatmul.mubr.msk.bf16.gmra.mrb[44].mxu1 %vm9560_vm0, %v12587_v5  ;;  %vm9586_vm0 = vmpackc.low %vm2906_vm9, %vm12518_vm7  ;;  %vm2910_vm9 = vcmp.lt.s32.totalorder %v673_v37, 15  ;;  %v12612_v5 = vld [vmem:[#allocation74_spill] sm:$0xff] }
 0x34f   : > { %3304 = vmatprep.mubr.bf16.mxu1 %v12223_v62  ;;  %v12597_v45 = vsel %vm9586_vm0, 4294967295, %v12596_v45  ;;  %v12614_v8 = vpack.c.bf16 %v12612_v5, %v12613_v7 }
 0x350   : > { %12598 = vst [vmem:[#allocation27_spill] sm:$0xff] %v12597_v45 }
 0x356   : > { %6167 = vmatmul.mubr.msk.bf16.gmra.mrb[48].mxu1 %vm9574_vm5, %v12595_v44  ;;  %vm9598_vm5 = vmpackc.low %vm2908_vm8, %vm12518_vm7  ;;  %vm3533_vm8 = vcmp.lt.s32.totalorder %v645_v27, 14  ;;  %v12619_v27 = vld [vmem:[#allocation77_spill] sm:$0xff]  ;;  %v7428_v44 = vld [vmem:[#allocation5 + $0x40] sm:$0xff]  }
 0x357   : > { %3314 = vmatprep.mubr.bf16.mxu1 %v12223_v62  ;;  %v12603_v49 = vsel %vm9598_vm5, 4294967295, %v12602_v49  ;;  %vm6232_vm4 = vmpackc.low %vm3533_vm8, %vm12518_vm7  ;;  %v12620_v3 = vpack.c.bf16 %v12618_v38, %v12619_v27  ;;  %6507 = vmatprep.subr.bf16.mxu0 %v7428_v44 }
 0x358   : > { %12604 = vst [vmem:[#allocation33_spill] sm:$0xff] %v12603_v49  ;;  %6508 = vmatpush3.bf16.msra.mxu0 %v7429_v40 }
 0x35e   : > { %6170 = vmatmul.mubr.msk.bf16.gmra.mrb[52].mxu1 %vm9586_vm0, %v12601_v36  ;;  %vm9609_vm0 = vmpackc.low %vm2910_vm9, %vm12518_vm7  ;;  %vm3535_vm9 = vcmp.lt.s32.totalorder %v659_v25, 14  ;;  %v4040_v25 = vsub.s32 0, %v7857_v53 }
 0x35f   : > { %3324 = vmatprep.mubr.bf16.mxu1 %v12223_v62  ;;  %v12609_v34 = vsel %vm9609_vm0, 4294967295, %v12608_v34 }
 0x360   : > { %12610 = vst [vmem:[#allocation26_spill] sm:$0xff] %v12609_v34  ;;  %v9641_v36 = vrot.slane %v4036_v33, %v4040_v25 }
 0x366   : > { %6173 = vmatmul.mubr.msk.bf16.gmra.mrb[56].mxu1 %vm9598_vm5, %v12607_v9  ;;  %vm6235_vm5 = vmpackc.low %vm3535_vm9, %vm12518_vm7 }
 0x367   : > { %3334 = vmatprep.mubr.bf16.mxu1 %v12223_v62 }
 0x36e   : > { %6176 = vmatmul.mubr.msk.bf16.gmra.mrb[60].mxu1 %vm9609_vm0, %v12611_v12  ;;  %vm3537_vm0 = vcmp.lt.s32.totalorder %v673_v37, 14  ;;  %v9643_v37 = vrot.slane %v4036_v33, %v4044_v19  ;;  %v12622_v12 = vld [vmem:[#allocation29_spill] sm:$0xff] }
 0x36f   : > { %3941 = vmatprep.mubr.bf16.mxu1 %v12223_v62  ;;  %vm6238_vm12 = vmpackc.low %vm3537_vm0, %vm12518_vm7  ;;  %vm12634_vm7 = vcmp.lt.s32.totalorder %v7857_v53, 1 }
 0x376   : > { %6234 = vmatmul.mubr.msk.bf16.vlgmr.msra.gmra.mrb[52].mxu1 %vm6232_vm4, %v12614_v8  ;;  %vm12637_vm4 = vmmov %vm12634_vm7 }
 0x377   : > { %3951 = vmatprep.mubr.bf16.mxu1 %v12223_v62  ;;  %vm12651_vm8 = vmmov %vm12637_vm4 }
 0x378   : > { %vm12653_vm9 = vmmov %vm12637_vm4 }
 0x37e   : > { %6237 = vmatmul.mubr.msk.bf16.gmra.mrb[56].mxu1 %vm6235_vm5, %v12617_v15 }
 0x37f   : > { %3961 = vmatprep.mubr.bf16.mxu1 %v12223_v62  ;;  %v4112_v62 = vld [vmem:[%s11783_s6] sm:$0x3] }
 0x380   : > { %v9646_v59 = vrot.slane %v4112_v62, %v4040_v25  ;;  %v9649_v7 = vrot.slane %v4112_v62, %v4044_v19 }
 0x382   : > { %12621 = vst [vmem:[#allocation44_spill] sm:$0xff] %v9646_v59 }
 0x386   : > { %6240 = vmatmul.mubr.msk.bf16.gmra.mrb[60].mxu1 %vm6238_vm12, %v12620_v3  ;;  %v12624_v3 = vld [vmem:[#allocation32_spill] sm:$0xff]  ;;  %vm12640_vm12 = vcmp.lt.s32.totalorder %v7857_v53, 7 }
 0x387   : > { %vm12643_vm0 = vmmov %vm12640_vm12 }
 0x388   : > { %vm12647_vm5 = vmmov %vm12643_vm0 }
 0x3c9   : > { %v3186_v11 = vpop.f32.mrb[0].mxu1 }
 0x3ca   : > { %v6965_v2 = vadd.f32 %v9011_v50, %v3186_v11  ;;  %v3188_v9 = vpop.f32.mrb[1].mxu1 }
 0x3cb   : > { %v6966_v5 = vadd.f32 %v12622_v12, %v3188_v9  ;;  %v3190_v8 = vpop.f32.mrb[2].mxu1  ;;  %v7431_v12 = vld [vmem:[#allocation5 + $0x8] sm:$0xff]  }
 0x3cc   : > { %v4048_v17 = vmul.f32 %v6965_v2, %v9641_v36  ;;  %v6967_v15 = vadd.f32 %v12623_v26, %v3190_v8  ;;  %v3192_v38 = vpop.f32.mrb[3].mxu1  ;;  %v12628_v8 = vld [vmem:[#allocation31_spill] sm:$0xff] }
 0x3cd   : > { %v4049_v27 = vmul.f32 %v6966_v5, %v9643_v37  ;;  %v6968_v44 = vadd.f32 %v12624_v3, %v3192_v38  ;;  %v12629_v3 = vld [vmem:[#allocation35_spill] sm:$0xff] }
 0x3ce   : > { %v4124_v40 = vadd.f32 %v9646_v59, %v4048_v17  ;;  %v4050_v50 = vmul.f32 %v6967_v15, %v9641_v36 }
 0x3cf   : > { %v4125_v25 = vadd.f32 %v9649_v7, %v4049_v27  ;;  %v4051_v33 = vmul.f32 %v6968_v44, %v9643_v37 }
 0x3d0   : > { %v9659_v19 = vmax.f32 %v4124_v40, 0.0  ;;  %v4126_v62 = vadd.f32 %v9646_v59, %v4050_v50 }
 0x3d1   : > { %v9662_v11 = vmax.f32 %v4125_v25, 0.0  ;;  %v4127_v2 = vadd.f32 %v9649_v7, %v4051_v33  ;;  %v3196_v9 = vpop.f32.mrb[4].mxu1  ;;  %v12631_v25 = vld [vmem:[#allocation39_spill] sm:$0xff] }
 0x3d2   : > { %12625 = vst [vmem:[#allocation65_spill] sm:$0xff] %v9659_v19  ;;  %v9666_v5 = vmax.f32 %v4126_v62, 0.0  ;;  %v6969_v17 = vadd.f32 %v12628_v8, %v3196_v9  ;;  %v3198_v26 = vpop.f32.mrb[5].mxu1  ;;  %v7430_v8 = vld [vmem:[#allocation5 + $0x48] sm:$0xff]   ;;  %v12633_v45 = vrot.slane %v9659_v19, 7 }
 0x3d3   : > { %12626 = vst [vmem:[#allocation66_spill] sm:$0xff] %v9662_v11  ;;  %v9671_v27 = vmax.f32 %v4127_v2, 0.0  ;;  %v6970_v44 = vadd.f32 %v12629_v3, %v3198_v26  ;;  %v3200_v40 = vpop.f32.mrb[6].mxu1  ;;  %v12630_v26 = vld [vmem:[#allocation34_spill] sm:$0xff]  ;;  %v11966_v34 = vrot.slane %v9662_v11, 1  ;;  %6509 = vmatprep.subr.bf16.mxu0 %v7430_v8 }
 0x3d4   : > { %12627 = vst [vmem:[#allocation46_spill] sm:$0xff] %v9666_v5  ;;  %v5089_v33 = vrot.slane %v9666_v5, 1  ;;  %v4052_v62 = vmul.f32 %v6969_v17, %v9641_v36  ;;  %v3202_v9 = vpop.f32.mrb[7].mxu1  ;;  %v6971_v3 = vadd.f32 %v12630_v26, %v3200_v40  ;;  %v12632_v17 = vrot.slane %v9666_v5, 7  ;;  %6510 = vmatpush3.bf16.msra.mxu0 %v7431_v12 }
 0x3d5   : > { %v4320_v15 = vrot.slane %v9671_v27, 7  ;;  %v4053_v38 = vmul.f32 %v6970_v44, %v9643_v37  ;;  %v6972_v49 = vadd.f32 %v12631_v25, %v3202_v9  ;;  %v12636_v40 = vrot.slane %v9662_v11, 7  ;;  %v12645_v25 = vld [vmem:[#allocation36_spill] sm:$0xff] }
 0x3d6   : > { %v4128_v50 = vadd.f32 %v9646_v59, %v4052_v62  ;;  %v9692_v24 = vsel %vm12634_vm7, %v12633_v45, %v12632_v17  ;;  %v4054_v44 = vmul.f32 %v6971_v3, %v9641_v36  ;;  %v12639_v45 = vrot.slane %v9659_v19, 1  ;;  %vm12655_vm7 = vmmov %vm12637_vm4 }
 0x3d7   : > { %12635 = vst [vmem:[#allocation67_spill] sm:$0xff] %v9692_v24  ;;  %v4129_v2 = vadd.f32 %v9649_v7, %v4053_v38  ;;  %v9700_v62 = vsel %vm12637_vm4, %v12636_v40, %v4320_v15  ;;  %v4055_v8 = vmul.f32 %v6972_v49, %v9643_v37  ;;  %v12642_v17 = vrot.slane %v9671_v27, 1 }
 0x3d8   : > { %12638 = vst [vmem:[#allocation68_spill] sm:$0xff] %v9700_v62  ;;  %v9704_v9 = vmax.f32 %v4128_v50, 0.0  ;;  %v9711_v38 = vsel %vm12640_vm12, %v12639_v45, %v5089_v33  ;;  %v4130_v26 = vadd.f32 %v9646_v59, %v4054_v44  ;;  %vm12663_vm12 = vmmov %vm12637_vm4 }
 0x3d9   : > { %12641 = vst [vmem:[#allocation50_spill] sm:$0xff] %v9711_v38  ;;  %v9713_v12 = vmax.f32 %v4129_v2, 0.0  ;;  %v3206_v3 = vpop.f32.mrb[8].mxu1  ;;  %v9722_v50 = vsel %vm12643_vm0, %v11966_v34, %v12642_v17  ;;  %v4131_v45 = vadd.f32 %v9649_v7, %v4055_v8  ;;  %v7432_v17 = vld [vmem:[#allocation5 + $0x50] sm:$0xff]   ;;  %vm12666_vm0 = vmmov %vm12637_vm4 }
 0x3da   : > { %12644 = vst [vmem:[#allocation59_spill] sm:$0xff] %v9722_v50  ;;  %v4321_v49 = vrot.slane %v9704_v9, 7  ;;  %v11975_v40 = vrot.slane %v9704_v9, 1  ;;  %v6973_v2 = vadd.f32 %v12645_v25, %v3206_v3  ;;  %v3208_v4 = vpop.f32.mrb[9].mxu1  ;;  %v9730_v35 = vmax.f32 %v4130_v26, 0.0  ;;  %v7433_v34 = vld [vmem:[#allocation5 + $0x10] sm:$0xff]   ;;  %6511 = vmatprep.subr.bf16.mxu0 %v7432_v17 }
 0x3db   : > { %v4322_v44 = vrot.slane %v9713_v12, 7  ;;  %v6974_v14 = vadd.f32 %v12646_v39, %v3208_v4  ;;  %v3210_v22 = vpop.f32.mrb[10].mxu1  ;;  %v9739_v8 = vmax.f32 %v4131_v45, 0.0  ;;  %v12649_v3 = vld [vmem:[#allocation40_spill] sm:$0xff]  ;;  %v7434_v26 = vld [vmem:[#allocation5 + $0x58] sm:$0xff]   ;;  %6512 = vmatpush3.bf16.msra.mxu0 %v7433_v34  ;;  %v12659_v38 = vld [vmem:[#allocation18_spill] sm:$0xff] }
 0x3dc   : > { %v9737_v13 = vsel %vm12647_vm5, %v5089_v33, %v11975_v40  ;;  %v4056_v25 = vmul.f32 %v6973_v2, %v9641_v36  ;;  %v6975_v56 = vadd.f32 %v12649_v3, %v3210_v22  ;;  %v3212_v20 = vpop.f32.mrb[11].mxu1  ;;  %v4323_v4 = vrot.slane %v9730_v35, 7  ;;  %v7435_v3 = vld [vmem:[#allocation5 + $0x18] sm:$0xff]   ;;  %6513 = vmatprep.subr.bf16.mxu0 %v7434_v26  ;;  %vm12668_vm5 = vmmov %vm12666_vm0 }
 0x3dd   : > { %12648 = vst [vmem:[#allocation38_spill] sm:$0xff] %v9737_v13  ;;  %v4057_v31 = vmul.f32 %v6974_v14, %v9643_v37  ;;  %v4324_v33 = vrot.slane %v9739_v8, 7  ;;  %v12650_v39 = vld [vmem:[#allocation43_spill] sm:$0xff]  ;;  %v9756_v28 = vsel %vm12651_vm8, %v4320_v15, %v4322_v44  ;;  %vm12670_vm8 = vmmov %vm12666_vm0 }
 0x3de   : > { %v4132_v2 = vadd.f32 %v9646_v59, %v4056_v25  ;;  %v4058_v22 = vmul.f32 %v6975_v56, %v9641_v36  ;;  %v6976_v48 = vadd.f32 %v12650_v39, %v3212_v20  ;;  %12652 = vst [vmem:[#allocation69_spill] sm:$0xff] %v9756_v28  ;;  %v9760_v14 = vsel %vm12653_vm9, %v4321_v49, %v4323_v4  ;;  %v12660_v39 = vld [vmem:[#allocation20_spill] sm:$0xff]  ;;  %vm12675_vm9 = vmmov %vm12666_vm0 }
 0x3df   : > { %v4133_v40 = vadd.f32 %v9649_v7, %v4057_v31  ;;  %12654 = vst [vmem:[#allocation70_spill] sm:$0xff] %v9760_v14  ;;  %v9767_v56 = vsel %vm12655_vm7, %v4322_v44, %v4324_v33  ;;  %v12657_v31 = vrot.slane %v9666_v5, 7  ;;  %6514 = vmatpush3.bf16.msra.mxu0 %v7435_v3  ;;  %vm12677_vm7 = vmmov %vm12666_vm0 }
 0x3e0   : > { %v9762_v17 = vmax.f32 %v4132_v2, 0.0  ;;  %v4134_v25 = vadd.f32 %v9646_v59, %v4058_v22  ;;  %12656 = vst [vmem:[#allocation71_spill] sm:$0xff] %v9767_v56  ;;  %v4059_v15 = vmul.f32 %v6976_v48, %v9643_v37  ;;  %v7436_v2 = vld [vmem:[#allocation5 + $0x60] sm:$0xff]  }
 0x3e1   : > { %v9773_v20 = vsel %vm12637_vm4, %v12657_v31, %v4321_v49  ;;  %v9775_v34 = vmax.f32 %v4133_v40, 0.0  ;;  %v3216_v26 = vpop.f32.mrb[12].mxu1  ;;  %6515 = vmatprep.subr.bf16.mxu0 %v7436_v2  ;;  %vm12679_vm4 = vmmov %vm12666_vm0 }
 0x3e2   : > { %12658 = vst [vmem:[#allocation72_spill] sm:$0xff] %v9773_v20  ;;  %v4325_v44 = vrot.slane %v9762_v17, 7  ;;  %v9784_v45 = vmax.f32 %v4134_v25, 0.0  ;;  %v6977_v49 = vadd.f32 %v12659_v38, %v3216_v26  ;;  %v3218_v31 = vpop.f32.mrb[13].mxu1  ;;  %v4135_v13 = vadd.f32 %v9649_v7, %v4059_v15  ;;  %v12661_v38 = vld [vmem:[#allocation21_spill] sm:$0xff] }
 0x3e3   : > { %v4326_v40 = vrot.slane %v9775_v34, 7  ;;  %v6978_v52 = vadd.f32 %v12660_v39, %v3218_v31  ;;  %v3220_v5 = vpop.f32.mrb[14].mxu1  ;;  %v7438_v39 = vld [vmem:[#allocation5 + $0x68] sm:$0xff]   ;;  %6516 = vmatpush3.bf16.msra.mxu0 %v7437_v63  ;;  %v7440_v63 = vld [vmem:[#allocation5 + $0x70] sm:$0xff]  }
 0x3e4   : > { %v4060_v22 = vmul.f32 %v6977_v49, %v9641_v36  ;;  %v6979_v26 = vadd.f32 %v12661_v38, %v3220_v5  ;;  %v3222_v3 = vpop.f32.mrb[15].mxu1  ;;  %v9795_v55 = vmax.f32 %v4135_v13, 0.0  ;;  %v7439_v49 = vld [vmem:[#allocation5 + $0x28] sm:$0xff]   ;;  %v12665_v5 = vrot.slane %v9784_v45, 7  ;;  %6517 = vmatprep.subr.bf16.mxu0 %v7438_v39 }
 0x3e5   : > { %v4061_v48 = vmul.f32 %v6978_v52, %v9643_v37  ;;  %v6980_v15 = vadd.f32 %v12662_v46, %v3222_v3  ;;  %v9801_v31 = vsel %vm12663_vm12, %v4324_v33, %v4326_v40  ;;  %v9813_v46 = vsel %vm12668_vm5, %v4323_v4, %v4325_v44  ;;  %v7441_v3 = vld [vmem:[#allocation5 + $0x30] sm:$0xff]   ;;  %vm12682_vm12 = vmmov %vm12666_vm0 }
 0x3e6   : > { %12664 = vst [vmem:[#allocation73_spill] sm:$0xff] %v9801_v31  ;;  %v4136_v23 = vadd.f32 %v9646_v59, %v4060_v22  ;;  %v4062_v25 = vmul.f32 %v6979_v26, %v9641_v36  ;;  %v9809_v13 = vsel %vm12666_vm0, %v4325_v44, %v12665_v5  ;;  %12669 = vst [vmem:[#allocation37_spill] sm:$0xff] %v9813_v46  ;;  %v4328_v52 = vrot.slane %v9795_v55, 7 }
 0x3e7   : > { %12667 = vst [vmem:[#allocation74_spill] sm:$0xff] %v9809_v13  ;;  %v4137_v2 = vadd.f32 %v9649_v7, %v4061_v48  ;;  %v4063_v22 = vmul.f32 %v6980_v15, %v9643_v37  ;;  %6518 = vmatpush3.bf16.msra.mxu0 %v7439_v49  ;;  %vm12687_vm5 = vmmov %vm12666_vm0 }
 0x3e8   : > { %v9819_v38 = vmax.f32 %v4136_v23, 0.0  ;;  %v4138_v26 = vadd.f32 %v9646_v59, %v4062_v25  ;;  %v9831_v48 = vsel %vm12670_vm8, %v4326_v40, %v4328_v52  ;;  %6519 = vmatprep.subr.bf16.mxu0 %v7440_v63  ;;  %vm12689_vm8 = vmmov %vm12666_vm0 }
 0x3e9   : > { %v9826_v44 = vmax.f32 %v4137_v2, 0.0  ;;  %v4139_v5 = vadd.f32 %v9649_v7, %v4063_v22  ;;  %v3226_v33 = vpop.f32.mrb[16].mxu1  ;;  %12671 = vst [vmem:[#allocation75_spill] sm:$0xff] %v9831_v48 }
 0x3ea   : > { %v4329_v25 = vrot.slane %v9819_v38, 7  ;;  %v9837_v39 = vmax.f32 %v4138_v26, 0.0  ;;  %v6981_v4 = vadd.f32 %v9055_v0, %v3226_v33  ;;  %v3228_v2 = vpop.f32.mrb[17].mxu1  ;;  %v12673_v33 = vld [vmem:[#allocation81_spill] sm:$0xff] }
 0x3eb   : > { %v4330_v22 = vrot.slane %v9826_v44, 7  ;;  %v9842_v40 = vmax.f32 %v4139_v5, 0.0  ;;  %v6982_v58 = vadd.f32 %v12672_v6, %v3228_v2  ;;  %v3230_v23 = vpop.f32.mrb[18].mxu1  ;;  %6520 = vmatpush3.bf16.msra.mxu0 %v7441_v3 }
 0x3ec   : > { %v4331_v15 = vrot.slane %v9837_v39, 7  ;;  %v4064_v0 = vmul.f32 %v6981_v4, %v9641_v36  ;;  %v6983_v49 = vadd.f32 %v12673_v33, %v3230_v23  ;;  %v3232_v60 = vpop.f32.mrb[19].mxu1  ;;  %6521 = vmatprep.subr.bf16.mxu0 %v7442_v21 }
 0x3ed   : > { %v4332_v1 = vrot.slane %v9842_v40, 7  ;;  %v4065_v5 = vmul.f32 %v6982_v58, %v9643_v37  ;;  %v6984_v6 = vadd.f32 %v12674_v29, %v3232_v60  ;;  %v9859_v23 = vsel %vm12675_vm9, %v4328_v52, %v4330_v22  ;;  %vm12691_vm9 = vmmov %vm12666_vm0 }
 0x3ee   : > { %v4140_v63 = vadd.f32 %v9646_v59, %v4064_v0  ;;  %v4066_v2 = vmul.f32 %v6983_v49, %v9641_v36  ;;  %12676 = vst [vmem:[#allocation76_spill] sm:$0xff] %v9859_v23  ;;  %v9869_v60 = vsel %vm12679_vm4, %v4329_v25, %v4331_v15  ;;  %v12681_v0 = vrot.slane %v9784_v45, 7  ;;  %vm12701_vm4 = vmmov %vm12666_vm0 }
 0x3ef   : > { %v4141_v33 = vadd.f32 %v9649_v7, %v4065_v5  ;;  %v4067_v26 = vmul.f32 %v6984_v6, %v9643_v37  ;;  %v9865_v29 = vsel %vm12677_vm7, %v4330_v22, %v4332_v1  ;;  %12680 = vst [vmem:[#allocation77_spill] sm:$0xff] %v9869_v60  ;;  %6522 = vmatpush3.bf16.msra.mxu0 %v7443_v10  ;;  %v12684_v6 = vld [vmem:[#allocation83_spill] sm:$0xff]  ;;  %vm12699_vm7 = vmmov %vm12666_vm0 }
 0x3f0   : > { %12678 = vst [vmem:[#allocation78_spill] sm:$0xff] %v9865_v29  ;;  %v9871_v58 = vmax.f32 %v4140_v63, 0.0  ;;  %v4142_v3 = vadd.f32 %v9646_v59, %v4066_v2  ;;  %v9880_v21 = vsel %vm12682_vm12, %v12681_v0, %v4329_v25  ;;  %vm12703_vm12 = vmmov %vm12666_vm0 }
 0x3f1   : > { %12683 = vst [vmem:[#allocation29_spill] sm:$0xff] %v9880_v21  ;;  %v9882_v49 = vmax.f32 %v4141_v33, 0.0  ;;  %v4143_v22 = vadd.f32 %v9649_v7, %v4067_v26  ;;  %v3236_v5 = vpop.f32.mrb[20].mxu1 }
 0x3f2   : > { %v4333_v2 = vrot.slane %v9871_v58, 7  ;;  %v9891_v4 = vmax.f32 %v4142_v3, 0.0  ;;  %v6985_v25 = vadd.f32 %v9067_v51, %v3236_v5  ;;  %v3238_v0 = vpop.f32.mrb[21].mxu1 }
 0x3f3   : > { %v4334_v33 = vrot.slane %v9882_v49, 7  ;;  %v9896_v18 = vmax.f32 %v4143_v22, 0.0  ;;  %v6986_v21 = vadd.f32 %v12684_v6, %v3238_v0  ;;  %v3240_v60 = vpop.f32.mrb[22].mxu1  ;;  %v12685_v22 = vld [vmem:[#allocation84_spill] sm:$0xff] }
 0x3f4   : > { %v4335_v63 = vrot.slane %v9891_v4, 7  ;;  %v4068_v3 = vmul.f32 %v6985_v25, %v9641_v36  ;;  %v6987_v52 = vadd.f32 %v9071_v47, %v3240_v60  ;;  %v3242_v51 = vpop.f32.mrb[23].mxu1 }
 0x3f5   : > { %v4336_v10 = vrot.slane %v9896_v18, 7  ;;  %v4069_v26 = vmul.f32 %v6986_v21, %v9643_v37  ;;  %v6988_v23 = vadd.f32 %v12685_v22, %v3242_v51  ;;  %v9911_v61 = vsel %vm12666_vm0, %v4332_v1, %v4334_v33 }
 0x3f6   : > { %v4144_v6 = vadd.f32 %v9646_v59, %v4068_v3  ;;  %v4070_v0 = vmul.f32 %v6987_v52, %v9641_v36  ;;  %12686 = vst [vmem:[#allocation30_spill] sm:$0xff] %v9911_v61  ;;  %v9915_v47 = vsel %vm12687_vm5, %v4333_v2, %v4335_v63  ;;  %v9925_v3 = vsel %vm12691_vm9, %v4331_v15, %v4333_v2  ;;  %vm12712_vm5 = vmmov %vm12666_vm0 }
 0x3f7   : > { %12688 = vst [vmem:[#allocation32_spill] sm:$0xff] %v9915_v47  ;;  %v4145_v60 = vadd.f32 %v9649_v7, %v4069_v26  ;;  %v4071_v25 = vmul.f32 %v6988_v23, %v9643_v37  ;;  %v9921_v21 = vsel %vm12689_vm8, %v4334_v33, %v4336_v10  ;;  %12692 = vst [vmem:[#allocation35_spill] sm:$0xff] %v9925_v3  ;;  %v12697_v47 = vld [vmem:[#allocation85_spill] sm:$0xff] }
 0x3f8   : > { %12690 = vst [vmem:[#allocation31_spill] sm:$0xff] %v9921_v21  ;;  %v9927_v52 = vmax.f32 %v4144_v6, 0.0  ;;  %v4146_v1 = vadd.f32 %v9646_v59, %v4070_v0  ;;  %vm12714_vm8 = vmmov %vm12666_vm0 }
 0x3f9   : > { %v9934_v22 = vmax.f32 %v4145_v60, 0.0  ;;  %v4147_v23 = vadd.f32 %v9649_v7, %v4071_v25  ;;  %v3246_v33 = vpop.f32.mrb[24].mxu1  ;;  %vm12716_vm9 = vmmov %vm12666_vm0 }
 0x3fa   : > { %12693 = vst [vmem:[#allocation34_spill] sm:$0xff] %v9927_v52  ;;  %v4337_v2 = vrot.slane %v9927_v52, 7  ;;  %v9943_v0 = vmax.f32 %v4146_v1, 0.0  ;;  %v6989_v51 = vadd.f32 %v9078_v16, %v3246_v33  ;;  %v3248_v26 = vpop.f32.mrb[25].mxu1 }
 0x3fb   : > { %12694 = vst [vmem:[#allocation39_spill] sm:$0xff] %v9934_v22  ;;  %v4338_v60 = vrot.slane %v9934_v22, 7  ;;  %v9948_v3 = vmax.f32 %v4147_v23, 0.0  ;;  %v6990_v5 = vadd.f32 %v12697_v47, %v3248_v26  ;;  %v3250_v61 = vpop.f32.mrb[26].mxu1  ;;  %v12698_v23 = vld [vmem:[#allocation86_spill] sm:$0xff] }
 0x3fc   : > { %12695 = vst [vmem:[#allocation36_spill] sm:$0xff] %v9943_v0  ;;  %v4339_v15 = vrot.slane %v9943_v0, 7  ;;  %v4072_v6 = vmul.f32 %v6989_v51, %v9641_v36  ;;  %v6991_v1 = vadd.f32 %v9082_v54, %v3250_v61  ;;  %v3252_v29 = vpop.f32.mrb[27].mxu1 }
 0x3fd   : > { %12696 = vst [vmem:[#allocation42_spill] sm:$0xff] %v9948_v3  ;;  %v4340_v16 = vrot.slane %v9948_v3, 7  ;;  %v4073_v25 = vmul.f32 %v6990_v5, %v9643_v37  ;;  %v6992_v46 = vadd.f32 %v12698_v23, %v3252_v29  ;;  %v9963_v21 = vsel %vm12699_vm7, %v4336_v10, %v4338_v60  ;;  %vm12718_vm7 = vmmov %vm12666_vm0 }
 0x3fe   : > { %v4148_v47 = vadd.f32 %v9646_v59, %v4072_v6  ;;  %v4074_v26 = vmul.f32 %v6991_v1, %v9641_v36  ;;  %12700 = vst [vmem:[#allocation40_spill] sm:$0xff] %v9963_v21  ;;  %v9967_v54 = vsel %vm12701_vm4, %v4337_v2, %v4339_v15  ;;  %v9977_v29 = vsel %vm12666_vm0, %v4335_v63, %v4337_v2  ;;  %vm12726_vm4 = vmmov %vm12666_vm0 }
 0x3ff   : > { %12702 = vst [vmem:[#allocation43_spill] sm:$0xff] %v9967_v54  ;;  %v4149_v61 = vadd.f32 %v9649_v7, %v4073_v25  ;;  %v4075_v51 = vmul.f32 %v6992_v46, %v9643_v37  ;;  %v9973_v5 = vsel %vm12703_vm12, %v4338_v60, %v4340_v16  ;;  %12705 = vst [vmem:[#allocation20_spill] sm:$0xff] %v9977_v29  ;;  %v12710_v54 = vld [vmem:[#allocation87_spill] sm:$0xff] }
 0x400   : > { %12704 = vst [vmem:[#allocation18_spill] sm:$0xff] %v9973_v5  ;;  %v9979_v6 = vmax.f32 %v4148_v47, 0.0  ;;  %v4150_v10 = vadd.f32 %v9646_v59, %v4074_v26  ;;  %vm12728_vm12 = vmmov %vm12666_vm0 }
 0x401   : > { %v9986_v23 = vmax.f32 %v4149_v61, 0.0  ;;  %v4151_v46 = vadd.f32 %v9649_v7, %v4075_v51  ;;  %v3256_v60 = vpop.f32.mrb[28].mxu1 }
 0x402   : > { %12706 = vst [vmem:[#allocation21_spill] sm:$0xff] %v9979_v6  ;;  %v4341_v2 = vrot.slane %v9979_v6, 7  ;;  %v9995_v26 = vmax.f32 %v4150_v10, 0.0  ;;  %v6993_v1 = vadd.f32 %v9090_v42, %v3256_v60  ;;  %v3258_v25 = vpop.f32.mrb[29].mxu1 }
 0x403   : > { %12707 = vst [vmem:[#allocation79_spill] sm:$0xff] %v9986_v23  ;;  %v4342_v61 = vrot.slane %v9986_v23, 7  ;;  %v10000_v29 = vmax.f32 %v4151_v46, 0.0  ;;  %v6994_v33 = vadd.f32 %v12710_v54, %v3258_v25  ;;  %v3260_v21 = vpop.f32.mrb[30].mxu1  ;;  %v12711_v46 = vld [vmem:[#allocation88_spill] sm:$0xff] }
 0x404   : > { %12708 = vst [vmem:[#allocation80_spill] sm:$0xff] %v9995_v26  ;;  %v4343_v63 = vrot.slane %v9995_v26, 7  ;;  %v4076_v47 = vmul.f32 %v6993_v1, %v9641_v36  ;;  %v6995_v10 = vadd.f32 %v9094_v43, %v3260_v21  ;;  %v3262_v13 = vpop.f32.mrb[31].mxu1 }
 0x405   : > { %12709 = vst [vmem:[#allocation81_spill] sm:$0xff] %v10000_v29  ;;  %v4344_v42 = vrot.slane %v10000_v29, 7  ;;  %v4077_v51 = vmul.f32 %v6994_v33, %v9643_v37  ;;  %v6996_v31 = vadd.f32 %v12711_v46, %v3262_v13  ;;  %v10015_v5 = vsel %vm12712_vm5, %v4340_v16, %v4342_v61  ;;  %vm12731_vm5 = vmmov %vm12666_vm0 }
 0x406   : > { %v4152_v54 = vadd.f32 %v9646_v59, %v4076_v47  ;;  %v4078_v25 = vmul.f32 %v6995_v10, %v9641_v36  ;;  %12713 = vst [vmem:[#allocation82_spill] sm:$0xff] %v10015_v5  ;;  %v10019_v43 = vsel %vm12714_vm8, %v4341_v2, %v4343_v63  ;;  %v10029_v13 = vsel %vm12718_vm7, %v4339_v15, %v4341_v2  ;;  %vm12740_vm8 = vmmov %vm12666_vm0 }
 0x407   : > { %12715 = vst [vmem:[#allocation83_spill] sm:$0xff] %v10019_v43  ;;  %v4153_v21 = vadd.f32 %v9649_v7, %v4077_v51  ;;  %v4079_v1 = vmul.f32 %v6996_v31, %v9643_v37  ;;  %v10025_v33 = vsel %vm12716_vm9, %v4342_v61, %v4344_v42  ;;  %12719 = vst [vmem:[#allocation85_spill] sm:$0xff] %v10029_v13  ;;  %v12724_v43 = vld [vmem:[#allocation89_spill] sm:$0xff] }
 0x408   : > { %12717 = vst [vmem:[#allocation84_spill] sm:$0xff] %v10025_v33  ;;  %v10031_v47 = vmax.f32 %v4152_v54, 0.0  ;;  %v4154_v16 = vadd.f32 %v9646_v59, %v4078_v25  ;;  %vm12742_vm9 = vmmov %vm12666_vm0 }
 0x409   : > { %v10038_v46 = vmax.f32 %v4153_v21, 0.0  ;;  %v4155_v31 = vadd.f32 %v9649_v7, %v4079_v1  ;;  %v3266_v61 = vpop.f32.mrb[32].mxu1  ;;  %vm12744_vm7 = vmmov %vm12666_vm0 }
 0x40a   : > { %12720 = vst [vmem:[#allocation86_spill] sm:$0xff] %v10031_v47  ;;  %v4345_v2 = vrot.slane %v10031_v47, 7  ;;  %v10047_v25 = vmax.f32 %v4154_v16, 0.0  ;;  %v6997_v10 = vadd.f32 %v9102_v30, %v3266_v61  ;;  %v3268_v51 = vpop.f32.mrb[33].mxu1 }
 0x40b   : > { %12721 = vst [vmem:[#allocation87_spill] sm:$0xff] %v10038_v46  ;;  %v4346_v21 = vrot.slane %v10038_v46, 7  ;;  %v10052_v13 = vmax.f32 %v4155_v31, 0.0  ;;  %v6998_v60 = vadd.f32 %v12724_v43, %v3268_v51  ;;  %v3270_v5 = vpop.f32.mrb[34].mxu1  ;;  %v12725_v31 = vld [vmem:[#allocation90_spill] sm:$0xff] }
 0x40c   : > { %12722 = vst [vmem:[#allocation88_spill] sm:$0xff] %v10047_v25  ;;  %v4347_v15 = vrot.slane %v10047_v25, 7  ;;  %v4080_v54 = vmul.f32 %v6997_v10, %v9641_v36  ;;  %v6999_v16 = vadd.f32 %v9106_v32, %v3270_v5  ;;  %v3272_v48 = vpop.f32.mrb[35].mxu1 }
 0x40d   : > { %12723 = vst [vmem:[#allocation109_spill] sm:$0xff] %v10052_v13  ;;  %v4348_v30 = vrot.slane %v10052_v13, 7  ;;  %v4081_v1 = vmul.f32 %v6998_v60, %v9643_v37  ;;  %v7000_v20 = vadd.f32 %v12725_v31, %v3272_v48  ;;  %v10067_v33 = vsel %vm12726_vm4, %v4344_v42, %v4346_v21  ;;  %vm12746_vm4 = vmmov %vm12666_vm0 }
 0x40e   : > { %v4156_v43 = vadd.f32 %v9646_v59, %v4080_v54  ;;  %v4082_v51 = vmul.f32 %v6999_v16, %v9641_v36  ;;  %12727 = vst [vmem:[#allocation89_spill] sm:$0xff] %v10067_v33  ;;  %v10071_v32 = vsel %vm12728_vm12, %v4345_v2, %v4347_v15  ;;  %v10081_v48 = vsel %vm12731_vm5, %v4343_v63, %v4345_v2  ;;  %vm12756_vm12 = vmmov %vm12666_vm0 }
 0x40f   : > { %12729 = vst [vmem:[#allocation90_spill] sm:$0xff] %v10071_v32  ;;  %v4157_v5 = vadd.f32 %v9649_v7, %v4081_v1  ;;  %v4083_v10 = vmul.f32 %v7000_v20, %v9643_v37  ;;  %v10077_v60 = vsel %vm12666_vm0, %v4346_v21, %v4348_v30  ;;  %12732 = vst [vmem:[#allocation111_spill] sm:$0xff] %v10081_v48  ;;  %v12737_v32 = vld [vmem:[#allocation91_spill] sm:$0xff] }
 0x410   : > { %12730 = vst [vmem:[#allocation110_spill] sm:$0xff] %v10077_v60  ;;  %v10083_v54 = vmax.f32 %v4156_v43, 0.0  ;;  %v4158_v42 = vadd.f32 %v9646_v59, %v4082_v51  ;;  %vm12759_vm5 = vmmov %vm12666_vm0 }
 0x411   : > { %v10090_v31 = vmax.f32 %v4157_v5, 0.0  ;;  %v4159_v20 = vadd.f32 %v9649_v7, %v4083_v10  ;;  %v3276_v21 = vpop.f32.mrb[36].mxu1 }
 0x412   : > { %12733 = vst [vmem:[#allocation112_spill] sm:$0xff] %v10083_v54  ;;  %v4349_v2 = vrot.slane %v10083_v54, 7  ;;  %v10099_v51 = vmax.f32 %v4158_v42, 0.0  ;;  %v7001_v16 = vadd.f32 %v9114_v41, %v3276_v21  ;;  %v3278_v1 = vpop.f32.mrb[37].mxu1  ;;  %v12738_v42 = vld [vmem:[#allocation92_spill] sm:$0xff] }
 0x413   : > { %12734 = vst [vmem:[#allocation113_spill] sm:$0xff] %v10090_v31  ;;  %v4350_v5 = vrot.slane %v10090_v31, 7  ;;  %v10104_v48 = vmax.f32 %v4159_v20, 0.0  ;;  %v7002_v61 = vadd.f32 %v12737_v32, %v3278_v1  ;;  %v3280_v33 = vpop.f32.mrb[38].mxu1  ;;  %v12739_v20 = vld [vmem:[#allocation93_spill] sm:$0xff] }
 0x414   : > { %12735 = vst [vmem:[#allocation114_spill] sm:$0xff] %v10099_v51  ;;  %v4351_v63 = vrot.slane %v10099_v51, 7  ;;  %v4084_v43 = vmul.f32 %v7001_v16, %v9641_v36  ;;  %v7003_v14 = vadd.f32 %v12738_v42, %v3280_v33  ;;  %v3282_v28 = vpop.f32.mrb[39].mxu1 }
 0x415   : > { %12736 = vst [vmem:[#allocation115_spill] sm:$0xff] %v10104_v48  ;;  %v4352_v41 = vrot.slane %v10104_v48, 7  ;;  %v4085_v10 = vmul.f32 %v7002_v61, %v9643_v37  ;;  %v7004_v56 = vadd.f32 %v12739_v20, %v3282_v28  ;;  %v10119_v60 = vsel %vm12740_vm8, %v4348_v30, %v4350_v5  ;;  %vm12761_vm8 = vmmov %vm12666_vm0 }
 0x416   : > { %v4160_v32 = vadd.f32 %v9646_v59, %v4084_v43  ;;  %v4086_v1 = vmul.f32 %v7003_v14, %v9641_v36  ;;  %12741 = vst [vmem:[#allocation91_spill] sm:$0xff] %v10119_v60  ;;  %v10123_v33 = vsel %vm12742_vm9, %v4349_v2, %v4351_v63  ;;  %v10133_v28 = vsel %vm12746_vm4, %v4347_v15, %v4349_v2  ;;  %v12751_v43 = vld [vmem:[#allocation94_spill] sm:$0xff]  ;;  %vm12771_vm9 = vmmov %vm12666_vm0 }
 0x417   : > { %12743 = vst [vmem:[#allocation92_spill] sm:$0xff] %v10123_v33  ;;  %v4161_v16 = vadd.f32 %v9649_v7, %v4085_v10  ;;  %v4087_v42 = vmul.f32 %v7004_v56, %v9643_v37  ;;  %v10129_v61 = vsel %vm12744_vm7, %v4350_v5, %v4352_v41  ;;  %12747 = vst [vmem:[#allocation116_spill] sm:$0xff] %v10133_v28  ;;  %v12753_v33 = vld [vmem:[#allocation95_spill] sm:$0xff] }
 0x418   : > { %12745 = vst [vmem:[#allocation93_spill] sm:$0xff] %v10129_v61  ;;  %v10135_v14 = vmax.f32 %v4160_v32, 0.0  ;;  %v4162_v30 = vadd.f32 %v9646_v59, %v4086_v1  ;;  %vm12773_vm7 = vmmov %vm12666_vm0 }
 0x419   : > { %v10142_v20 = vmax.f32 %v4161_v16, 0.0  ;;  %v4163_v56 = vadd.f32 %v9649_v7, %v4087_v42  ;;  %v3286_v5 = vpop.f32.mrb[40].mxu1  ;;  %vm12775_vm4 = vmmov %vm12666_vm0 }
 0x41a   : > { %12748 = vst [vmem:[#allocation117_spill] sm:$0xff] %v10135_v14  ;;  %v4353_v2 = vrot.slane %v10135_v14, 7  ;;  %v10151_v1 = vmax.f32 %v4162_v30, 0.0  ;;  %v7005_v60 = vadd.f32 %v12751_v43, %v3286_v5  ;;  %v3288_v10 = vpop.f32.mrb[41].mxu1  ;;  %v12754_v30 = vld [vmem:[#allocation96_spill] sm:$0xff] }
 0x41b   : > { %12749 = vst [vmem:[#allocation118_spill] sm:$0xff] %v10142_v20  ;;  %v4354_v16 = vrot.slane %v10142_v20, 7  ;;  %v10156_v28 = vmax.f32 %v4163_v56, 0.0  ;;  %v7006_v21 = vadd.f32 %v12753_v33, %v3288_v10  ;;  %v3290_v61 = vpop.f32.mrb[42].mxu1  ;;  %v12755_v56 = vld [vmem:[#allocation97_spill] sm:$0xff] }
 0x41c   : > { %12750 = vst [vmem:[#allocation119_spill] sm:$0xff] %v10151_v1  ;;  %v4355_v15 = vrot.slane %v10151_v1, 7  ;;  %v4088_v32 = vmul.f32 %v7005_v60, %v9641_v36  ;;  %v7007_v62 = vadd.f32 %v12754_v30, %v3290_v61  ;;  %v3292_v11 = vpop.f32.mrb[43].mxu1 }
 0x41d   : > { %12752 = vst [vmem:[#allocation94_spill] sm:$0xff] %v10156_v28  ;;  %v4356_v43 = vrot.slane %v10156_v28, 7  ;;  %v4089_v42 = vmul.f32 %v7006_v21, %v9643_v37  ;;  %v7008_v24 = vadd.f32 %v12755_v56, %v3292_v11  ;;  %v10171_v57 = vsel %vm12756_vm12, %v4352_v41, %v4354_v16  ;;  %vm12777_vm12 = vmmov %vm12666_vm0 }
 0x41e   : > { %v4164_v33 = vadd.f32 %v9646_v59, %v4088_v32  ;;  %v4090_v10 = vmul.f32 %v7007_v62, %v9641_v36  ;;  %12757 = vst [vmem:[#allocation95_spill] sm:$0xff] %v10171_v57  ;;  %v10175_v60 = vsel %vm12666_vm0, %v4353_v2, %v4355_v15  ;;  %v10185_v11 = vsel %vm12761_vm8, %v4351_v63, %v4353_v2  ;;  %v12766_v32 = vld [vmem:[#allocation98_spill] sm:$0xff]  ;;  %vm12791_vm8 = vmmov %vm12775_vm4 }
 0x41f   : > { %12758 = vst [vmem:[#allocation96_spill] sm:$0xff] %v10175_v60  ;;  %v4165_v61 = vadd.f32 %v9649_v7, %v4089_v42  ;;  %v4091_v30 = vmul.f32 %v7008_v24, %v9643_v37  ;;  %v10181_v21 = vsel %vm12759_vm5, %v4354_v16, %v4356_v43  ;;  %12762 = vst [vmem:[#allocation120_spill] sm:$0xff] %v10185_v11  ;;  %v12768_v60 = vld [vmem:[#allocation99_spill] sm:$0xff]  ;;  %vm12788_vm0 = vcmp.lt.s32.totalorder %v7857_v53, 7 }
 0x420   : > { %12760 = vst [vmem:[#allocation97_spill] sm:$0xff] %v10181_v21  ;;  %v10187_v62 = vmax.f32 %v4164_v33, 0.0  ;;  %v4166_v41 = vadd.f32 %v9646_v59, %v4090_v10  ;;  %vm12790_vm5 = vmmov %vm12775_vm4 }
 0x421   : > { %v10194_v56 = vmax.f32 %v4165_v61, 0.0  ;;  %v4167_v24 = vadd.f32 %v9649_v7, %v4091_v30  ;;  %v3296_v16 = vpop.f32.mrb[44].mxu1 }
 0x422   : > { %12763 = vst [vmem:[#allocation121_spill] sm:$0xff] %v10187_v62  ;;  %v4357_v2 = vrot.slane %v10187_v62, 7  ;;  %v10203_v10 = vmax.f32 %v4166_v41, 0.0  ;;  %v7009_v57 = vadd.f32 %v12766_v32, %v3296_v16  ;;  %v3298_v42 = vpop.f32.mrb[45].mxu1  ;;  %v12769_v41 = vld [vmem:[#allocation100_spill] sm:$0xff]  ;;  %v12784_v16 = vld [vmem:[#allocation103_spill] sm:$0xff] }
 0x423   : > { %12764 = vst [vmem:[#allocation122_spill] sm:$0xff] %v10194_v56  ;;  %v4358_v61 = vrot.slane %v10194_v56, 7  ;;  %v10208_v11 = vmax.f32 %v4167_v24, 0.0  ;;  %v7010_v5 = vadd.f32 %v12768_v60, %v3298_v42  ;;  %v3300_v21 = vpop.f32.mrb[46].mxu1  ;;  %v12770_v24 = vld [vmem:[#allocation101_spill] sm:$0xff] }
 0x424   : > { %12765 = vst [vmem:[#allocation123_spill] sm:$0xff] %v10203_v10  ;;  %v4359_v63 = vrot.slane %v10203_v10, 7  ;;  %v4092_v33 = vmul.f32 %v7009_v57, %v9641_v36  ;;  %v7011_v48 = vadd.f32 %v12769_v41, %v3300_v21  ;;  %v3302_v25 = vpop.f32.mrb[47].mxu1 }
 0x425   : > { %12767 = vst [vmem:[#allocation98_spill] sm:$0xff] %v10208_v11  ;;  %v4360_v32 = vrot.slane %v10208_v11, 7  ;;  %v4093_v30 = vmul.f32 %v7010_v5, %v9643_v37  ;;  %v7012_v13 = vadd.f32 %v12770_v24, %v3302_v25  ;;  %v10223_v19 = vsel %vm12771_vm9, %v4356_v43, %v4358_v61  ;;  %vm12792_vm9 = vmmov %vm12775_vm4 }
 0x426   : > { %v4168_v60 = vadd.f32 %v9646_v59, %v4092_v33  ;;  %v4094_v42 = vmul.f32 %v7011_v48, %v9641_v36  ;;  %12772 = vst [vmem:[#allocation99_spill] sm:$0xff] %v10223_v19  ;;  %v10227_v57 = vsel %vm12773_vm7, %v4357_v2, %v4359_v63  ;;  %v10237_v25 = vsel %vm12777_vm12, %v4355_v15, %v4357_v2  ;;  %v12782_v33 = vld [vmem:[#allocation102_spill] sm:$0xff]  ;;  %vm12794_vm7 = vmmov %vm12775_vm4 }
 0x427   : > { %12774 = vst [vmem:[#allocation100_spill] sm:$0xff] %v10227_v57  ;;  %v4169_v21 = vadd.f32 %v9649_v7, %v4093_v30  ;;  %v4095_v41 = vmul.f32 %v7012_v13, %v9643_v37  ;;  %v10233_v5 = vsel %vm12775_vm4, %v4358_v61, %v4360_v32  ;;  %12778 = vst [vmem:[#allocation124_spill] sm:$0xff] %v10237_v25 }
 0x428   : > { %12776 = vst [vmem:[#allocation101_spill] sm:$0xff] %v10233_v5  ;;  %v10239_v48 = vmax.f32 %v4168_v60, 0.0  ;;  %v4170_v43 = vadd.f32 %v9646_v59, %v4094_v42  ;;  %v12785_v60 = vld [vmem:[#allocation105_spill] sm:$0xff]  ;;  %vm12799_vm4 = vmmov %vm12788_vm0 }
 0x429   : > { %v10246_v24 = vmax.f32 %v4169_v21, 0.0  ;;  %v4171_v13 = vadd.f32 %v9649_v7, %v4095_v41  ;;  %v3306_v61 = vpop.f32.mrb[48].mxu1  ;;  %v7444_v21 = vld [vmem:[#allocation5 + $0xc0] sm:$0xff]   ;;  %v12786_v41 = vld [vmem:[#allocation106_spill] sm:$0xff]  ;;  %vm12801_vm12 = vmmov %vm12790_vm5 }
 0x42a   : > { %12779 = vst [vmem:[#allocation125_spill] sm:$0xff] %v10239_v48  ;;  %v4361_v2 = vrot.slane %v10239_v48, 7  ;;  %v10255_v42 = vmax.f32 %v4170_v43, 0.0  ;;  %v7013_v19 = vadd.f32 %v12782_v33, %v3306_v61  ;;  %v3308_v30 = vpop.f32.mrb[49].mxu1  ;;  %6619 = vmatprep.subr.bf16.mxu0 %v7444_v21 }
 0x42b   : > { %12780 = vst [vmem:[#allocation126_spill] sm:$0xff] %v10246_v24  ;;  %v4362_v25 = vrot.slane %v10246_v24, 7  ;;  %v10260_v57 = vmax.f32 %v4171_v13, 0.0  ;;  %v7014_v5 = vadd.f32 %v12784_v16, %v3308_v30  ;;  %v3310_v51 = vpop.f32.mrb[50].mxu1  ;;  %v12787_v16 = vrot.slane %v10239_v48, 1 }
 0x42c   : > { %12781 = vst [vmem:[#allocation127_spill] sm:$0xff] %v10255_v42  ;;  %v4363_v15 = vrot.slane %v10255_v42, 7  ;;  %v5133_v28 = vrot.slane %v10255_v42, 1  ;;  %v4096_v43 = vmul.f32 %v7013_v19, %v9641_v36  ;;  %v7015_v20 = vadd.f32 %v12785_v60, %v3310_v51  ;;  %v3312_v33 = vpop.f32.mrb[51].mxu1 }
 0x42d   : > { %12783 = vst [vmem:[#allocation102_spill] sm:$0xff] %v10260_v57  ;;  %v4364_v61 = vrot.slane %v10260_v57, 7  ;;  %v4097_v13 = vmul.f32 %v7014_v5, %v9643_v37  ;;  %v7016_v31 = vadd.f32 %v12786_v41, %v3312_v33  ;;  %v10281_v60 = vsel %vm12790_vm5, %v4360_v32, %v4362_v25 }
 0x42e   : > { %v10275_v30 = vsel %vm12788_vm0, %v12787_v16, %v5133_v28  ;;  %v4172_v19 = vadd.f32 %v9646_v59, %v4096_v43  ;;  %v4098_v51 = vmul.f32 %v7015_v20, %v9641_v36  ;;  %v10291_v33 = vsel %vm12792_vm9, %v4361_v2, %v4363_v15  ;;  %vm12802_vm0 = vmmov %vm12790_vm5 }
 0x42f   : > { %12789 = vst [vmem:[#allocation103_spill] sm:$0xff] %v10275_v30  ;;  %v4173_v21 = vadd.f32 %v9649_v7, %v4097_v13  ;;  %v4099_v5 = vmul.f32 %v7016_v31, %v9643_v37  ;;  %v10287_v41 = vsel %vm12791_vm8, %v4362_v25, %v4364_v61  ;;  %v10300_v43 = vsel %vm12794_vm7, %v4359_v63, %v4361_v2  ;;  %vm12803_vm5 = vmmov %vm12799_vm4 }
 0x430   : > { %v10293_v16 = vmax.f32 %v4172_v19, 0.0  ;;  %v4174_v20 = vadd.f32 %v9646_v59, %v4098_v51  ;;  %12795 = vst [vmem:[#allocation106_spill] sm:$0xff] %v10300_v43  ;;  %vm12805_vm8 = vmmov %vm12802_vm0  ;;  %v12807_v43 = vrot.slane %v9713_v12, 1  ;;  %v12823_v42 = vrot.slane %v9704_v9, 1 }
 0x431   : > { %v10302_v31 = vmax.f32 %v4173_v21, 0.0  ;;  %v4175_v25 = vadd.f32 %v9649_v7, %v4099_v5  ;;  %vm12806_vm9 = vmmov %vm12802_vm0 }
 0x432   : > { %12793 = vst [vmem:[#allocation105_spill] sm:$0xff] %v10293_v16  ;;  %v4365_v54 = vrot.slane %v10293_v16, 7  ;;  %v5135_v51 = vrot.slane %v10293_v16, 1  ;;  %v10311_v59 = vmax.f32 %v4174_v20, 0.0  ;;  %vm12809_vm7 = vmmov %vm12799_vm4  ;;  %v12815_v21 = vmov %v12807_v43 }
 0x433   : > { %12796 = vst [vmem:[#allocation128_spill] sm:$0xff] %v10302_v31  ;;  %v4366_v2 = vrot.slane %v10302_v31, 7  ;;  %v10317_v5 = vmax.f32 %v4175_v25, 0.0  ;;  %v12819_v16 = vrot.slane %v9730_v35, 1 }
 0x434   : > { %12797 = vst [vmem:[#allocation129_spill] sm:$0xff] %v10311_v59  ;;  %v10323_v19 = vsel %vm12799_vm4, %v5133_v28, %v5135_v51  ;;  %v12075_v32 = vrot.slane %v10311_v59, 7  ;;  %v12074_v20 = vrot.slane %v10311_v59, 1  ;;  %v10329_v63 = vsel %vm12801_vm12, %v4363_v15, %v4365_v54  ;;  %vm12816_vm12 = vmmov %vm12799_vm4 }
 0x435   : > { %12798 = vst [vmem:[#allocation130_spill] sm:$0xff] %v10317_v5  ;;  %12800 = vst [vmem:[#allocation131_spill] sm:$0xff] %v10323_v19  ;;  %v12076_v25 = vrot.slane %v10317_v5, 7  ;;  %v10337_v13 = vsel %vm12802_vm0, %v4364_v61, %v4366_v2  ;;  %v12818_v19 = vrot.slane %v9762_v17, 1 }
 0x436   : > { %v10343_v28 = vsel %vm12803_vm5, %v5135_v51, %v12074_v20  ;;  %v10349_v15 = vsel %vm12805_vm8, %v4365_v54, %v12075_v32  ;;  %v12808_v32 = vrot.slane %v9671_v27, 1  ;;  %v12812_v51 = vrot.slane %v9739_v8, 1  ;;  %vm12820_vm0 = vmmov %vm12799_vm4 }
 0x437   : > { %12804 = vst [vmem:[#allocation132_spill] sm:$0xff] %v10343_v28  ;;  %v10359_v61 = vsel %vm12806_vm9, %v4366_v2, %v12076_v25  ;;  %v12811_v25 = vrot.slane %v9775_v34, 1  ;;  %vm12824_vm5 = vmmov %vm12820_vm0 }
 0x438   : > { %v10375_v2 = vsel %vm12809_vm7, %v12808_v32, %v12807_v43  ;;  %v12814_v54 = vmov %v12812_v51  ;;  %v12826_v43 = vrot.slane %v9826_v44, 1  ;;  %v12827_v32 = vrot.slane %v9795_v55, 1  ;;  %vm12828_vm8 = vmmov %vm12820_vm0 }
 0x439   : > { %12810 = vst [vmem:[#allocation133_spill] sm:$0xff] %v10375_v2  ;;  %v10383_v20 = vsel %vm12799_vm4, %v12812_v51, %v12811_v25  ;;  %v10391_v30 = vsel %vm12816_vm12, %v12815_v21, %v12814_v54  ;;  %v10403_v25 = vsel %vm12820_vm0, %v12819_v16, %v12818_v19  ;;  %v12822_v51 = vmov %v12819_v16  ;;  %vm12832_vm9 = vmmov %vm12820_vm0 }
 0x43a   : > { %12813 = vst [vmem:[#allocation134_spill] sm:$0xff] %v10383_v20  ;;  %12817 = vst [vmem:[#allocation135_spill] sm:$0xff] %v10391_v30  ;;  %v10411_v21 = vsel %vm12824_vm5, %v12823_v42, %v12822_v51  ;;  %v10421_v30 = vsel %vm12828_vm8, %v12827_v32, %v12826_v43  ;;  %v12830_v16 = vmov %v12827_v32  ;;  %v12831_v19 = vrot.slane %v9775_v34, 1 }
 0x43b   : > { %12821 = vst [vmem:[#allocation136_spill] sm:$0xff] %v10403_v25  ;;  %12825 = vst [vmem:[#allocation137_spill] sm:$0xff] %v10411_v21  ;;  %v12834_v42 = vrot.slane %v9819_v38, 1  ;;  %v12835_v51 = vrot.slane %v9784_v45, 1  ;;  %v12839_v21 = vrot.slane %v9762_v17, 1  ;;  %v12854_v2 = vrot.slane %v9819_v38, 1 }
 0x43c   : > { %12829 = vst [vmem:[#allocation138_spill] sm:$0xff] %v10421_v30  ;;  %v10429_v20 = vsel %vm12832_vm9, %v12831_v19, %v12830_v16  ;;  %vm12836_vm7 = vmmov %vm12820_vm0  ;;  %v12842_v16 = vrot.slane %v9882_v49, 1  ;;  %v12843_v19 = vrot.slane %v9842_v40, 1  ;;  %v12850_v30 = vrot.slane %v9837_v39, 1 }
 0x43d   : > { %12833 = vst [vmem:[#allocation139_spill] sm:$0xff] %v10429_v20  ;;  %v10437_v54 = vsel %vm12836_vm7, %v12835_v51, %v12834_v42  ;;  %v12838_v43 = vmov %v12835_v51  ;;  %vm12840_vm4 = vmmov %vm12820_vm0  ;;  %v12847_v51 = vrot.slane %v9826_v44, 1  ;;  %v12849_v20 = vrot.slane %v9871_v58, 1 }
 0x43e   : > { %12837 = vst [vmem:[#allocation140_spill] sm:$0xff] %v10437_v54  ;;  %v10447_v25 = vsel %vm12840_vm4, %v12839_v21, %v12838_v43  ;;  %vm12844_vm12 = vmmov %vm12820_vm0  ;;  %v12846_v42 = vmov %v12843_v19  ;;  %v12857_v43 = vrot.slane %v9934_v22, 1  ;;  %v12858_v21 = vrot.slane %v9896_v18, 1 }
 0x43f   : > { %12841 = vst [vmem:[#allocation141_spill] sm:$0xff] %v10447_v25  ;;  %v10455_v50 = vsel %vm12844_vm12, %v12843_v19, %v12842_v16  ;;  %v10463_v32 = vsel %vm12820_vm0, %v12847_v51, %v12846_v42  ;;  %vm12851_vm5 = vmmov %vm12820_vm0  ;;  %v12853_v19 = vmov %v12850_v30  ;;  %v12885_v54 = vrot.slane %v9927_v52, 1 }
 0x440   : > { %12845 = vst [vmem:[#allocation142_spill] sm:$0xff] %v10455_v50  ;;  %12848 = vst [vmem:[#allocation143_spill] sm:$0xff] %v10463_v32  ;;  %v10475_v16 = vsel %vm12851_vm5, %v12850_v30, %v12849_v20  ;;  %v12861_v30 = vmov %v12858_v21  ;;  %v12862_v20 = vrot.slane %v9882_v49, 1 }
 0x441   : > { %12852 = vst [vmem:[#allocation144_spill] sm:$0xff] %v10475_v16  ;;  %vm12855_vm8 = vmmov %vm12820_vm0 }
 0x442   : > { %v10483_v42 = vsel %vm12855_vm8, %v12854_v2, %v12853_v19  ;;  %vm12859_vm9 = vmmov %vm12820_vm0  ;;  %v12865_v2 = vrot.slane %v9927_v52, 1  ;;  %v12866_v19 = vrot.slane %v9891_v4, 1 }
 0x443   : > { %12856 = vst [vmem:[#allocation145_spill] sm:$0xff] %v10483_v42  ;;  %v10493_v32 = vsel %vm12859_vm9, %v12858_v21, %v12857_v43  ;;  %vm12863_vm7 = vmmov %vm12820_vm0  ;;  %v12870_v42 = vrot.slane %v9871_v58, 1 }
 0x444   : > { %12860 = vst [vmem:[#allocation146_spill] sm:$0xff] %v10493_v32  ;;  %v10501_v50 = vsel %vm12863_vm7, %v12862_v20, %v12861_v30  ;;  %vm12867_vm4 = vmmov %vm12820_vm0  ;;  %v12869_v43 = vmov %v12866_v19  ;;  %v12873_v30 = vrot.slane %v9986_v23, 1  ;;  %v12874_v20 = vrot.slane %v9948_v3, 1  ;;  %v7445_v3 = vld [vmem:[#allocation5 + $0x80] sm:$0xff]  }
 0x445   : > { %12864 = vst [vmem:[#allocation147_spill] sm:$0xff] %v10501_v50  ;;  %v10509_v51 = vsel %vm12867_vm4, %v12866_v19, %v12865_v2  ;;  %vm12871_vm12 = vmmov %vm12820_vm0  ;;  %v12877_v19 = vrot.slane %v9934_v22, 1  ;;  %v12880_v50 = vrot.slane %v9979_v6, 1  ;;  %v12881_v32 = vrot.slane %v9943_v0, 1 }
 0x446   : > { %12868 = vst [vmem:[#allocation148_spill] sm:$0xff] %v10509_v51  ;;  %v10519_v16 = vsel %vm12871_vm12, %v12870_v42, %v12869_v43  ;;  %v10527_v25 = vsel %vm12820_vm0, %v12874_v20, %v12873_v30  ;;  %v12876_v2 = vmov %v12874_v20  ;;  %vm12878_vm5 = vmmov %vm12820_vm0  ;;  %v12888_v43 = vrot.slane %v10038_v46, 1 }
 0x447   : > { %12872 = vst [vmem:[#allocation149_spill] sm:$0xff] %v10519_v16  ;;  %12875 = vst [vmem:[#allocation150_spill] sm:$0xff] %v10527_v25  ;;  %v10535_v21 = vsel %vm12878_vm5, %v12877_v19, %v12876_v2  ;;  %v12884_v20 = vmov %v12881_v32  ;;  %v12889_v42 = vrot.slane %v10000_v29, 1  ;;  %v12905_v16 = vld [vmem:[#allocation109_spill] sm:$0xff] }
 0x448   : > { %12879 = vst [vmem:[#allocation151_spill] sm:$0xff] %v10535_v21  ;;  %vm12882_vm8 = vmmov %vm12820_vm0  ;;  %v12906_v51 = vrot.slane %v12905_v16, 1 }
 0x449   : > { %v10547_v30 = vsel %vm12882_vm8, %v12881_v32, %v12880_v50  ;;  %vm12886_vm9 = vmmov %vm12820_vm0  ;;  %v12892_v50 = vmov %v12889_v42  ;;  %v12893_v32 = vrot.slane %v9986_v23, 1 }
 0x44a   : > { %12883 = vst [vmem:[#allocation152_spill] sm:$0xff] %v10547_v30  ;;  %v10555_v2 = vsel %vm12886_vm9, %v12885_v54, %v12884_v20  ;;  %vm12890_vm7 = vmmov %vm12820_vm0  ;;  %v12896_v54 = vrot.slane %v10031_v47, 1  ;;  %v12897_v20 = vrot.slane %v9995_v26, 1 }
 0x44b   : > { %12887 = vst [vmem:[#allocation153_spill] sm:$0xff] %v10555_v2  ;;  %v10565_v21 = vsel %vm12890_vm7, %v12889_v42, %v12888_v43  ;;  %vm12894_vm4 = vmmov %vm12820_vm0  ;;  %v12901_v2 = vrot.slane %v9979_v6, 1  ;;  %v12915_v6 = vld [vmem:[#allocation88_spill] sm:$0xff] }
 0x44c   : > { %12891 = vst [vmem:[#allocation154_spill] sm:$0xff] %v10565_v21  ;;  %v10573_v25 = vsel %vm12894_vm4, %v12893_v32, %v12892_v50  ;;  %vm12898_vm12 = vmmov %vm12820_vm0  ;;  %v12900_v43 = vmov %v12897_v20  ;;  %v12903_v50 = vld [vmem:[#allocation113_spill] sm:$0xff]  ;;  %v12916_v26 = vrot.slane %v12915_v6, 1 }
 0x44d   : > { %12895 = vst [vmem:[#allocation155_spill] sm:$0xff] %v10573_v25  ;;  %v10581_v19 = vsel %vm12898_vm12, %v12897_v20, %v12896_v54  ;;  %v10591_v30 = vsel %vm12820_vm0, %v12901_v2, %v12900_v43  ;;  %v12904_v32 = vrot.slane %v12903_v50, 1  ;;  %vm12907_vm5 = vmmov %vm12820_vm0  ;;  %v12909_v54 = vmov %v12906_v51  ;;  %v12913_v25 = vld [vmem:[#allocation112_spill] sm:$0xff]  ;;  %v12923_v43 = vld [vmem:[#allocation118_spill] sm:$0xff] }
 0x44e   : > { %12899 = vst [vmem:[#allocation156_spill] sm:$0xff] %v10581_v19  ;;  %12902 = vst [vmem:[#allocation157_spill] sm:$0xff] %v10591_v30  ;;  %v12910_v20 = vrot.slane %v10038_v46, 1  ;;  %v12914_v21 = vrot.slane %v12913_v25, 1  ;;  %v12920_v46 = vrot.slane %v10031_v47, 1  ;;  %v12924_v2 = vrot.slane %v12923_v43, 1 }
 0x44f   : > { %v10599_v23 = vsel %vm12907_vm5, %v12906_v51, %v12904_v32  ;;  %vm12911_vm8 = vmmov %vm12820_vm0  ;;  %v12919_v32 = vmov %v12916_v26 }
 0x450   : > { %12908 = vst [vmem:[#allocation158_spill] sm:$0xff] %v10599_v23  ;;  %v10607_v42 = vsel %vm12911_vm8, %v12910_v20, %v12909_v54  ;;  %vm12917_vm9 = vmmov %vm12820_vm0 }
 0x451   : > { %12912 = vst [vmem:[#allocation159_spill] sm:$0xff] %v10607_v42  ;;  %v10619_v51 = vsel %vm12917_vm9, %v12916_v26, %v12914_v21  ;;  %vm12921_vm7 = vmmov %vm12820_vm0  ;;  %v12925_v42 = vld [vmem:[#allocation115_spill] sm:$0xff]  ;;  %v12930_v21 = vrot.slane %v12903_v50, 1 }
 0x452   : > { %12918 = vst [vmem:[#allocation160_spill] sm:$0xff] %v10619_v51  ;;  %v10627_v54 = vsel %vm12921_vm7, %v12920_v46, %v12919_v32  ;;  %v12926_v23 = vrot.slane %v12925_v42, 1  ;;  %vm12927_vm4 = vmmov %vm12820_vm0  ;;  %v12933_v46 = vrot.slane %v10135_v14, 1  ;;  %v12934_v32 = vld [vmem:[#allocation114_spill] sm:$0xff]  ;;  %v12938_v51 = vrot.slane %v12913_v25, 1 }
 0x453   : > { %12922 = vst [vmem:[#allocation161_spill] sm:$0xff] %v10627_v54  ;;  %vm12931_vm12 = vmmov %vm12820_vm0  ;;  %v12935_v20 = vrot.slane %v12934_v32, 1 }
 0x454   : > { %v10637_v30 = vsel %vm12927_vm4, %v12926_v23, %v12924_v2  ;;  %v12929_v26 = vmov %v12926_v23  ;;  %vm12939_vm5 = vmmov %vm12820_vm0 }
 0x455   : > { %12928 = vst [vmem:[#allocation162_spill] sm:$0xff] %v10637_v30  ;;  %v10645_v19 = vsel %vm12931_vm12, %v12930_v21, %v12929_v26  ;;  %v10653_v54 = vsel %vm12820_vm0, %v12935_v20, %v12933_v46  ;;  %v12937_v2 = vmov %v12935_v20  ;;  %v12941_v26 = vrot.slane %v10194_v56, 1  ;;  %v12942_v21 = vld [vmem:[#allocation94_spill] sm:$0xff]  ;;  %vm12944_vm8 = vmmov %vm12820_vm0 }
 0x456   : > { %12932 = vst [vmem:[#allocation163_spill] sm:$0xff] %v10645_v19  ;;  %12936 = vst [vmem:[#allocation164_spill] sm:$0xff] %v10653_v54  ;;  %v10663_v50 = vsel %vm12939_vm5, %v12938_v51, %v12937_v2  ;;  %v12943_v42 = vrot.slane %v12942_v21, 1  ;;  %v12947_v46 = vrot.slane %v12923_v43, 1  ;;  %v12950_v19 = vrot.slane %v10187_v62, 1 }
 0x457   : > { %12940 = vst [vmem:[#allocation165_spill] sm:$0xff] %v10663_v50  ;;  %vm12948_vm9 = vmmov %vm12820_vm0  ;;  %v12951_v30 = vrot.slane %v10151_v1, 1  ;;  %v12955_v43 = vrot.slane %v10135_v14, 1  ;;  %v12958_v2 = vrot.slane %v10246_v24, 1  ;;  %v12959_v51 = vrot.slane %v10208_v11, 1 }
 0x458   : > { %v10671_v47 = vsel %vm12944_vm8, %v12943_v42, %v12941_v26  ;;  %v12946_v20 = vmov %v12943_v42  ;;  %vm12952_vm7 = vmmov %vm12820_vm0  ;;  %v12992_v21 = vrot.slane %v10317_v5, 7 }
 0x459   : > { %12945 = vst [vmem:[#allocation166_spill] sm:$0xff] %v10671_v47  ;;  %v10679_v23 = vsel %vm12948_vm9, %v12947_v46, %v12946_v20  ;;  %v10691_v42 = vsel %vm12952_vm7, %v12951_v30, %v12950_v19  ;;  %v12954_v26 = vmov %v12951_v30  ;;  %vm12956_vm4 = vmmov %vm12820_vm0  ;;  %v12962_v30 = vmov %v12959_v51 }
 0x45a   : > { %12949 = vst [vmem:[#allocation167_spill] sm:$0xff] %v10679_v23  ;;  %12953 = vst [vmem:[#allocation168_spill] sm:$0xff] %v10691_v42  ;;  %v10699_v20 = vsel %vm12956_vm4, %v12955_v43, %v12954_v26  ;;  %v12963_v19 = vrot.slane %v10194_v56, 1  ;;  %v12965_v43 = vrot.slane %v10239_v48, 1  ;;  %v12966_v26 = vrot.slane %v10203_v10, 1 }
 0x45b   : > { %12957 = vst [vmem:[#allocation169_spill] sm:$0xff] %v10699_v20  ;;  %vm12960_vm12 = vmmov %vm12820_vm0  ;;  %v12970_v20 = vrot.slane %v10187_v62, 1 }
 0x45c   : > { %v10709_v23 = vsel %vm12960_vm12, %v12959_v51, %v12958_v2  ;;  %v10717_v47 = vsel %vm12820_vm0, %v12963_v19, %v12962_v30  ;;  %vm12967_vm5 = vmmov %vm12820_vm0  ;;  %v12969_v2 = vmov %v12966_v26  ;;  %v12973_v30 = vrot.slane %v10302_v31, 1 }
 0x45d   : > { %12961 = vst [vmem:[#allocation170_spill] sm:$0xff] %v10709_v23  ;;  %12964 = vst [vmem:[#allocation171_spill] sm:$0xff] %v10717_v47  ;;  %v10725_v46 = vsel %vm12967_vm5, %v12966_v26, %v12965_v43  ;;  %v12974_v19 = vrot.slane %v10260_v57, 1  ;;  %v12978_v26 = vrot.slane %v10246_v24, 1  ;;  %v12981_v47 = vrot.slane %v10317_v5, 1  ;;  %v12985_v24 = vld [vmem:[#allocation44_spill] sm:$0xff] }
 0x45e   : > { %12968 = vst [vmem:[#allocation172_spill] sm:$0xff] %v10725_v46  ;;  %vm12971_vm8 = vmmov %vm12820_vm0  ;;  %v12982_v23 = vmov %v12973_v30  ;;  %vm12993_vm5 = vcmp.lt.s32.totalorder %v7857_v53, 1  ;;  %v7448_v53 = vld [vmem:[#allocation5 + $0xd0] sm:$0xff]  }
 0x45f   : > { %v10735_v42 = vsel %vm12971_vm8, %v12970_v20, %v12969_v2  ;;  %vm12975_vm9 = vmmov %vm12820_vm0  ;;  %v12977_v43 = vmov %v12974_v19 }
 0x460   : > { %12972 = vst [vmem:[#allocation173_spill] sm:$0xff] %v10735_v42  ;;  %v10743_v50 = vsel %vm12975_vm9, %v12974_v19, %v12973_v30  ;;  %vm12979_vm7 = vmmov %vm12820_vm0  ;;  %v3943_v19 = vpop.f32.mrb[52].mxu1 }
 0x461   : > { %12976 = vst [vmem:[#allocation174_spill] sm:$0xff] %v10743_v50  ;;  %v10751_v51 = vsel %vm12979_vm7, %v12978_v26, %v12977_v43  ;;  %vm12983_vm4 = vmmov %vm12820_vm0  ;;  %v4100_v54 = vmul.f32 %v9641_v36, %v3943_v19  ;;  %v3945_v48 = vpop.f32.mrb[53].mxu1 }
 0x462   : > { %12980 = vst [vmem:[#allocation175_spill] sm:$0xff] %v10751_v51  ;;  %v10763_v30 = vsel %vm12983_vm4, %v12982_v23, %v12981_v47  ;;  %v4101_v43 = vmul.f32 %v9643_v37, %v3945_v48  ;;  %v3947_v26 = vpop.f32.mrb[54].mxu1  ;;  %vm12989_vm12 = vmmov %vm12820_vm0 }
 0x463   : > { %12984 = vst [vmem:[#allocation176_spill] sm:$0xff] %v10763_v30  ;;  %v4176_v20 = vadd.f32 %v12985_v24, %v4100_v54  ;;  %v4102_v42 = vmul.f32 %v9641_v36, %v3947_v26  ;;  %v3949_v2 = vpop.f32.mrb[55].mxu1  ;;  %vm12994_vm8 = vmmov %vm12993_vm5 }
 0x464   : > { %v4177_v51 = vadd.f32 %v9649_v7, %v4101_v43  ;;  %v4103_v50 = vmul.f32 %v9643_v37, %v3949_v2  ;;  %v12988_v2 = vrot.slane %v10311_v59, 1  ;;  %vm12995_vm9 = vmmov %vm12993_vm5 }
 0x465   : > { %v10771_v46 = vmax.f32 %v4176_v20, 0.0  ;;  %v4178_v47 = vadd.f32 %v12985_v24, %v4102_v42  ;;  %v3953_v20 = vpop.f32.mrb[56].mxu1  ;;  %vm12998_vm7 = vmmov %vm12993_vm5 }
 0x466   : > { %v10774_v23 = vmax.f32 %v4177_v51, 0.0  ;;  %v4179_v19 = vadd.f32 %v9649_v7, %v4103_v50  ;;  %v3955_v62 = vpop.f32.mrb[57].mxu1  ;;  %vm13003_vm4 = vmmov %vm12820_vm0 }
 0x467   : > { %12986 = vst [vmem:[#allocation44_spill] sm:$0xff] %v10771_v46  ;;  %v5139_v48 = vrot.slane %v10771_v46, 1  ;;  %v10778_v31 = vmax.f32 %v4178_v47, 0.0  ;;  %v4369_v54 = vrot.slane %v10771_v46, 7  ;;  %v4104_v47 = vmul.f32 %v9641_v36, %v3953_v20  ;;  %v3957_v11 = vpop.f32.mrb[58].mxu1 }
 0x468   : > { %v4370_v26 = vrot.slane %v10774_v23, 7  ;;  %v10783_v57 = vmax.f32 %v4179_v19, 0.0  ;;  %v4105_v56 = vmul.f32 %v9643_v37, %v3955_v62  ;;  %v4106_v1 = vmul.f32 %v9641_v36, %v3957_v11  ;;  %v3959_v20 = vpop.f32.mrb[59].mxu1 }
 0x469   : > { %12987 = vst [vmem:[#allocation177_spill] sm:$0xff] %v10778_v31  ;;  %v10789_v42 = vsel %vm12989_vm12, %v12988_v2, %v5139_v48  ;;  %v4371_v50 = vrot.slane %v10778_v31, 7  ;;  %v5141_v51 = vrot.slane %v10778_v31, 1  ;;  %v4180_v14 = vadd.f32 %v12985_v24, %v4104_v47  ;;  %vm13005_vm12 = vmmov %vm12820_vm0 }
 0x46a   : > { %12990 = vst [vmem:[#allocation178_spill] sm:$0xff] %v10789_v42  ;;  %v4372_v19 = vrot.slane %v10783_v57, 7  ;;  %v10809_v10 = vsel %vm12993_vm5, %v12992_v21, %v4370_v26  ;;  %v4181_v43 = vadd.f32 %v9649_v7, %v4105_v56  ;;  %v4107_v62 = vmul.f32 %v9643_v37, %v3959_v20 }
 0x46b   : > { %v10801_v2 = vsel %vm12820_vm0, %v5139_v48, %v5141_v51  ;;  %v10819_v48 = vsel %vm12995_vm9, %v4369_v54, %v4371_v50  ;;  %v10821_v11 = vmax.f32 %v4180_v14, 0.0  ;;  %v4182_v47 = vadd.f32 %v12985_v24, %v4106_v1  ;;  %vm13009_vm9 = vmmov %vm12993_vm5 }
 0x46c   : > { %12991 = vst [vmem:[#allocation179_spill] sm:$0xff] %v10801_v2  ;;  %v10815_v28 = vsel %vm12994_vm8, %v4370_v26, %v4372_v19  ;;  %v12997_v42 = vrot.slane %v10311_v59, 7  ;;  %v10832_v20 = vmax.f32 %v4181_v43, 0.0  ;;  %v4183_v26 = vadd.f32 %v9649_v7, %v4107_v62  ;;  %v3963_v59 = vpop.f32.mrb[60].mxu1  ;;  %vm13008_vm8 = vmmov %vm12993_vm5 }
 0x46d   : > { %12996 = vst [vmem:[#allocation180_spill] sm:$0xff] %v10821_v11  ;;  %v4373_v1 = vrot.slane %v10821_v11, 7  ;;  %v5143_v21 = vrot.slane %v10821_v11, 1  ;;  %v10841_v32 = vmax.f32 %v4182_v47, 0.0  ;;  %v13001_v25 = vrot.slane %v10774_v23, 1 }
 0x46e   : > { %v10830_v56 = vsel %vm12998_vm7, %v12997_v42, %v4369_v54  ;;  %v4374_v43 = vrot.slane %v10832_v20, 7  ;;  %v10847_v62 = vmax.f32 %v4183_v26, 0.0  ;;  %v13002_v14 = vrot.slane %v10317_v5, 1  ;;  %v3965_v42 = vpop.f32.mrb[61].mxu1  ;;  %vm13010_vm7 = vmmov %vm12993_vm5 }
 0x46f   : > { %12999 = vst [vmem:[#allocation181_spill] sm:$0xff] %v10841_v32  ;;  %v10859_v47 = vsel %vm13005_vm12, %v5141_v51, %v5143_v21  ;;  %v4375_v54 = vrot.slane %v10841_v32, 7  ;;  %v5145_v46 = vrot.slane %v10841_v32, 1  ;;  %v4108_v26 = vmul.f32 %v9641_v36, %v3963_v59  ;;  %vm13013_vm12 = vmmov %vm12993_vm5 }
 0x470   : > { %13000 = vst [vmem:[#allocation182_spill] sm:$0xff] %v10847_v62  ;;  %v10855_v6 = vsel %vm13003_vm4, %v13002_v14, %v13001_v25  ;;  %13006 = vst [vmem:[#allocation184_spill] sm:$0xff] %v10859_v47  ;;  %v4376_v5 = vrot.slane %v10847_v62, 7  ;;  %v5146_v16 = vrot.slane %v10847_v62, 1  ;;  %v4109_v25 = vmul.f32 %v9643_v37, %v3965_v42  ;;  %v3967_v14 = vpop.f32.mrb[62].mxu1 }
 0x471   : > { %13004 = vst [vmem:[#allocation183_spill] sm:$0xff] %v10855_v6  ;;  %v10871_v51 = vsel %vm12820_vm0, %v5143_v21, %v5145_v46  ;;  %v4184_v29 = vadd.f32 %v12985_v24, %v4108_v26  ;;  %v4110_v52 = vmul.f32 %v9641_v36, %v3967_v14  ;;  %v3969_v59 = vpop.f32.mrb[63].mxu1  ;;  %v10877_v0 = vsel %vm12993_vm5, %v4372_v19, %v4374_v43  ;;  %vm13011_vm4 = vmmov %vm12820_vm0 }
 0x472   : > { %13007 = vst [vmem:[#allocation185_spill] sm:$0xff] %v10871_v51  ;;  %v4185_v31 = vadd.f32 %v9649_v7, %v4109_v25  ;;  %v4111_v2 = vmul.f32 %v9643_v37, %v3969_v59  ;;  %v10883_v42 = vsel %vm13008_vm8, %v4374_v43, %v4376_v5  ;;  %v10887_v21 = vsel %vm13009_vm9, %v4373_v1, %v4375_v54  ;;  %vm13014_vm0 = vmmov %vm12993_vm5 }
 0x473   : > { %v10889_v26 = vmax.f32 %v4184_v29, 0.0  ;;  %v4186_v36 = vadd.f32 %v12985_v24, %v4110_v52  ;;  %v10896_v25 = vsel %vm13010_vm7, %v4371_v50, %v4373_v1  ;;  %vm13017_vm5 = vmmov %vm13014_vm0  ;;  %v13030_v32 = vrot.slane %v10832_v20, 1 }
 0x474   : > { %v10898_v37 = vmax.f32 %v4185_v31, 0.0  ;;  %v4187_v43 = vadd.f32 %v9649_v7, %v4111_v2  ;;  %vm13018_vm8 = vmmov %vm13011_vm4 }
 0x475   : > { %v4377_v59 = vrot.slane %v10889_v26, 7  ;;  %v5147_v52 = vrot.slane %v10889_v26, 1  ;;  %v10907_v24 = vmax.f32 %v4186_v36, 0.0  ;;  %vm13021_vm9 = vmmov %vm13011_vm4 }
 0x476   : > { %v4378_v31 = vrot.slane %v10898_v37, 7  ;;  %v5148_v1 = vrot.slane %v10898_v37, 1  ;;  %v10913_v7 = vmax.f32 %v4187_v43, 0.0  ;;  %vm13023_vm7 = vmmov %vm13014_vm0 }
 0x477   : > { %v10919_v29 = vsel %vm13011_vm4, %v5145_v46, %v5147_v52  ;;  %v4379_v14 = vrot.slane %v10907_v24, 7  ;;  %v5149_v36 = vrot.slane %v10907_v24, 1  ;;  %v10925_v50 = vsel %vm13013_vm12, %v4375_v54, %v4377_v59  ;;  %v13015_v46 = vld [vmem:[#allocation65_spill] sm:$0xff]  ;;  %vm13027_vm4 = vmmov %vm13014_vm0 }
 0x478   : > { %13012 = vst [vmem:[#allocation186_spill] sm:$0xff] %v10919_v29  ;;  %v4380_v43 = vrot.slane %v10913_v7, 7  ;;  %v5150_v47 = vrot.slane %v10913_v7, 1  ;;  %v10933_v2 = vsel %vm13014_vm0, %v4376_v5, %v4378_v31  ;;  %v13016_v30 = vrot.slane %v13015_v46, 7  ;;  %v13024_v5 = vld [vmem:[#allocation67_spill] sm:$0xff]  ;;  %vm13028_vm12 = vmmov %vm13014_vm0 }
 0x479   : > { %v10941_v54 = vsel %vm13018_vm8, %v5147_v52, %v5149_v36  ;;  %v13020_v11 = vrot.slane %v13015_v46, 1  ;;  %v10951_v51 = vsel %vm13023_vm7, %v4377_v59, %v4379_v14  ;;  %vm13032_vm0 = vmmov %vm13018_vm8 }
 0x47a   : > { %v4443_v6 = vsel %vm13017_vm5, %v4379_v14, %v13016_v30  ;;  %13019 = vst [vmem:[#allocation65_spill] sm:$0xff] %v10941_v54  ;;  %v13025_v30 = vld [vmem:[#allocation66_spill] sm:$0xff]  ;;  %v10962_v22 = vsel %vm13028_vm12, %v4378_v31, %v4380_v43  ;;  %v13031_v31 = vrot.slane %v10783_v57, 1  ;;  %vm13035_vm5 = vmmov %vm13032_vm0  ;;  %v13046_v14 = vld [vmem:[#allocation69_spill] sm:$0xff] }
 0x47b   : > { %v10947_v19 = vsel %vm13021_vm9, %v5149_v36, %v13020_v11  ;;  %v6261_v29 = vpack.c.bf16 %v13024_v5, %v4443_v6  ;;  %v13026_v62 = vrot.slane %v13025_v30, 7  ;;  %v13029_v11 = vld [vmem:[#allocation68_spill] sm:$0xff]  ;;  %v7446_v5 = vld [vmem:[#allocation5 + $0xc8] sm:$0xff]   ;;  %vm13037_vm8 = vmmov %vm13032_vm0 }
 0x47c   : > { %13022 = vst [vmem:[#allocation187_spill] sm:$0xff] %v10947_v19  ;;  %v10991_v59 = vsel %vm13037_vm8, %v5146_v16, %v5148_v1  ;;  %vm13039_vm9 = vmmov %vm13032_vm0 }
 0x47d   : > { %v4444_v52 = vsel %vm13027_vm4, %v4380_v43, %v13026_v62  ;;  %v10979_v43 = vsel %vm13032_vm0, %v13031_v31, %v13030_v32  ;;  %vm13040_vm7 = vmmov %vm13032_vm0  ;;  %v13049_v62 = vld [vmem:[#allocation70_spill] sm:$0xff] }
 0x47e   : > { %v6258_v36 = vpack.c.bf16 %v13029_v11, %v4444_v52  ;;  %v13033_v52 = vmov %v13031_v31  ;;  %v13034_v11 = vrot.slane %v10774_v23, 1  ;;  %v11001_v31 = vsel %vm13039_vm9, %v13030_v32, %v5146_v16  ;;  %vm13043_vm4 = vmmov %vm13032_vm0  ;;  %v13045_v32 = vld [vmem:[#allocation71_spill] sm:$0xff] }
 0x47f   : > { %v13047_v19 = vpack.c.bf16 %v13045_v32, %v13046_v14  ;;  %v13052_v16 = vld [vmem:[#allocation75_spill] sm:$0xff] }
 0x480   : > { %v10987_v6 = vsel %vm13035_vm5, %v13034_v11, %v13033_v52  ;;  %6259 = vmatprep.mubr.msk.bf16.mxu0 %vm9157_vm15, %v6258_v36  ;;  %v11005_v52 = vsel %vm13040_vm7, %v5148_v1, %v5150_v47  ;;  %v13042_v11 = vrot.slane %v13025_v30, 1  ;;  %v13060_v1 = vld [vmem:[#allocation76_spill] sm:$0xff]  ;;  %v13066_v32 = vld [vmem:[#allocation31_spill] sm:$0xff] }
 0x481   : > { %13036 = vst [vmem:[#allocation67_spill] sm:$0xff] %v10987_v6  ;;  %13041 = vst [vmem:[#allocation66_spill] sm:$0xff] %v11005_v52  ;;  %6262 = vmatmul.mubr.msk.bf16.vlgmr.msra.gmra.mrb[84].mxu0 %vm9157_vm15, %v6261_v29  ;;  %v7447_v6 = vld [vmem:[#allocation5 + $0x88] sm:$0xff]   ;;  %v7450_v29 = vld [vmem:[#allocation5 + $0xd8] sm:$0xff]  }
 0x482   : > { %v11011_v54 = vsel %vm13043_vm4, %v5150_v47, %v13042_v11  ;;  %6265 = vmatprep.mubr.msk.bf16.mxu0 %vm9182_vm1, %v13047_v19  ;;  %6620 = vmatpush3.bf16.msra.mxu0 %v7445_v3  ;;  %v7449_v47 = vld [vmem:[#allocation5 + $0x90] sm:$0xff]   ;;  %v13050_v11 = vld [vmem:[#allocation72_spill] sm:$0xff]  ;;  %v13053_v52 = vld [vmem:[#allocation73_spill] sm:$0xff] }
 0x483   : > { %13044 = vst [vmem:[#allocation68_spill] sm:$0xff] %v11011_v54  ;;  %6621 = vmatprep.subr.bf16.mxu0 %v7446_v5  ;;  %v13051_v36 = vpack.c.bf16 %v13049_v62, %v13050_v11  ;;  %v13054_v14 = vpack.c.bf16 %v13052_v16, %v13053_v52  ;;  %v7451_v3 = vld [vmem:[#allocation5 + $0x98] sm:$0xff]   ;;  %v7452_v19 = vld [vmem:[#allocation5 + $0xe0] sm:$0xff]   ;;  %v7454_v5 = vld [vmem:[#allocation5 + $0xe8] sm:$0xff]  }
 0x484   : > { %v13057_v54 = vld [vmem:[#allocation37_spill] sm:$0xff]  ;;  %v7457_v11 = vld [vmem:[#allocation5 + $0xb0] sm:$0xff]  }
 0x486   : > { %6622 = vmatpush3.bf16.msra.mxu0 %v7447_v6  ;;  %v7453_v6 = vld [vmem:[#allocation5 + $0xa0] sm:$0xff]  }
 0x487   : > { %6623 = vmatprep.subr.bf16.mxu0 %v7448_v53  ;;  %v13056_v53 = vld [vmem:[#allocation74_spill] sm:$0xff] }
 0x488   : > { %v13058_v62 = vpack.c.bf16 %v13056_v53, %v13057_v54  ;;  %v13067_v53 = vld [vmem:[#allocation30_spill] sm:$0xff] }
 0x489   : > { %6268 = vmatmul.mubr.msk.bf16.gmra.mrb[88].mxu0 %vm9182_vm1, %v13051_v36  ;;  %v13059_v36 = vld [vmem:[#allocation78_spill] sm:$0xff] }
 0x48a   : > { %6271 = vmatprep.mubr.msk.bf16.mxu0 %vm9198_vm6, %v13054_v14  ;;  %6624 = vmatpush3.bf16.msra.mxu0 %v7449_v47  ;;  %v13061_v52 = vpack.c.bf16 %v13059_v36, %v13060_v1  ;;  %v7455_v47 = vld [vmem:[#allocation5 + $0xa8] sm:$0xff]   ;;  %v7458_v14 = vld [vmem:[#allocation5 + $0xf8] sm:$0xff]  }
 0x48b   : > { %6625 = vmatprep.subr.bf16.mxu0 %v7450_v29  ;;  %v7456_v29 = vld [vmem:[#allocation5 + $0xf0] sm:$0xff]   ;;  %v13071_v1 = vld [vmem:[#allocation35_spill] sm:$0xff] }
 0x48c   : > { %v13084_v36 = vld [vmem:[#allocation83_spill] sm:$0xff] }
 0x48e   : > { %6626 = vmatpush3.bf16.msra.mxu0 %v7451_v3  ;;  %v13063_v3 = vld [vmem:[#allocation77_spill] sm:$0xff] }
 0x48f   : > { %6627 = vmatprep.subr.bf16.mxu0 %v7452_v19  ;;  %v13064_v19 = vld [vmem:[#allocation29_spill] sm:$0xff] }
 0x490   : > { %v13065_v54 = vpack.c.bf16 %v13063_v3, %v13064_v19  ;;  %v13077_v19 = vld [vmem:[#allocation43_spill] sm:$0xff] }
 0x491   : > { %6274 = vmatmul.mubr.msk.bf16.gmra.mrb[92].mxu0 %vm9198_vm6, %v13058_v62  ;;  %v13068_v62 = vpack.c.bf16 %v13066_v32, %v13067_v53  ;;  %v13092_v3 = vld [vmem:[#allocation111_spill] sm:$0xff] }
 0x492   : > { %6277 = vmatprep.mubr.msk.bf16.mxu0 %vm9214_vm10, %v13061_v52  ;;  %6628 = vmatpush3.bf16.msra.mxu0 %v7453_v6  ;;  %v7459_v6 = vld [vmem:[#allocation5 + $0xb8] sm:$0xff]  }
 0x493   : > { %6629 = vmatprep.subr.bf16.mxu0 %v7454_v5  ;;  %v13070_v5 = vld [vmem:[#allocation32_spill] sm:$0xff] }
 0x494   : > { %v13072_v52 = vpack.c.bf16 %v13070_v5, %v13071_v1  ;;  %v13087_v1 = vld [vmem:[#allocation110_spill] sm:$0xff] }
 0x496   : > { %6630 = vmatpush3.bf16.msra.mxu0 %v7455_v47  ;;  %v13073_v47 = vld [vmem:[#allocation18_spill] sm:$0xff] }
 0x497   : > { %6631 = vmatprep.subr.bf16.mxu0 %v7456_v29  ;;  %v13074_v29 = vld [vmem:[#allocation40_spill] sm:$0xff] }
 0x498   : > { %v13075_v16 = vpack.c.bf16 %v13073_v47, %v13074_v29  ;;  %v13106_v29 = vld [vmem:[#allocation96_spill] sm:$0xff] }
 0x499   : > { %6280 = vmatmul.mubr.msk.bf16.gmra.mrb[96].mxu0 %vm9214_vm10, %v13065_v54  ;;  %v13078_v54 = vld [vmem:[#allocation20_spill] sm:$0xff] }
 0x49a   : > { %6283 = vmatprep.mubr.msk.bf16.mxu0 %vm9230_vm2, %v13068_v62  ;;  %6632 = vmatpush3.bf16.msra.mxu0 %v7457_v11  ;;  %v13079_v32 = vpack.c.bf16 %v13077_v19, %v13078_v54  ;;  %v13080_v11 = vld [vmem:[#allocation84_spill] sm:$0xff]  ;;  %v13094_v54 = vld [vmem:[#allocation93_spill] sm:$0xff] }
 0x49b   : > { %6633 = vmatprep.subr.bf16.mxu0 %v7458_v14  ;;  %v13081_v14 = vld [vmem:[#allocation82_spill] sm:$0xff]  ;;  %v13099_v62 = vld [vmem:[#allocation116_spill] sm:$0xff] }
 0x49c   : > { %v13082_v53 = vpack.c.bf16 %v13080_v11, %v13081_v14  ;;  %v13114_v14 = vld [vmem:[#allocation100_spill] sm:$0xff] }
 0x49e   : > { %6634 = vmatpush3.bf16.msra.mxu0 %v7459_v6  ;;  %v13085_v6 = vld [vmem:[#allocation85_spill] sm:$0xff] }
 0x49f   : > { %v13086_v5 = vpack.c.bf16 %v13084_v36, %v13085_v6  ;;  %v13101_v6 = vld [vmem:[#allocation97_spill] sm:$0xff] }
 0x4a1   : > { %6286 = vmatmul.mubr.msk.bf16.gmra.mrb[100].mxu0 %vm9230_vm2, %v13072_v52  ;;  %v13088_v52 = vld [vmem:[#allocation89_spill] sm:$0xff] }
 0x4a2   : > { %6289 = vmatprep.mubr.msk.bf16.mxu0 %vm9246_vm13, %v13075_v16  ;;  %v13089_v47 = vpack.c.bf16 %v13087_v1, %v13088_v52  ;;  %v13091_v16 = vld [vmem:[#allocation90_spill] sm:$0xff]  ;;  %v13104_v52 = vld [vmem:[#allocation51_spill] sm:$0xff] }
 0x4a3   : > { %v13093_v19 = vpack.c.bf16 %v13091_v16, %v13092_v3  ;;  %vm13105_vm15 = vnez %v13104_v52  ;;  %v13107_v16 = vld [vmem:[#allocation120_spill] sm:$0xff]  ;;  %v13122_v52 = vpack.c.bf16 %v10359_v61, %v10337_v13  ;;  %v13130_v13 = vpack.c.bf16 %v10883_v42, %v10877_v0  ;;  %v13139_v42 = vld [vmem:[#allocation46_spill] sm:$0xff] }
 0x4a4   : > { %v13108_v3 = vpack.c.bf16 %v13106_v29, %v13107_v16  ;;  %v13125_v29 = vpack.c.bf16 %v10349_v15, %v10329_v63  ;;  %v13131_v61 = vld [vmem:[#allocation56_spill] sm:$0xff]  ;;  %v13133_v63 = vpack.c.bf16 %v10887_v21, %v10896_v25  ;;  %v13137_v15 = vpack.c.bf16 %v10951_v51, %v10925_v50  ;;  %v7463_v25 = vld [vmem:[#allocation5 + $0x108] sm:$0xff]   ;;  %v7464_v51 = vld [vmem:[#allocation5 + $0x150] sm:$0xff]  }
 0x4a5   : > { %v13138_v0 = vpack.c.bf16 %v9671_v27, %v13025_v30  ;;  %v13140_v21 = vpack.c.bf16 %v13139_v42, %v13015_v46  ;;  %v7465_v50 = vld [vmem:[#allocation5 + $0x110] sm:$0xff]   ;;  %v13142_v27 = vpack.c.bf16 %v9730_v35, %v9704_v9  ;;  %v13143_v46 = vpack.c.bf16 %v9795_v55, %v9775_v34  ;;  %v7467_v30 = vld [vmem:[#allocation5 + $0x118] sm:$0xff]   ;;  %v7470_v16 = vld [vmem:[#allocation5 + $0x168] sm:$0xff]  }
 0x4a6   : > { %v13145_v35 = vpack.c.bf16 %v9842_v40, %v9826_v44  ;;  %v7471_v9 = vld [vmem:[#allocation5 + $0x128] sm:$0xff]   ;;  %v7472_v55 = vld [vmem:[#allocation5 + $0x170] sm:$0xff]   ;;  %v13148_v44 = vpack.c.bf16 %v9891_v4, %v9871_v58  ;;  %v13164_v58 = vld [vmem:[#allocation88_spill] sm:$0xff] }
 0x4a7   : > { %v7473_v34 = vld [vmem:[#allocation5 + $0x130] sm:$0xff]  }
 0x4a8   : > { %v13149_v40 = vld [vmem:[#allocation42_spill] sm:$0xff] }
 0x4a9   : > { %6292 = vmatmul.mubr.msk.bf16.gmra.mrb[104].mxu0 %vm9246_vm13, %v13079_v32  ;;  %v13095_v32 = vld [vmem:[#allocation91_spill] sm:$0xff]  ;;  %vm13132_vm13 = vnez %v13131_v61  ;;  %v13180_v42 = vld [vmem:[#allocation122_spill] sm:$0xff] }
 0x4aa   : > { %6295 = vmatprep.mubr.msk.bf16.mxu0 %vm9262_vm14, %v13082_v53  ;;  %v13096_v11 = vpack.c.bf16 %v13094_v54, %v13095_v32  ;;  %v13098_v53 = vld [vmem:[#allocation92_spill] sm:$0xff]  ;;  %v13110_v54 = vld [vmem:[#allocation99_spill] sm:$0xff] }
 0x4ab   : > { %v13100_v36 = vpack.c.bf16 %v13098_v53, %v13099_v62  ;;  %v13115_v53 = vld [vmem:[#allocation124_spill] sm:$0xff] }
 0x4ac   : > { %v13116_v62 = vpack.c.bf16 %v13114_v14, %v13115_v53  ;;  %v13152_v14 = vld [vmem:[#allocation36_spill] sm:$0xff]  ;;  %v13153_v53 = vld [vmem:[#allocation34_spill] sm:$0xff] }
 0x4b1   : > { %6298 = vmatmul.mubr.msk.bf16.gmra.mrb[108].mxu0 %vm9262_vm14, %v13086_v5  ;;  %v13102_v5 = vld [vmem:[#allocation95_spill] sm:$0xff] }
 0x4b2   : > { %6301 = vmatprep.mubr.msk.bf16.mxu0 %vm9279_vm3, %v13089_v47  ;;  %v13103_v1 = vpack.c.bf16 %v13101_v6, %v13102_v5  ;;  %v7460_v47 = vld [vmem:[#allocation5 + $0x140] sm:$0xff]   ;;  %v13118_v6 = vld [vmem:[#allocation53_spill] sm:$0xff]  ;;  %v13120_v5 = vld [vmem:[#allocation106_spill] sm:$0xff] }
 0x4b3   : > { %6731 = vmatprep.subr.bf16.mxu0 %v7460_v47  ;;  %vm13119_vm6 = vnez %v13118_v6  ;;  %v13123_v47 = vld [vmem:[#allocation54_spill] sm:$0xff] }
 0x4b4   : > { %vm13124_vm10 = vnez %v13123_v47 }
 0x4b9   : > { %6304 = vmatmul.mubr.msk.bf16.gmra.mrb[112].mxu0 %vm9279_vm3, %v13093_v19  ;;  %v13109_v19 = vld [vmem:[#allocation101_spill] sm:$0xff] }
 0x4ba   : > { %6307 = vmatprep.mubr.msk.bf16.mxu0 %vm9289_vm11, %v13096_v11  ;;  %v13111_v32 = vpack.c.bf16 %v13109_v19, %v13110_v54  ;;  %v13112_v11 = vld [vmem:[#allocation52_spill] sm:$0xff]  ;;  %v7474_v19 = vld [vmem:[#allocation5 + $0x178] sm:$0xff]   ;;  %v13146_v54 = vpack.c.bf16 %v9837_v39, %v9819_v38  ;;  %v13154_v38 = vpack.c.bf16 %v13152_v14, %v13153_v53  ;;  %v13155_v39 = vld [vmem:[#allocation81_spill] sm:$0xff] }
 0x4bb   : > { %vm13113_vm1 = vnez %v13112_v11  ;;  %v13194_v14 = vld [vmem:[#allocation129_spill] sm:$0xff] }
 0x4bc   : > { %v13195_v53 = vld [vmem:[#allocation105_spill] sm:$0xff] }
 0x4c1   : > { %6310 = vmatmul.mubr.msk.bf16.gmra.mrb[116].mxu0 %vm9289_vm11, %v13100_v36  ;;  %v13117_v36 = vpack.c.bf16 %v10287_v41, %v10281_v60  ;;  %v13126_v60 = vpack.c.bf16 %v10815_v28, %v10809_v10  ;;  %v13127_v41 = vld [vmem:[#allocation55_spill] sm:$0xff]  ;;  %v13134_v10 = vpack.c.bf16 %v10962_v22, %v10933_v2  ;;  %v13135_v28 = vld [vmem:[#allocation57_spill] sm:$0xff]  ;;  %v13141_v22 = vpack.c.bf16 %v9739_v8, %v9713_v12  ;;  %v7468_v12 = vld [vmem:[#allocation5 + $0x160] sm:$0xff]  }
 0x4c2   : > { %6313 = vmatprep.mubr.msk.bf16.mxu0 %vm13105_vm15, %v13103_v1  ;;  %v13121_v1 = vpack.c.bf16 %v10291_v33, %v13120_v5  ;;  %vm13128_vm2 = vnez %v13127_v41  ;;  %v13129_v33 = vpack.c.bf16 %v10819_v48, %v10830_v56  ;;  %vm13136_vm14 = vnez %v13135_v28  ;;  %v7461_v48 = vld [vmem:[#allocation5 + $0x100] sm:$0xff]   ;;  %v7462_v56 = vld [vmem:[#allocation5 + $0x148] sm:$0xff]   ;;  %v7466_v2 = vld [vmem:[#allocation5 + $0x158] sm:$0xff]  }
 0x4c3   : > { %v7469_v8 = vld [vmem:[#allocation5 + $0x120] sm:$0xff]   ;;  %v13161_v5 = vld [vmem:[#allocation109_spill] sm:$0xff] }
 0x4c9   : > { %6316 = vmatmul.mubr.msk.bf16.gmra.mrb[120].mxu0 %vm13105_vm15, %v13108_v3  ;;  %v13144_v3 = vpack.c.bf16 %v9784_v45, %v9762_v17  ;;  %v13147_v45 = vpack.c.bf16 %v9896_v18, %v9882_v49  ;;  %v7475_v17 = vld [vmem:[#allocation5 + $0x138] sm:$0xff]   ;;  %v13158_v49 = vld [vmem:[#allocation80_spill] sm:$0xff] }
 0x4ca   : > { %6319 = vmatprep.mubr.msk.bf16.mxu0 %vm13113_vm1, %v13111_v32  ;;  %v13150_v32 = vld [vmem:[#allocation39_spill] sm:$0xff] }
 0x4cb   : > { %v13151_v11 = vpack.c.bf16 %v13149_v40, %v13150_v32 }
 0x4d1   : > { %6322 = vmatmul.mubr.msk.bf16.gmra.mrb[124].mxu0 %vm13113_vm1, %v13116_v62  ;;  %v13156_v62 = vld [vmem:[#allocation79_spill] sm:$0xff] }
 0x4d2   : > { %6325 = vmatprep.mubr.msk.bf16.mxu0 %vm13119_vm6, %v13117_v36  ;;  %v13157_v18 = vpack.c.bf16 %v13155_v39, %v13156_v62  ;;  %v13159_v36 = vld [vmem:[#allocation21_spill] sm:$0xff]  ;;  %v13197_v39 = vpack.c.bf16 %v10783_v57, %v10774_v23 }
 0x4d3   : > { %v13160_v6 = vpack.c.bf16 %v13158_v49, %v13159_v36 }
 0x4d9   : > { %6328 = vmatmul.mubr.msk.bf16.gmra.mrb[128].mxu0 %vm13119_vm6, %v13121_v1  ;;  %v13162_v1 = vld [vmem:[#allocation87_spill] sm:$0xff] }
 0x4da   : > { %6331 = vmatprep.mubr.msk.bf16.mxu0 %vm13124_vm10, %v13122_v52  ;;  %v13163_v4 = vpack.c.bf16 %v13161_v5, %v13162_v1  ;;  %v13165_v52 = vld [vmem:[#allocation86_spill] sm:$0xff]  ;;  %v13198_v1 = vld [vmem:[#allocation177_spill] sm:$0xff] }
 0x4db   : > { %v13166_v47 = vpack.c.bf16 %v13164_v58, %v13165_v52  ;;  %v13201_v52 = vld [vmem:[#allocation182_spill] sm:$0xff] }
 0x4e1   : > { %6334 = vmatmul.mubr.msk.bf16.gmra.mrb[132].mxu0 %vm13124_vm10, %v13125_v29  ;;  %v13167_v29 = vld [vmem:[#allocation115_spill] sm:$0xff] }
 0x4e2   : > { %6337 = vmatprep.mubr.msk.bf16.mxu0 %vm13128_vm2, %v13126_v60  ;;  %v13168_v60 = vld [vmem:[#allocation113_spill] sm:$0xff] }
 0x4e3   : > { %v13169_v41 = vpack.c.bf16 %v13167_v29, %v13168_v60 }
 0x4e9   : > { %6340 = vmatmul.mubr.msk.bf16.gmra.mrb[136].mxu0 %vm13128_vm2, %v13129_v33  ;;  %v13170_v33 = vld [vmem:[#allocation114_spill] sm:$0xff] }
 0x4ea   : > { %6343 = vmatprep.mubr.msk.bf16.mxu0 %vm13132_vm13, %v13130_v13  ;;  %v13171_v13 = vld [vmem:[#allocation112_spill] sm:$0xff] }
 0x4eb   : > { %v13172_v61 = vpack.c.bf16 %v13170_v33, %v13171_v13  ;;  %v13203_v13 = vld [vmem:[#allocation181_spill] sm:$0xff] }
 0x4f1   : > { %6346 = vmatmul.mubr.msk.bf16.gmra.mrb[140].mxu0 %vm13132_vm13, %v13133_v63  ;;  %v13173_v63 = vld [vmem:[#allocation94_spill] sm:$0xff] }
 0x4f2   : > { %6349 = vmatprep.mubr.msk.bf16.mxu0 %vm13136_vm14, %v13134_v10  ;;  %v13174_v10 = vld [vmem:[#allocation118_spill] sm:$0xff] }
 0x4f3   : > { %v13175_v28 = vpack.c.bf16 %v13173_v63, %v13174_v10  ;;  %v13206_v10 = vpack.c.bf16 %v10913_v7, %v10898_v37 }
 0x4f9   : > { %6352 = vmatmul.mubr.msk.bf16.gmra.mrb[144].mxu0 %vm13136_vm14, %v13137_v15  ;;  %v13176_v15 = vld [vmem:[#allocation119_spill] sm:$0xff] }
 0x4fa   : > { %4958 = vmatprep.mubr.bf16.mxu0 %v13138_v0  ;;  %v13177_v0 = vld [vmem:[#allocation117_spill] sm:$0xff] }
 0x501   : > { %4959 = vmatmul.mubr.bf16.vlgmr.msra.gmra.mrb[148].mxu0 %v13140_v21 }
 0x502   : > { %4966 = vmatprep.mubr.bf16.mxu0 %v13141_v22  ;;  %6732 = vmatpush3.bf16.msra.mxu0 %v7461_v48  ;;  %v13178_v48 = vpack.c.bf16 %v13176_v15, %v13177_v0  ;;  %v13182_v22 = vld [vmem:[#allocation123_spill] sm:$0xff] }
 0x503   : > { %6733 = vmatprep.subr.bf16.mxu0 %v7462_v56  ;;  %v13179_v56 = vld [vmem:[#allocation98_spill] sm:$0xff] }
 0x504   : > { %v13181_v21 = vpack.c.bf16 %v13179_v56, %v13180_v42  ;;  %v13207_v42 = vpack.c.bf16 %v10907_v24, %v10889_v26  ;;  %v13216_v26 = vld [vmem:[#allocation134_spill] sm:$0xff]  ;;  %v13217_v24 = vld [vmem:[#allocation135_spill] sm:$0xff] }
 0x506   : > { %6734 = vmatpush3.bf16.msra.mxu0 %v7463_v25  ;;  %v13183_v25 = vld [vmem:[#allocation121_spill] sm:$0xff] }
 0x507   : > { %6735 = vmatprep.subr.bf16.mxu0 %v7464_v51  ;;  %v13184_v51 = vpack.c.bf16 %v13182_v22, %v13183_v25  ;;  %v13209_v22 = vld [vmem:[#allocation59_spill] sm:$0xff] }
 0x509   : > { %4967 = vmatmul.mubr.bf16.gmra.mrb[152].mxu0 %v13142_v27 }
 0x50a   : > { %4974 = vmatprep.mubr.bf16.mxu0 %v13143_v46  ;;  %6736 = vmatpush3.bf16.msra.mxu0 %v7465_v50  ;;  %v13185_v50 = vld [vmem:[#allocation102_spill] sm:$0xff] }
 0x50b   : > { %6737 = vmatprep.subr.bf16.mxu0 %v7466_v2  ;;  %v13186_v2 = vld [vmem:[#allocation126_spill] sm:$0xff] }
 0x50c   : > { %v13187_v27 = vpack.c.bf16 %v13185_v50, %v13186_v2 }
 0x50e   : > { %6738 = vmatpush3.bf16.msra.mxu0 %v7467_v30 }
 0x50f   : > { %6739 = vmatprep.subr.bf16.mxu0 %v7468_v12 }
 0x511   : > { %4975 = vmatmul.mubr.bf16.gmra.mrb[156].mxu0 %v13144_v3 }
 0x512   : > { %4982 = vmatprep.mubr.bf16.mxu0 %v13145_v35  ;;  %6740 = vmatpush3.bf16.msra.mxu0 %v7469_v8  ;;  %v13188_v35 = vld [vmem:[#allocation127_spill] sm:$0xff] }
 0x513   : > { %6741 = vmatprep.subr.bf16.mxu0 %v7470_v16 }
 0x516   : > { %6742 = vmatpush3.bf16.msra.mxu0 %v7471_v9  ;;  %v13189_v9 = vld [vmem:[#allocation125_spill] sm:$0xff] }
 0x517   : > { %6743 = vmatprep.subr.bf16.mxu0 %v7472_v55  ;;  %v13190_v55 = vpack.c.bf16 %v13188_v35, %v13189_v9  ;;  %v13218_v35 = vpack.c.bf16 %v13216_v26, %v13217_v24  ;;  %v13219_v9 = vld [vmem:[#allocation62_spill] sm:$0xff]  ;;  %v13245_v26 = vld [vmem:[#allocation148_spill] sm:$0xff]  ;;  %v13246_v24 = vld [vmem:[#allocation149_spill] sm:$0xff] }
 0x518   : > { %vm13220_vm11 = vnez %v13219_v9  ;;  %v13248_v9 = vld [vmem:[#allocation150_spill] sm:$0xff] }
 0x519   : > { %4983 = vmatmul.mubr.bf16.gmra.mrb[160].mxu0 %v13146_v54 }
 0x51a   : > { %4990 = vmatprep.mubr.bf16.mxu0 %v13147_v45  ;;  %6744 = vmatpush3.bf16.msra.mxu0 %v7473_v34  ;;  %v13191_v34 = vld [vmem:[#allocation130_spill] sm:$0xff] }
 0x51b   : > { %6745 = vmatprep.subr.bf16.mxu0 %v7474_v19  ;;  %v13192_v19 = vld [vmem:[#allocation128_spill] sm:$0xff] }
 0x51c   : > { %v13193_v54 = vpack.c.bf16 %v13191_v34, %v13192_v19 }
 0x51e   : > { %6746 = vmatpush3.bf16.msra.mxu0 %v7475_v17 }
 0x521   : > { %4991 = vmatmul.mubr.bf16.gmra.mrb[164].mxu0 %v13148_v44 }
 0x522   : > { %4998 = vmatprep.mubr.bf16.mxu0 %v13151_v11 }
 0x529   : > { %4999 = vmatmul.mubr.bf16.gmra.mrb[168].mxu0 %v13154_v38  ;;  %v13196_v38 = vpack.c.bf16 %v13194_v14, %v13195_v53  ;;  %v13224_v53 = vld [vmem:[#allocation138_spill] sm:$0xff] }
 0x52a   : > { %5006 = vmatprep.mubr.bf16.mxu0 %v13157_v18 }
 0x531   : > { %5007 = vmatmul.mubr.bf16.gmra.mrb[172].mxu0 %v13160_v6 }
 0x532   : > { %5014 = vmatprep.mubr.bf16.mxu0 %v13163_v4  ;;  %v13199_v4 = vld [vmem:[#allocation44_spill] sm:$0xff] }
 0x533   : > { %v13200_v58 = vpack.c.bf16 %v13198_v1, %v13199_v4 }
 0x539   : > { %5015 = vmatmul.mubr.bf16.gmra.mrb[176].mxu0 %v13166_v47  ;;  %v13202_v47 = vpack.c.bf16 %v13201_v52, %v10832_v20  ;;  %v13229_v52 = vld [vmem:[#allocation140_spill] sm:$0xff] }
 0x53a   : > { %5022 = vmatprep.mubr.bf16.mxu0 %v13169_v41 }
 0x541   : > { %5023 = vmatmul.mubr.bf16.gmra.mrb[180].mxu0 %v13172_v61  ;;  %v13204_v61 = vld [vmem:[#allocation180_spill] sm:$0xff] }
 0x542   : > { %5030 = vmatprep.mubr.bf16.mxu0 %v13175_v28  ;;  %v13205_v63 = vpack.c.bf16 %v13203_v13, %v13204_v61  ;;  %v13235_v13 = vld [vmem:[#allocation64_spill] sm:$0xff] }
 0x543   : > { %vm13236_vm0 = vnez %v13235_v13 }
 0x549   : > { %5031 = vmatmul.mubr.bf16.gmra.mrb[184].mxu0 %v13178_v48 }
 0x54a   : > { %5038 = vmatprep.mubr.bf16.mxu0 %v13181_v21  ;;  %v13208_v21 = vld [vmem:[#allocation133_spill] sm:$0xff] }
 0x54b   : > { %v13210_v25 = vpack.c.bf16 %v13208_v21, %v13209_v22  ;;  %v13240_v22 = vld [vmem:[#allocation146_spill] sm:$0xff] }
 0x551   : > { %5039 = vmatmul.mubr.bf16.gmra.mrb[188].mxu0 %v13184_v51  ;;  %v13211_v51 = vld [vmem:[#allocation58_spill] sm:$0xff] }
 0x552   : > { %5046 = vmatprep.mubr.bf16.mxu0 %v13187_v27  ;;  %vm13212_vm3 = vnez %v13211_v51 }
 0x554   : > { %v6523_v46 = vpop.f32.mrb[84].mxu0 }
 0x555   : > { %v6524_v30 = vpop.f32.mrb[85].mxu0 }
 0x556   : > { %v11238_v12 = vadd.f32 %v6524_v30, %v6523_v46  ;;  %v6526_v8 = vpop.f32.mrb[86].mxu0  ;;  %v13213_v30 = vld [vmem:[#allocation38_spill] sm:$0xff] }
 0x557   : > { %v6527_v16 = vpop.f32.mrb[87].mxu0 }
 0x558   : > { %v11240_v3 = vadd.f32 %v6527_v16, %v6526_v8  ;;  %v13214_v8 = vld [vmem:[#allocation50_spill] sm:$0xff] }
 0x559   : > { %5047 = vmatmul.mubr.bf16.gmra.mrb[192].mxu0 %v13190_v55  ;;  %v13215_v16 = vpack.c.bf16 %v13213_v30, %v13214_v8 }
 0x55a   : > { %5054 = vmatprep.mubr.bf16.mxu0 %v13193_v54 }
 0x55c   : > { %v6529_v45 = vpop.f32.mrb[88].mxu0 }
 0x55d   : > { %v6530_v17 = vpop.f32.mrb[89].mxu0 }
 0x55e   : > { %v11248_v44 = vadd.f32 %v6530_v17, %v6529_v45  ;;  %v6532_v40 = vpop.f32.mrb[90].mxu0 }
 0x55f   : > { %v6533_v32 = vpop.f32.mrb[91].mxu0 }
 0x560   : > { %v11250_v11 = vadd.f32 %v6533_v32, %v6532_v40  ;;  %v13221_v40 = vld [vmem:[#allocation136_spill] sm:$0xff]  ;;  %v13222_v32 = vld [vmem:[#allocation137_spill] sm:$0xff] }
 0x561   : > { %5055 = vmatmul.mubr.bf16.gmra.mrb[196].mxu0 %v13196_v38  ;;  %v13223_v14 = vpack.c.bf16 %v13221_v40, %v13222_v32  ;;  %v13225_v38 = vld [vmem:[#allocation139_spill] sm:$0xff] }
 0x562   : > { %5062 = vmatprep.mubr.bf16.mxu0 %v13197_v39  ;;  %v13226_v39 = vpack.c.bf16 %v13224_v53, %v13225_v38 }
 0x564   : > { %v6535_v62 = vpop.f32.mrb[92].mxu0 }
 0x565   : > { %v6536_v18 = vpop.f32.mrb[93].mxu0 }
 0x566   : > { %v11258_v49 = vadd.f32 %v6536_v18, %v6535_v62  ;;  %v6538_v36 = vpop.f32.mrb[94].mxu0  ;;  %v13227_v62 = vld [vmem:[#allocation63_spill] sm:$0xff] }
 0x567   : > { %v6539_v6 = vpop.f32.mrb[95].mxu0  ;;  %vm13228_vm12 = vnez %v13227_v62  ;;  %v13254_v62 = vld [vmem:[#allocation153_spill] sm:$0xff] }
 0x568   : > { %v11260_v5 = vadd.f32 %v6539_v6, %v6538_v36 }
 0x569   : > { %5063 = vmatmul.mubr.bf16.gmra.mrb[200].mxu0 %v13200_v58 }
 0x56a   : > { %5070 = vmatprep.mubr.bf16.mxu0 %v13202_v47  ;;  %v13230_v47 = vld [vmem:[#allocation141_spill] sm:$0xff] }
 0x56c   : > { %v6541_v29 = vpop.f32.mrb[96].mxu0 }
 0x56d   : > { %v6542_v60 = vpop.f32.mrb[97].mxu0 }
 0x56e   : > { %v11268_v57 = vadd.f32 %v6542_v60, %v6541_v29  ;;  %v6544_v23 = vpop.f32.mrb[98].mxu0  ;;  %v13231_v29 = vpack.c.bf16 %v13229_v52, %v13230_v47  ;;  %v13232_v60 = vld [vmem:[#allocation142_spill] sm:$0xff]  ;;  %v13259_v52 = vld [vmem:[#allocation61_spill] sm:$0xff] }
 0x56f   : > { %v6545_v41 = vpop.f32.mrb[99].mxu0  ;;  %vm13260_vm9 = vnez %v13259_v52  ;;  %v13283_v52 = vld [vmem:[#allocation22_spill] sm:$0xff] }
 0x570   : > { %v11270_v33 = vadd.f32 %v6545_v41, %v6544_v23  ;;  %v13233_v23 = vld [vmem:[#allocation143_spill] sm:$0xff]  ;;  %vm13284_vm15 = vnez %v13283_v52 }
 0x571   : > { %5071 = vmatmul.mubr.bf16.gmra.mrb[204].mxu0 %v13205_v63  ;;  %v13234_v41 = vpack.c.bf16 %v13232_v60, %v13233_v23 }
 0x572   : > { %5078 = vmatprep.mubr.bf16.mxu0 %v13206_v10 }
 0x574   : > { %v6547_v28 = vpop.f32.mrb[100].mxu0 }
 0x575   : > { %v6548_v15 = vpop.f32.mrb[101].mxu0 }
 0x576   : > { %v11278_v20 = vadd.f32 %v6548_v15, %v6547_v28  ;;  %v6550_v0 = vpop.f32.mrb[102].mxu0 }
 0x577   : > { %v6551_v48 = vpop.f32.mrb[103].mxu0 }
 0x578   : > { %v11280_v56 = vadd.f32 %v6551_v48, %v6550_v0  ;;  %v13237_v48 = vld [vmem:[#allocation144_spill] sm:$0xff] }
 0x579   : > { %5079 = vmatmul.mubr.bf16.gmra.mrb[208].mxu0 %v13207_v42  ;;  %v13238_v42 = vld [vmem:[#allocation145_spill] sm:$0xff] }
 0x57a   : > { %6387 = vmatprep.mubr.msk.bf16.mxu0 %vm13212_vm3, %v13210_v25  ;;  %v13239_v21 = vpack.c.bf16 %v13237_v48, %v13238_v42  ;;  %v13241_v25 = vld [vmem:[#allocation147_spill] sm:$0xff] }
 0x57b   : > { %v13242_v51 = vpack.c.bf16 %v13240_v22, %v13241_v25  ;;  %v13265_v48 = vld [vmem:[#allocation159_spill] sm:$0xff] }
 0x57c   : > { %v6553_v37 = vpop.f32.mrb[104].mxu0 }
 0x57d   : > { %v6554_v7 = vpop.f32.mrb[105].mxu0 }
 0x57e   : > { %v11290_v50 = vadd.f32 %v6554_v7, %v6553_v37  ;;  %v6556_v2 = vpop.f32.mrb[106].mxu0  ;;  %v13243_v37 = vld [vmem:[#allocation16_spill] sm:$0xff] }
 0x57f   : > { %v6557_v27 = vpop.f32.mrb[107].mxu0  ;;  %vm13244_vm5 = vnez %v13243_v37 }
 0x580   : > { %v11292_v46 = vadd.f32 %v6557_v27, %v6556_v2 }
 0x581   : > { %6390 = vmatmul.mubr.msk.bf16.vlgmr.msra.gmra.mrb[212].mxu0 %vm13212_vm3, %v13215_v16 }
 0x582   : > { %6393 = vmatprep.mubr.msk.bf16.mxu0 %vm13220_vm11, %v13218_v35  ;;  %v13247_v35 = vpack.c.bf16 %v13245_v26, %v13246_v24  ;;  %v13272_v24 = vld [vmem:[#allocation162_spill] sm:$0xff] }
 0x584   : > { %v6559_v55 = vpop.f32.mrb[108].mxu0 }
 0x585   : > { %v6560_v34 = vpop.f32.mrb[109].mxu0 }
 0x586   : > { %v11304_v19 = vadd.f32 %v6560_v34, %v6559_v55  ;;  %v6562_v54 = vpop.f32.mrb[110].mxu0  ;;  %v13249_v55 = vld [vmem:[#allocation151_spill] sm:$0xff] }
 0x587   : > { %v6563_v45 = vpop.f32.mrb[111].mxu0  ;;  %v13250_v34 = vpack.c.bf16 %v13248_v9, %v13249_v55  ;;  %v13275_v55 = vld [vmem:[#allocation19_spill] sm:$0xff] }
 0x588   : > { %v11306_v17 = vadd.f32 %v6563_v45, %v6562_v54  ;;  %v13251_v54 = vld [vmem:[#allocation60_spill] sm:$0xff]  ;;  %vm13276_vm4 = vnez %v13275_v55 }
 0x589   : > { %6396 = vmatmul.mubr.msk.bf16.gmra.mrb[216].mxu0 %vm13220_vm11, %v13223_v14  ;;  %vm13252_vm8 = vnez %v13251_v54 }
 0x58a   : > { %6399 = vmatprep.mubr.msk.bf16.mxu0 %vm13228_vm12, %v13226_v39  ;;  %v13253_v39 = vld [vmem:[#allocation152_spill] sm:$0xff] }
 0x58c   : > { %v6565_v18 = vpop.f32.mrb[112].mxu0 }
 0x58d   : > { %v6566_v36 = vpop.f32.mrb[113].mxu0 }
 0x58e   : > { %v11318_v6 = vadd.f32 %v6566_v36, %v6565_v18  ;;  %v6568_v1 = vpop.f32.mrb[114].mxu0  ;;  %v13255_v18 = vpack.c.bf16 %v13253_v39, %v13254_v62  ;;  %v13256_v36 = vld [vmem:[#allocation154_spill] sm:$0xff]  ;;  %v13277_v39 = vld [vmem:[#allocation164_spill] sm:$0xff]  ;;  %v13278_v62 = vld [vmem:[#allocation165_spill] sm:$0xff] }
 0x58f   : > { %v6569_v4 = vpop.f32.mrb[115].mxu0 }
 0x590   : > { %v11320_v58 = vadd.f32 %v6569_v4, %v6568_v1  ;;  %v13257_v1 = vld [vmem:[#allocation155_spill] sm:$0xff] }
 0x591   : > { %6402 = vmatmul.mubr.msk.bf16.gmra.mrb[220].mxu0 %vm13228_vm12, %v13231_v29  ;;  %v13258_v4 = vpack.c.bf16 %v13256_v36, %v13257_v1  ;;  %v13280_v36 = vld [vmem:[#allocation166_spill] sm:$0xff]  ;;  %v13281_v1 = vld [vmem:[#allocation167_spill] sm:$0xff] }
 0x592   : > { %6405 = vmatprep.mubr.msk.bf16.mxu0 %vm13236_vm0, %v13234_v41 }
 0x594   : > { %v6571_v61 = vpop.f32.mrb[116].mxu0 }
 0x595   : > { %v6572_v63 = vpop.f32.mrb[117].mxu0 }
 0x596   : > { %v11332_v10 = vadd.f32 %v6572_v63, %v6571_v61  ;;  %v6574_v28 = vpop.f32.mrb[118].mxu0  ;;  %v13261_v61 = vld [vmem:[#allocation156_spill] sm:$0xff]  ;;  %v13262_v63 = vld [vmem:[#allocation157_spill] sm:$0xff] }
 0x597   : > { %v6575_v15 = vpop.f32.mrb[119].mxu0 }
 0x598   : > { %v11334_v0 = vadd.f32 %v6575_v15, %v6574_v28  ;;  %v13263_v28 = vpack.c.bf16 %v13261_v61, %v13262_v63  ;;  %v13264_v15 = vld [vmem:[#allocation158_spill] sm:$0xff] }
 0x599   : > { %6408 = vmatmul.mubr.msk.bf16.gmra.mrb[224].mxu0 %vm13236_vm0, %v13239_v21  ;;  %v13266_v42 = vpack.c.bf16 %v13264_v15, %v13265_v48  ;;  %v13267_v21 = vld [vmem:[#allocation17_spill] sm:$0xff] }
 0x59a   : > { %6411 = vmatprep.mubr.msk.bf16.mxu0 %vm13244_vm5, %v13242_v51  ;;  %vm13268_vm7 = vnez %v13267_v21  ;;  %v13286_v15 = vld [vmem:[#allocation169_spill] sm:$0xff]  ;;  %v13289_v21 = vld [vmem:[#allocation171_spill] sm:$0xff] }
 0x59c   : > { %v6577_v7 = vpop.f32.mrb[120].mxu0 }
 0x59d   : > { %v6578_v2 = vpop.f32.mrb[121].mxu0 }
 0x59e   : > { %v11346_v27 = vadd.f32 %v6578_v2, %v6577_v7  ;;  %v6580_v30 = vpop.f32.mrb[122].mxu0 }
 0x59f   : > { %v6581_v8 = vpop.f32.mrb[123].mxu0 }
 0x5a0   : > { %v11348_v16 = vadd.f32 %v6581_v8, %v6580_v30  ;;  %v13269_v30 = vld [vmem:[#allocation160_spill] sm:$0xff]  ;;  %v13270_v8 = vld [vmem:[#allocation161_spill] sm:$0xff] }
 0x5a1   : > { %6414 = vmatmul.mubr.msk.bf16.gmra.mrb[228].mxu0 %vm13244_vm5, %v13247_v35  ;;  %v13271_v26 = vpack.c.bf16 %v13269_v30, %v13270_v8  ;;  %v13273_v35 = vld [vmem:[#allocation163_spill] sm:$0xff] }
 0x5a2   : > { %6417 = vmatprep.mubr.msk.bf16.mxu0 %vm13252_vm8, %v13250_v34  ;;  %v13274_v9 = vpack.c.bf16 %v13272_v24, %v13273_v35  ;;  %v13293_v35 = vld [vmem:[#allocation172_spill] sm:$0xff] }
 0x5a4   : > { %v6583_v45 = vpop.f32.mrb[124].mxu0 }
 0x5a5   : > { %v6584_v40 = vpop.f32.mrb[125].mxu0 }
 0x5a6   : > { %v11360_v32 = vadd.f32 %v6584_v40, %v6583_v45  ;;  %v6586_v14 = vpop.f32.mrb[126].mxu0 }
 0x5a7   : > { %v6587_v53 = vpop.f32.mrb[127].mxu0 }
 0x5a8   : > { %v11362_v38 = vadd.f32 %v6587_v53, %v6586_v14 }
 0x5a9   : > { %6420 = vmatmul.mubr.msk.bf16.gmra.mrb[232].mxu0 %vm13252_vm8, %v13255_v18  ;;  %v13279_v18 = vpack.c.bf16 %v13277_v39, %v13278_v62 }
 0x5aa   : > { %6423 = vmatprep.mubr.msk.bf16.mxu0 %vm13260_vm9, %v13258_v4  ;;  %v13282_v4 = vpack.c.bf16 %v13280_v36, %v13281_v1 }
 0x5ac   : > { %v6589_v47 = vpop.f32.mrb[128].mxu0 }
 0x5ad   : > { %v6590_v29 = vpop.f32.mrb[129].mxu0 }
 0x5ae   : > { %v11374_v60 = vadd.f32 %v6590_v29, %v6589_v47  ;;  %v6592_v23 = vpop.f32.mrb[130].mxu0 }
 0x5af   : > { %v6593_v41 = vpop.f32.mrb[131].mxu0 }
 0x5b0   : > { %v11376_v13 = vadd.f32 %v6593_v41, %v6592_v23 }
 0x5b1   : > { %6426 = vmatmul.mubr.msk.bf16.gmra.mrb[236].mxu0 %vm13260_vm9, %v13263_v28  ;;  %v13285_v28 = vld [vmem:[#allocation168_spill] sm:$0xff] }
 0x5b2   : > { %6429 = vmatprep.mubr.msk.bf16.mxu0 %vm13268_vm7, %v13266_v42  ;;  %v13287_v48 = vpack.c.bf16 %v13285_v28, %v13286_v15  ;;  %v13288_v42 = vld [vmem:[#allocation170_spill] sm:$0xff]  ;;  %v13304_v28 = vld [vmem:[#allocation183_spill] sm:$0xff]  ;;  %v13305_v15 = vld [vmem:[#allocation176_spill] sm:$0xff] }
 0x5b4   : > { %v6595_v22 = vpop.f32.mrb[132].mxu0 }
 0x5b5   : > { %v6596_v25 = vpop.f32.mrb[133].mxu0 }
 0x5b6   : > { %v11388_v51 = vadd.f32 %v6596_v25, %v6595_v22  ;;  %v6598_v37 = vpop.f32.mrb[134].mxu0  ;;  %v13290_v22 = vpack.c.bf16 %v13288_v42, %v13289_v21  ;;  %v13291_v25 = vld [vmem:[#allocation23_spill] sm:$0xff]  ;;  %v13307_v42 = vld [vmem:[#allocation25_spill] sm:$0xff] }
 0x5b7   : > { %v6599_v7 = vpop.f32.mrb[135].mxu0  ;;  %vm13292_vm1 = vnez %v13291_v25  ;;  %vm13308_vm10 = vnez %v13307_v42 }
 0x5b8   : > { %v11390_v2 = vadd.f32 %v6599_v7, %v6598_v37 }
 0x5b9   : > { %6432 = vmatmul.mubr.msk.bf16.gmra.mrb[240].mxu0 %vm13268_vm7, %v13271_v26 }
 0x5ba   : > { %6435 = vmatprep.mubr.msk.bf16.mxu0 %vm13276_vm4, %v13274_v9  ;;  %v13294_v9 = vld [vmem:[#allocation173_spill] sm:$0xff] }
 0x5bb   : > { %v13295_v55 = vpack.c.bf16 %v13293_v35, %v13294_v9  ;;  %v13310_v35 = vld [vmem:[#allocation132_spill] sm:$0xff] }
 0x5bc   : > { %v6601_v34 = vpop.f32.mrb[136].mxu0 }
 0x5bd   : > { %v6602_v54 = vpop.f32.mrb[137].mxu0 }
 0x5be   : > { %v11402_v45 = vadd.f32 %v6602_v54, %v6601_v34  ;;  %v6604_v40 = vpop.f32.mrb[138].mxu0  ;;  %v13296_v34 = vld [vmem:[#allocation174_spill] sm:$0xff]  ;;  %v13297_v54 = vld [vmem:[#allocation175_spill] sm:$0xff] }
 0x5bf   : > { %v6605_v14 = vpop.f32.mrb[139].mxu0 }
 0x5c0   : > { %v11404_v53 = vadd.f32 %v6605_v14, %v6604_v40  ;;  %v13298_v40 = vpack.c.bf16 %v13296_v34, %v13297_v54  ;;  %v13299_v14 = vld [vmem:[#allocation24_spill] sm:$0xff]  ;;  %v13314_v54 = vld [vmem:[#allocation27_spill] sm:$0xff] }
 0x5c1   : > { %6438 = vmatmul.mubr.msk.bf16.gmra.mrb[244].mxu0 %vm13276_vm4, %v13279_v18  ;;  %vm13300_vm6 = vnez %v13299_v14  ;;  %vm13315_vm2 = vnez %v13314_v54 }
 0x5c2   : > { %6441 = vmatprep.mubr.msk.bf16.mxu0 %vm13284_vm15, %v13282_v4 }
 0x5c4   : > { %v6607_v47 = vpop.f32.mrb[140].mxu0 }
 0x5c5   : > { %v6608_v29 = vpop.f32.mrb[141].mxu0 }
 0x5c6   : > { %v11416_v23 = vadd.f32 %v6608_v29, %v6607_v47  ;;  %v6610_v41 = vpop.f32.mrb[142].mxu0  ;;  %v13301_v47 = vld [vmem:[#allocation131_spill] sm:$0xff] }
 0x5c7   : > { %v6611_v61 = vpop.f32.mrb[143].mxu0  ;;  %v13302_v29 = vld [vmem:[#allocation103_spill] sm:$0xff] }
 0x5c8   : > { %v11418_v63 = vadd.f32 %v6611_v61, %v6610_v41  ;;  %v13303_v41 = vpack.c.bf16 %v13301_v47, %v13302_v29  ;;  %v13320_v29 = vld [vmem:[#allocation33_spill] sm:$0xff] }
 0x5c9   : > { %6444 = vmatmul.mubr.msk.bf16.gmra.mrb[248].mxu0 %vm13284_vm15, %v13287_v48  ;;  %v13306_v48 = vpack.c.bf16 %v13304_v28, %v13305_v15  ;;  %vm13321_vm13 = vnez %v13320_v29 }
 0x5ca   : > { %6447 = vmatprep.mubr.msk.bf16.mxu0 %vm13292_vm1, %v13290_v22 }
 0x5cc   : > { %v6613_v37 = vpop.f32.mrb[144].mxu0 }
 0x5cd   : > { %v6614_v7 = vpop.f32.mrb[145].mxu0 }
 0x5ce   : > { %v11430_v30 = vadd.f32 %v6614_v7, %v6613_v37  ;;  %v6616_v8 = vpop.f32.mrb[146].mxu0 }
 0x5cf   : > { %v6617_v26 = vpop.f32.mrb[147].mxu0 }
 0x5d0   : > { %v11432_v24 = vadd.f32 %v6617_v26, %v6616_v8  ;;  %v13309_v26 = vld [vmem:[#allocation178_spill] sm:$0xff] }
 0x5d1   : > { %6450 = vmatmul.mubr.msk.bf16.gmra.mrb[252].mxu0 %vm13292_vm1, %v13295_v55  ;;  %v13311_v9 = vpack.c.bf16 %v13309_v26, %v13310_v35  ;;  %v13312_v55 = vld [vmem:[#allocation67_spill] sm:$0xff] }
 0x5d2   : > { %6453 = vmatprep.mubr.msk.bf16.mxu0 %vm13300_vm6, %v13298_v40  ;;  %v13313_v34 = vpack.c.bf16 %v10979_v43, %v13312_v55 }
 0x5d4   : > { %v6635_v39 = vpop.f32.mrb[148].mxu0 }
 0x5d5   : > { %v6636_v62 = vpop.f32.mrb[149].mxu0 }
 0x5d6   : > { %v6637_v18 = vadd.f32 %v6636_v62, %v6635_v39  ;;  %v6638_v36 = vpop.f32.mrb[150].mxu0 }
 0x5d7   : > { %v6639_v1 = vpop.f32.mrb[151].mxu0 }
 0x5d8   : > { %v11445_v4 = vadd.f32 %v6637_v18, %v11238_v12  ;;  %v6640_v52 = vadd.f32 %v6639_v1, %v6638_v36  ;;  %v13316_v1 = vld [vmem:[#allocation184_spill] sm:$0xff] }
 0x5d9   : > { %6456 = vmatmul.mubr.msk.bf16.gmra.mrb[0].mxu0 %vm13300_vm6, %v13303_v41 }
 0x5da   : > { %v11453_v61 = vadd.f32 %v6640_v52, %v11240_v3  ;;  %6459 = vmatprep.mubr.msk.bf16.mxu0 %vm13308_vm10, %v13306_v48  ;;  %v13317_v52 = vld [vmem:[#allocation179_spill] sm:$0xff] }
 0x5db   : > { %v13318_v47 = vpack.c.bf16 %v13316_v1, %v13317_v52 }
 0x5dc   : > { %v6641_v21 = vpop.f32.mrb[152].mxu0 }
 0x5dd   : > { %v6642_v22 = vpop.f32.mrb[153].mxu0 }
 0x5de   : > { %v6643_v12 = vadd.f32 %v6642_v22, %v6641_v21  ;;  %v6644_v25 = vpop.f32.mrb[154].mxu0  ;;  %v13322_v22 = vld [vmem:[#allocation186_spill] sm:$0xff] }
 0x5df   : > { %v6645_v37 = vpop.f32.mrb[155].mxu0 }
 0x5e0   : > { %v11461_v7 = vadd.f32 %v6643_v12, %v11248_v44  ;;  %v6646_v8 = vadd.f32 %v6645_v37, %v6644_v25  ;;  %v13323_v12 = vld [vmem:[#allocation185_spill] sm:$0xff] }
 0x5e1   : > { %6462 = vmatmul.mubr.msk.bf16.gmra.mrb[4].mxu0 %vm13308_vm10, %v13311_v9  ;;  %v13324_v25 = vpack.c.bf16 %v13322_v22, %v13323_v12 }
 0x5e2   : > { %v11469_v3 = vadd.f32 %v6646_v8, %v11250_v11  ;;  %6465 = vmatprep.mubr.msk.bf16.mxu0 %vm13315_vm2, %v13313_v34  ;;  %v13319_v11 = vpack.c.bf16 %v10991_v59, %v11001_v31  ;;  %v13325_v31 = vld [vmem:[#allocation68_spill] sm:$0xff]  ;;  %v13328_v8 = vld [vmem:[#allocation26_spill] sm:$0xff] }
 0x5e3   : > { %vm13329_vm14 = vnez %v13328_v8 }
 0x5e4   : > { %v6647_v40 = vpop.f32.mrb[156].mxu0 }
 0x5e5   : > { %v6648_v14 = vpop.f32.mrb[157].mxu0 }
 0x5e6   : > { %v6649_v44 = vadd.f32 %v6648_v14, %v6647_v40  ;;  %v6650_v39 = vpop.f32.mrb[158].mxu0  ;;  %v13330_v40 = vld [vmem:[#allocation187_spill] sm:$0xff]  ;;  %v13331_v14 = vld [vmem:[#allocation65_spill] sm:$0xff] }
 0x5e7   : > { %v6651_v62 = vpop.f32.mrb[159].mxu0 }
 0x5e8   : > { %v11477_v18 = vadd.f32 %v6649_v44, %v11258_v49  ;;  %v6652_v36 = vadd.f32 %v6651_v62, %v6650_v39  ;;  %v13332_v44 = vpack.c.bf16 %v13330_v40, %v13331_v14 }
 0x5e9   : > { %6468 = vmatmul.mubr.msk.bf16.gmra.mrb[8].mxu0 %vm13315_vm2, %v13318_v47 }
 0x5ea   : > { %v11485_v43 = vadd.f32 %v6652_v36, %v11260_v5  ;;  %6471 = vmatprep.mubr.msk.bf16.mxu0 %vm13321_vm13, %v13319_v11  ;;  %v13326_v5 = vld [vmem:[#allocation66_spill] sm:$0xff] }
 0x5eb   : > { %v13327_v37 = vpack.c.bf16 %v13325_v31, %v13326_v5 }
 0x5ec   : > { %v6653_v41 = vpop.f32.mrb[160].mxu0 }
 0x5ed   : > { %v6654_v28 = vpop.f32.mrb[161].mxu0 }
 0x5ee   : > { %v6655_v49 = vadd.f32 %v6654_v28, %v6653_v41  ;;  %v6656_v15 = vpop.f32.mrb[162].mxu0 }
 0x5ef   : > { %v6657_v48 = vpop.f32.mrb[163].mxu0 }
 0x5f0   : > { %v11493_v42 = vadd.f32 %v6655_v49, %v11268_v57  ;;  %v6658_v21 = vadd.f32 %v6657_v48, %v6656_v15 }
 0x5f1   : > { %6474 = vmatmul.mubr.msk.bf16.gmra.mrb[12].mxu0 %vm13321_vm13, %v13324_v25 }
 0x5f2   : > { %v11501_v59 = vadd.f32 %v6658_v21, %v11270_v33  ;;  %6477 = vmatprep.mubr.msk.bf16.mxu0 %vm13329_vm14, %v13327_v37 }
 0x5f4   : > { %v6659_v26 = vpop.f32.mrb[164].mxu0 }
 0x5f5   : > { %v6660_v35 = vpop.f32.mrb[165].mxu0 }
 0x5f6   : > { %v6661_v57 = vadd.f32 %v6660_v35, %v6659_v26  ;;  %v6662_v9 = vpop.f32.mrb[166].mxu0 }
 0x5f7   : > { %v6663_v55 = vpop.f32.mrb[167].mxu0 }
 0x5f8   : > { %v11509_v34 = vadd.f32 %v6661_v57, %v11278_v20  ;;  %v6664_v54 = vadd.f32 %v6663_v55, %v6662_v9 }
 0x5f9   : > { %6480 = vmatmul.mubr.msk.bf16.gmra.mrb[16].mxu0 %vm13329_vm14, %v13332_v44 }
 0x5fa   : > { %v11517_v33 = vadd.f32 %v6664_v54, %v11280_v56 }
 0x5fc   : > { %v6665_v39 = vpop.f32.mrb[168].mxu0 }
 0x5fd   : > { %v6666_v62 = vpop.f32.mrb[169].mxu0 }
 0x5fe   : > { %v6667_v36 = vadd.f32 %v6666_v62, %v6665_v39  ;;  %v6668_v1 = vpop.f32.mrb[170].mxu0 }
 0x5ff   : > { %v6669_v52 = vpop.f32.mrb[171].mxu0 }
 0x600   : > { %v11520_v47 = vadd.f32 %v6667_v36, %v11290_v50  ;;  %v6670_v20 = vadd.f32 %v6669_v52, %v6668_v1 }
 0x602   : > { %v11523_v11 = vadd.f32 %v6670_v20, %v11292_v46 }
 0x604   : > { %v6671_v29 = vpop.f32.mrb[172].mxu0 }
 0x605   : > { %v6672_v41 = vpop.f32.mrb[173].mxu0 }
 0x606   : > { %v6673_v28 = vadd.f32 %v6672_v41, %v6671_v29  ;;  %v6674_v49 = vpop.f32.mrb[174].mxu0 }
 0x607   : > { %v6675_v15 = vpop.f32.mrb[175].mxu0 }
 0x608   : > { %v11526_v56 = vadd.f32 %v6673_v28, %v11304_v19  ;;  %v6676_v48 = vadd.f32 %v6675_v15, %v6674_v49 }
 0x60a   : > { %v11529_v21 = vadd.f32 %v6676_v48, %v11306_v17 }
 0x60c   : > { %v6677_v22 = vpop.f32.mrb[176].mxu0 }
 0x60d   : > { %v6678_v12 = vpop.f32.mrb[177].mxu0 }
 0x60e   : > { %v6679_v50 = vadd.f32 %v6678_v12, %v6677_v22  ;;  %v6680_v25 = vpop.f32.mrb[178].mxu0 }
 0x60f   : > { %v6681_v31 = vpop.f32.mrb[179].mxu0 }
 0x610   : > { %v11532_v46 = vadd.f32 %v6679_v50, %v11318_v6  ;;  %v6682_v5 = vadd.f32 %v6681_v31, %v6680_v25 }
 0x612   : > { %v11535_v37 = vadd.f32 %v6682_v5, %v11320_v58 }
 0x614   : > { %v6683_v8 = vpop.f32.mrb[180].mxu0 }
 0x615   : > { %v6684_v26 = vpop.f32.mrb[181].mxu0 }
 0x616   : > { %v6685_v19 = vadd.f32 %v6684_v26, %v6683_v8  ;;  %v6686_v35 = vpop.f32.mrb[182].mxu0 }
 0x617   : > { %v6687_v57 = vpop.f32.mrb[183].mxu0 }
 0x618   : > { %v11538_v17 = vadd.f32 %v6685_v19, %v11332_v10  ;;  %v6688_v9 = vadd.f32 %v6687_v57, %v6686_v35 }
 0x61a   : > { %v11541_v55 = vadd.f32 %v6688_v9, %v11334_v0 }
 0x61c   : > { %v6689_v54 = vpop.f32.mrb[184].mxu0 }
 0x61d   : > { %v6690_v40 = vpop.f32.mrb[185].mxu0 }
 0x61e   : > { %v6691_v6 = vadd.f32 %v6690_v40, %v6689_v54  ;;  %v6692_v14 = vpop.f32.mrb[186].mxu0 }
 0x61f   : > { %v6693_v44 = vpop.f32.mrb[187].mxu0 }
 0x620   : > { %v11544_v58 = vadd.f32 %v6691_v6, %v11346_v27  ;;  %v6694_v39 = vadd.f32 %v6693_v44, %v6692_v14 }
 0x622   : > { %v11547_v62 = vadd.f32 %v6694_v39, %v11348_v16 }
 0x624   : > { %v6695_v36 = vpop.f32.mrb[188].mxu0 }
 0x625   : > { %v6696_v1 = vpop.f32.mrb[189].mxu0 }
 0x626   : > { %v6697_v10 = vadd.f32 %v6696_v1, %v6695_v36  ;;  %v6698_v52 = vpop.f32.mrb[190].mxu0 }
 0x627   : > { %v6699_v20 = vpop.f32.mrb[191].mxu0 }
 0x628   : > { %v11550_v0 = vadd.f32 %v6697_v10, %v11360_v32  ;;  %v6700_v29 = vadd.f32 %v6699_v20, %v6698_v52 }
 0x62a   : > { %v11553_v41 = vadd.f32 %v6700_v29, %v11362_v38 }
 0x62c   : > { %v6701_v28 = vpop.f32.mrb[192].mxu0 }
 0x62d   : > { %v6702_v49 = vpop.f32.mrb[193].mxu0 }
 0x62e   : > { %v6703_v27 = vadd.f32 %v6702_v49, %v6701_v28  ;;  %v6704_v15 = vpop.f32.mrb[194].mxu0 }
 0x62f   : > { %v6705_v48 = vpop.f32.mrb[195].mxu0 }
 0x630   : > { %v11556_v16 = vadd.f32 %v6703_v27, %v11374_v60  ;;  %v6706_v22 = vadd.f32 %v6705_v48, %v6704_v15 }
 0x632   : > { %v11559_v12 = vadd.f32 %v6706_v22, %v11376_v13 }
 0x634   : > { %v6707_v50 = vpop.f32.mrb[196].mxu0 }
 0x635   : > { %v6708_v25 = vpop.f32.mrb[197].mxu0 }
 0x636   : > { %v6709_v32 = vadd.f32 %v6708_v25, %v6707_v50  ;;  %v6710_v31 = vpop.f32.mrb[198].mxu0 }
 0x637   : > { %v6711_v5 = vpop.f32.mrb[199].mxu0 }
 0x638   : > { %v11562_v38 = vadd.f32 %v6709_v32, %v11388_v51  ;;  %v6712_v8 = vadd.f32 %v6711_v5, %v6710_v31 }
 0x63a   : > { %v11565_v26 = vadd.f32 %v6712_v8, %v11390_v2 }
 0x63c   : > { %v6713_v19 = vpop.f32.mrb[200].mxu0 }
 0x63d   : > { %v6714_v35 = vpop.f32.mrb[201].mxu0 }
 0x63e   : > { %v6715_v60 = vadd.f32 %v6714_v35, %v6713_v19  ;;  %v6716_v57 = vpop.f32.mrb[202].mxu0 }
 0x63f   : > { %v6717_v9 = vpop.f32.mrb[203].mxu0 }
 0x640   : > { %v11568_v13 = vadd.f32 %v6715_v60, %v11402_v45  ;;  %v6718_v54 = vadd.f32 %v6717_v9, %v6716_v57 }
 0x642   : > { %v11571_v40 = vadd.f32 %v6718_v54, %v11404_v53 }
 0x644   : > { %v6719_v6 = vpop.f32.mrb[204].mxu0 }
 0x645   : > { %v6720_v14 = vpop.f32.mrb[205].mxu0 }
 0x646   : > { %v6721_v51 = vadd.f32 %v6720_v14, %v6719_v6  ;;  %v6722_v44 = vpop.f32.mrb[206].mxu0 }
 0x647   : > { %v6723_v39 = vpop.f32.mrb[207].mxu0 }
 0x648   : > { %v11574_v2 = vadd.f32 %v6721_v51, %v11416_v23  ;;  %v6724_v36 = vadd.f32 %v6723_v39, %v6722_v44 }
 0x64a   : > { %v11577_v1 = vadd.f32 %v6724_v36, %v11418_v63  ;;  %v11588_v63 = vld [vmem:[%s11785_s8] ss:$0 sm:$0xff] }
 0x64c   : > { %v6725_v10 = vpop.f32.mrb[208].mxu0 }
 0x64d   : > { %v6726_v52 = vpop.f32.mrb[209].mxu0 }
 0x64e   : > { %v6727_v45 = vadd.f32 %v6726_v52, %v6725_v10  ;;  %v6728_v20 = vpop.f32.mrb[210].mxu0 }
 0x64f   : > { %v6729_v29 = vpop.f32.mrb[211].mxu0 }
 0x650   : > { %v11580_v53 = vadd.f32 %v6727_v45, %v11430_v30  ;;  %v6730_v28 = vadd.f32 %v6729_v29, %v6728_v20  ;;  %v11594_v30 = vld [vmem:[%s11786_s9] ss:$0 sm:$0xff] }
 0x652   : > { %v11583_v49 = vadd.f32 %v6730_v28, %v11432_v24 }
 0x654   : > { %v6747_v27 = vpop.f32.mrb[212].mxu0 }
 0x655   : > { %v6748_v15 = vpop.f32.mrb[213].mxu0 }
 0x656   : > { %v6749_v23 = vadd.f32 %v6748_v15, %v6747_v27  ;;  %v6750_v48 = vpop.f32.mrb[214].mxu0 }
 0x657   : > { %v6751_v22 = vpop.f32.mrb[215].mxu0 }
 0x658   : > { %v5601_v50 = vadd.f32 %v6749_v23, %v11445_v4  ;;  %v6752_v25 = vadd.f32 %v6751_v22, %v6750_v48  ;;  %v5744_v4 = vld [vmem:[%s11787_s10 + $0x8] sm:$0xff] }
 0x659   : > { %5811 = vmatprep.mubr.f32.mxu0 %v5744_v4 }
 0x65a   : > { %v5640_v24 = vmul.f32 %v11588_v63, %v5601_v50  ;;  %v5602_v32 = vadd.f32 %v6752_v25, %v11453_v61 }
 0x65c   : > { %v5679_v31 = vadd.f32 %v11594_v30, %v5640_v24  ;;  %v5641_v5 = vmul.f32 %v11588_v63, %v5602_v32  ;;  %v6753_v8 = vpop.f32.mrb[216].mxu0 }
 0x65d   : > { %v6754_v19 = vpop.f32.mrb[217].mxu0 }
 0x65e   : > { %v5680_v35 = vadd.f32 %v11594_v30, %v5641_v5  ;;  %v6755_v60 = vadd.f32 %v6754_v19, %v6753_v8  ;;  %v6756_v57 = vpop.f32.mrb[218].mxu0  ;;  %v5711_v54 = vmax.f32 %v5679_v31, 0.0 }
 0x65f   : > { %v6757_v9 = vpop.f32.mrb[219].mxu0 }
 0x660   : > { %v5712_v6 = vmax.f32 %v5680_v35, 0.0  ;;  %v5603_v61 = vadd.f32 %v6755_v60, %v11461_v7  ;;  %v6758_v14 = vadd.f32 %v6757_v9, %v6756_v57 }
 0x662   : > { %v5642_v51 = vmul.f32 %v11588_v63, %v5603_v61  ;;  %v5604_v44 = vadd.f32 %v6758_v14, %v11469_v3  ;;  %v11607_v39 = vpack.c.bf16 %v5712_v6, %v5711_v54 }
 0x664   : > { %v5681_v36 = vadd.f32 %v11594_v30, %v5642_v51  ;;  %v5643_v10 = vmul.f32 %v11588_v63, %v5604_v44  ;;  %v6759_v52 = vpop.f32.mrb[220].mxu0 }
 0x665   : > { %v6760_v45 = vpop.f32.mrb[221].mxu0 }
 0x666   : > { %v5682_v20 = vadd.f32 %v11594_v30, %v5643_v10  ;;  %v6761_v29 = vadd.f32 %v6760_v45, %v6759_v52  ;;  %v6762_v28 = vpop.f32.mrb[222].mxu0  ;;  %v5713_v15 = vmax.f32 %v5681_v36, 0.0 }
 0x667   : > { %v6763_v27 = vpop.f32.mrb[223].mxu0 }
 0x668   : > { %v5714_v7 = vmax.f32 %v5682_v20, 0.0  ;;  %v5605_v23 = vadd.f32 %v6761_v29, %v11477_v18  ;;  %v6764_v48 = vadd.f32 %v6763_v27, %v6762_v28 }
 0x66a   : > { %v5644_v3 = vmul.f32 %v11588_v63, %v5605_v23  ;;  %v5606_v22 = vadd.f32 %v6764_v48, %v11485_v43  ;;  %v11615_v50 = vpack.c.bf16 %v5714_v7, %v5713_v15 }
 0x66c   : > { %v5683_v25 = vadd.f32 %v11594_v30, %v5644_v3  ;;  %v5645_v24 = vmul.f32 %v11588_v63, %v5606_v22  ;;  %v6765_v32 = vpop.f32.mrb[224].mxu0 }
 0x66d   : > { %v6766_v31 = vpop.f32.mrb[225].mxu0 }
 0x66e   : > { %v5684_v5 = vadd.f32 %v11594_v30, %v5645_v24  ;;  %v6767_v8 = vadd.f32 %v6766_v31, %v6765_v32  ;;  %v6768_v19 = vpop.f32.mrb[226].mxu0  ;;  %v5715_v35 = vmax.f32 %v5683_v25, 0.0 }
 0x66f   : > { %v6769_v4 = vpop.f32.mrb[227].mxu0 }
 0x670   : > { %v5716_v18 = vmax.f32 %v5684_v5, 0.0  ;;  %v5607_v60 = vadd.f32 %v6767_v8, %v11493_v42  ;;  %v6770_v57 = vadd.f32 %v6769_v4, %v6768_v19 }
 0x672   : > { %v5646_v43 = vmul.f32 %v11588_v63, %v5607_v60  ;;  %v5608_v9 = vadd.f32 %v6770_v57, %v11501_v59  ;;  %v11623_v54 = vpack.c.bf16 %v5716_v18, %v5715_v35 }
 0x674   : > { %v5685_v6 = vadd.f32 %v11594_v30, %v5646_v43  ;;  %v5647_v61 = vmul.f32 %v11588_v63, %v5608_v9  ;;  %v6771_v14 = vpop.f32.mrb[228].mxu0 }
 0x675   : > { %v6772_v51 = vpop.f32.mrb[229].mxu0 }
 0x676   : > { %v5686_v44 = vadd.f32 %v11594_v30, %v5647_v61  ;;  %v6773_v36 = vadd.f32 %v6772_v51, %v6771_v14  ;;  %v6774_v10 = vpop.f32.mrb[230].mxu0  ;;  %v5717_v45 = vmax.f32 %v5685_v6, 0.0 }
 0x677   : > { %v6775_v52 = vpop.f32.mrb[231].mxu0 }
 0x678   : > { %v5718_v42 = vmax.f32 %v5686_v44, 0.0  ;;  %v5609_v20 = vadd.f32 %v6773_v36, %v11509_v34  ;;  %v6776_v29 = vadd.f32 %v6775_v52, %v6774_v10 }
 0x67a   : > { %v5648_v59 = vmul.f32 %v11588_v63, %v5609_v20  ;;  %v5610_v28 = vadd.f32 %v6776_v29, %v11517_v33  ;;  %v11631_v27 = vpack.c.bf16 %v5718_v42, %v5717_v45 }
 0x67c   : > { %v5687_v15 = vadd.f32 %v11594_v30, %v5648_v59  ;;  %v5649_v7 = vmul.f32 %v11588_v63, %v5610_v28  ;;  %v6777_v23 = vpop.f32.mrb[232].mxu0 }
 0x67d   : > { %v6778_v48 = vpop.f32.mrb[233].mxu0 }
 0x67e   : > { %v5688_v3 = vadd.f32 %v11594_v30, %v5649_v7  ;;  %v6779_v22 = vadd.f32 %v6778_v48, %v6777_v23  ;;  %v6780_v25 = vpop.f32.mrb[234].mxu0  ;;  %v5719_v32 = vmax.f32 %v5687_v15, 0.0 }
 0x67f   : > { %v6781_v24 = vpop.f32.mrb[235].mxu0 }
 0x680   : > { %v5720_v34 = vmax.f32 %v5688_v3, 0.0  ;;  %v5611_v31 = vadd.f32 %v6779_v22, %v11520_v47  ;;  %v6782_v5 = vadd.f32 %v6781_v24, %v6780_v25 }
 0x682   : > { %v5650_v33 = vmul.f32 %v11588_v63, %v5611_v31  ;;  %v5612_v8 = vadd.f32 %v6782_v5, %v11523_v11  ;;  %v11639_v19 = vpack.c.bf16 %v5720_v34, %v5719_v32 }
 0x684   : > { %v5689_v4 = vadd.f32 %v11594_v30, %v5650_v33  ;;  %v5651_v35 = vmul.f32 %v11588_v63, %v5612_v8  ;;  %v6783_v18 = vpop.f32.mrb[236].mxu0 }
 0x685   : > { %v6784_v60 = vpop.f32.mrb[237].mxu0 }
 0x686   : > { %v5690_v57 = vadd.f32 %v11594_v30, %v5651_v35  ;;  %v6785_v43 = vadd.f32 %v6784_v60, %v6783_v18  ;;  %v6786_v9 = vpop.f32.mrb[238].mxu0  ;;  %v5721_v61 = vmax.f32 %v5689_v4, 0.0 }
 0x687   : > { %v6787_v6 = vpop.f32.mrb[239].mxu0 }
 0x688   : > { %v5722_v47 = vmax.f32 %v5690_v57, 0.0  ;;  %v5613_v14 = vadd.f32 %v6785_v43, %v11526_v56  ;;  %v6788_v51 = vadd.f32 %v6787_v6, %v6786_v9 }
 0x68a   : > { %v5652_v11 = vmul.f32 %v11588_v63, %v5613_v14  ;;  %v5614_v44 = vadd.f32 %v6788_v51, %v11529_v21  ;;  %v11647_v36 = vpack.c.bf16 %v5722_v47, %v5721_v61 }
 0x68c   : > { %v5691_v10 = vadd.f32 %v11594_v30, %v5652_v11  ;;  %v5653_v52 = vmul.f32 %v11588_v63, %v5614_v44  ;;  %v6789_v45 = vpop.f32.mrb[240].mxu0 }
 0x68d   : > { %v6790_v42 = vpop.f32.mrb[241].mxu0 }
 0x68e   : > { %v5692_v20 = vadd.f32 %v11594_v30, %v5653_v52  ;;  %v6791_v29 = vadd.f32 %v6790_v42, %v6789_v45  ;;  %v6792_v59 = vpop.f32.mrb[242].mxu0  ;;  %v5723_v15 = vmax.f32 %v5691_v10, 0.0 }
 0x68f   : > { %v6793_v28 = vpop.f32.mrb[243].mxu0 }
 0x690   : > { %v5724_v56 = vmax.f32 %v5692_v20, 0.0  ;;  %v5615_v7 = vadd.f32 %v6791_v29, %v11532_v46  ;;  %v6794_v23 = vadd.f32 %v6793_v28, %v6792_v59 }
 0x692   : > { %v5654_v21 = vmul.f32 %v11588_v63, %v5615_v7  ;;  %v5616_v48 = vadd.f32 %v6794_v23, %v11535_v37  ;;  %v11655_v3 = vpack.c.bf16 %v5724_v56, %v5723_v15 }
 0x694   : > { %v5693_v22 = vadd.f32 %v11594_v30, %v5654_v21  ;;  %v5655_v25 = vmul.f32 %v11588_v63, %v5616_v48  ;;  %v6795_v24 = vpop.f32.mrb[244].mxu0 }
 0x695   : > { %v6796_v32 = vpop.f32.mrb[245].mxu0 }
 0x696   : > { %v5694_v34 = vadd.f32 %v11594_v30, %v5655_v25  ;;  %v6797_v31 = vadd.f32 %v6796_v32, %v6795_v24  ;;  %v6798_v5 = vpop.f32.mrb[246].mxu0  ;;  %v5725_v8 = vmax.f32 %v5693_v22, 0.0 }
 0x697   : > { %v6799_v33 = vpop.f32.mrb[247].mxu0 }
 0x698   : > { %v5726_v46 = vmax.f32 %v5694_v34, 0.0  ;;  %v5617_v4 = vadd.f32 %v6797_v31, %v11538_v17  ;;  %v6800_v35 = vadd.f32 %v6799_v33, %v6798_v5 }
 0x69a   : > { %v5656_v37 = vmul.f32 %v11588_v63, %v5617_v4  ;;  %v5618_v18 = vadd.f32 %v6800_v35, %v11541_v55  ;;  %v11663_v60 = vpack.c.bf16 %v5726_v46, %v5725_v8 }
 0x69c   : > { %v5657_v57 = vmul.f32 %v11588_v63, %v5618_v18  ;;  %v6801_v43 = vpop.f32.mrb[248].mxu0  ;;  %v5695_v9 = vadd.f32 %v11594_v30, %v5656_v37 }
 0x69d   : > { %v6802_v6 = vpop.f32.mrb[249].mxu0 }
 0x69e   : > { %v6803_v61 = vadd.f32 %v6802_v6, %v6801_v43  ;;  %v6804_v47 = vpop.f32.mrb[250].mxu0  ;;  %v5696_v14 = vadd.f32 %v11594_v30, %v5657_v57  ;;  %v5727_v44 = vmax.f32 %v5695_v9, 0.0 }
 0x69f   : > { %v6805_v51 = vpop.f32.mrb[251].mxu0 }
 0x6a0   : > { %v5619_v17 = vadd.f32 %v6803_v61, %v11544_v58  ;;  %v6806_v11 = vadd.f32 %v6805_v51, %v6804_v47  ;;  %v5728_v10 = vmax.f32 %v5696_v14, 0.0 }
 0x6a2   : > { %v5658_v55 = vmul.f32 %v11588_v63, %v5619_v17  ;;  %v5620_v52 = vadd.f32 %v6806_v11, %v11547_v62  ;;  %v6917_v45 = vpack.c.bf16 %v5728_v10, %v5727_v44 }
 0x6a4   : > { %v5659_v42 = vmul.f32 %v11588_v63, %v5620_v52  ;;  %v6807_v20 = vpop.f32.mrb[252].mxu0  ;;  %6918 = vmatprep.subr.bf16.mxu0 %v6917_v45  ;;  %v5697_v29 = vadd.f32 %v11594_v30, %v5658_v55 }
 0x6a5   : > { %v6808_v59 = vpop.f32.mrb[253].mxu0  ;;  %6920 = vmatpush3.bf16.msra.mxu0 %v11607_v39 }
 0x6a6   : > { %v6809_v28 = vadd.f32 %v6808_v59, %v6807_v20  ;;  %v6810_v15 = vpop.f32.mrb[254].mxu0  ;;  %v5698_v58 = vadd.f32 %v11594_v30, %v5659_v42  ;;  %v5729_v21 = vmax.f32 %v5697_v29, 0.0 }
 0x6a7   : > { %v6811_v56 = vpop.f32.mrb[255].mxu0 }
 0x6a8   : > { %v5621_v7 = vadd.f32 %v6809_v28, %v11550_v0  ;;  %v6812_v23 = vadd.f32 %v6811_v56, %v6810_v15  ;;  %v5730_v62 = vmax.f32 %v5698_v58, 0.0 }
 0x6aa   : > { %v5660_v48 = vmul.f32 %v11588_v63, %v5621_v7  ;;  %v5622_v22 = vadd.f32 %v6812_v23, %v11553_v41  ;;  %v6921_v25 = vpack.c.bf16 %v5730_v62, %v5729_v21 }
 0x6ac   : > { %v5661_v24 = vmul.f32 %v11588_v63, %v5622_v22  ;;  %v6813_v32 = vpop.f32.mrb[0].mxu0  ;;  %6922 = vmatprep.subr.bf16.mxu0 %v6921_v25  ;;  %v5699_v39 = vadd.f32 %v11594_v30, %v5660_v48 }
 0x6ad   : > { %v6814_v34 = vpop.f32.mrb[1].mxu0  ;;  %6924 = vmatpush3.bf16.msra.mxu0 %v11615_v50 }
 0x6ae   : > { %v6815_v31 = vadd.f32 %v6814_v34, %v6813_v32  ;;  %v6816_v5 = vpop.f32.mrb[2].mxu0  ;;  %v5700_v0 = vadd.f32 %v11594_v30, %v5661_v24  ;;  %v5731_v4 = vmax.f32 %v5699_v39, 0.0 }
 0x6af   : > { %v6817_v33 = vpop.f32.mrb[3].mxu0 }
 0x6b0   : > { %v5623_v8 = vadd.f32 %v6815_v31, %v11556_v16  ;;  %v6818_v46 = vadd.f32 %v6817_v33, %v6816_v5  ;;  %v5732_v41 = vmax.f32 %v5700_v0, 0.0 }
 0x6b2   : > { %v5662_v35 = vmul.f32 %v11588_v63, %v5623_v8  ;;  %v5624_v37 = vadd.f32 %v6818_v46, %v11559_v12  ;;  %v6925_v18 = vpack.c.bf16 %v5732_v41, %v5731_v4 }
 0x6b4   : > { %v5663_v57 = vmul.f32 %v11588_v63, %v5624_v37  ;;  %v6819_v43 = vpop.f32.mrb[4].mxu0  ;;  %6926 = vmatprep.subr.bf16.mxu0 %v6925_v18  ;;  %v5701_v50 = vadd.f32 %v11594_v30, %v5662_v35 }
 0x6b5   : > { %v6820_v9 = vpop.f32.mrb[5].mxu0  ;;  %6928 = vmatpush3.bf16.msra.mxu0 %v11623_v54 }
 0x6b6   : > { %v6821_v6 = vadd.f32 %v6820_v9, %v6819_v43  ;;  %v6822_v61 = vpop.f32.mrb[6].mxu0  ;;  %v5702_v16 = vadd.f32 %v11594_v30, %v5663_v57  ;;  %v5733_v17 = vmax.f32 %v5701_v50, 0.0 }
 0x6b7   : > { %v6823_v47 = vpop.f32.mrb[7].mxu0 }
 0x6b8   : > { %v5625_v14 = vadd.f32 %v6821_v6, %v11562_v38  ;;  %v6824_v51 = vadd.f32 %v6823_v47, %v6822_v61  ;;  %v5734_v12 = vmax.f32 %v5702_v16, 0.0 }
 0x6ba   : > { %v5664_v11 = vmul.f32 %v11588_v63, %v5625_v14  ;;  %v5626_v44 = vadd.f32 %v6824_v51, %v11565_v26  ;;  %v6929_v10 = vpack.c.bf16 %v5734_v12, %v5733_v17 }
 0x6bc   : > { %v5665_v55 = vmul.f32 %v11588_v63, %v5626_v44  ;;  %v6825_v52 = vpop.f32.mrb[8].mxu0  ;;  %6930 = vmatprep.subr.bf16.mxu0 %v6929_v10  ;;  %v5703_v54 = vadd.f32 %v11594_v30, %v5664_v11 }
 0x6bd   : > { %v6826_v45 = vpop.f32.mrb[9].mxu0  ;;  %6932 = vmatpush3.bf16.msra.mxu0 %v11631_v27 }
 0x6be   : > { %v6827_v42 = vadd.f32 %v6826_v45, %v6825_v52  ;;  %v6828_v20 = vpop.f32.mrb[10].mxu0  ;;  %v5704_v38 = vadd.f32 %v11594_v30, %v5665_v55  ;;  %v5735_v15 = vmax.f32 %v5703_v54, 0.0 }
 0x6bf   : > { %v6829_v29 = vpop.f32.mrb[11].mxu0 }
 0x6c0   : > { %v5627_v59 = vadd.f32 %v6827_v42, %v11568_v13  ;;  %v6830_v28 = vadd.f32 %v6829_v29, %v6828_v20  ;;  %v5736_v26 = vmax.f32 %v5704_v38, 0.0 }
 0x6c2   : > { %v5666_v58 = vmul.f32 %v11588_v63, %v5627_v59  ;;  %v5628_v56 = vadd.f32 %v6830_v28, %v11571_v40  ;;  %v6933_v7 = vpack.c.bf16 %v5736_v26, %v5735_v15 }
 0x6c4   : > { %v5667_v23 = vmul.f32 %v11588_v63, %v5628_v56  ;;  %v6831_v21 = vpop.f32.mrb[12].mxu0  ;;  %6934 = vmatprep.subr.bf16.mxu0 %v6933_v7  ;;  %v5705_v27 = vadd.f32 %v11594_v30, %v5666_v58 }
 0x6c5   : > { %v6832_v62 = vpop.f32.mrb[13].mxu0  ;;  %6936 = vmatpush3.bf16.msra.mxu0 %v11639_v19 }
 0x6c6   : > { %v6833_v48 = vadd.f32 %v6832_v62, %v6831_v21  ;;  %v6834_v22 = vpop.f32.mrb[14].mxu0  ;;  %v5706_v13 = vadd.f32 %v11594_v30, %v5667_v23  ;;  %v5737_v39 = vmax.f32 %v5705_v27, 0.0 }
 0x6c7   : > { %v6835_v25 = vpop.f32.mrb[15].mxu0 }
 0x6c8   : > { %v5629_v24 = vadd.f32 %v6833_v48, %v11574_v2  ;;  %v6836_v32 = vadd.f32 %v6835_v25, %v6834_v22  ;;  %v5738_v40 = vmax.f32 %v5706_v13, 0.0 }
 0x6ca   : > { %v5668_v34 = vmul.f32 %v11588_v63, %v5629_v24  ;;  %v5630_v31 = vadd.f32 %v6836_v32, %v11577_v1  ;;  %v6937_v5 = vpack.c.bf16 %v5738_v40, %v5737_v39 }
 0x6cc   : > { %v5669_v0 = vmul.f32 %v11588_v63, %v5630_v31  ;;  %v6837_v33 = vpop.f32.mrb[16].mxu0  ;;  %6938 = vmatprep.subr.bf16.mxu0 %v6937_v5  ;;  %v5707_v19 = vadd.f32 %v11594_v30, %v5668_v34 }
 0x6cd   : > { %v6838_v8 = vpop.f32.mrb[17].mxu0  ;;  %6940 = vmatpush3.bf16.msra.mxu0 %v11647_v36 }
 0x6ce   : > { %v6839_v46 = vadd.f32 %v6838_v8, %v6837_v33  ;;  %v6840_v4 = vpop.f32.mrb[18].mxu0  ;;  %v5708_v2 = vadd.f32 %v11594_v30, %v5669_v0  ;;  %v5739_v18 = vmax.f32 %v5707_v19, 0.0 }
 0x6cf   : > { %v6841_v41 = vpop.f32.mrb[19].mxu0 }
 0x6d0   : > { %v5631_v35 = vadd.f32 %v6839_v46, %v11580_v53  ;;  %v6842_v37 = vadd.f32 %v6841_v41, %v6840_v4  ;;  %v5740_v1 = vmax.f32 %v5708_v2, 0.0 }
 0x6d2   : > { %v5670_v57 = vmul.f32 %v11588_v63, %v5631_v35  ;;  %v5632_v43 = vadd.f32 %v6842_v37, %v11583_v49  ;;  %v6941_v50 = vpack.c.bf16 %v5740_v1, %v5739_v18  ;;  %v5743_v49 = vld [vmem:[%s11787_s10] sm:$0xff] }
 0x6d4   : > { %v5671_v9 = vmul.f32 %v11588_v63, %v5632_v43  ;;  %6942 = vmatprep.subr.bf16.mxu0 %v6941_v50  ;;  %v5709_v36 = vadd.f32 %v11594_v30, %v5670_v57  ;;  %v5746_v63 = vld [vmem:[%s11787_s10 + $0x18] sm:$0xff] }
 0x6d5   : > { %6944 = vmatpush3.bf16.msra.mxu0 %v11655_v3 }
 0x6d6   : > { %v5710_v6 = vadd.f32 %v11594_v30, %v5671_v9  ;;  %v5741_v61 = vmax.f32 %v5709_v36, 0.0  ;;  %v5745_v30 = vld [vmem:[%s11787_s10 + $0x10] sm:$0xff] }
 0x6d8   : > { %v5742_v53 = vmax.f32 %v5710_v6, 0.0 }
 0x6da   : > { %v6945_v16 = vpack.c.bf16 %v5742_v53, %v5741_v61 }
 0x6dc   : > { %6946 = vmatprep.subr.bf16.mxu0 %v6945_v16 }
 0x6dd   : > { %6948 = vmatpush3.bf16.msra.mxu0 %v11663_v60 }
 0x6e0   : > { %5812 = vmatmul.mubr.f32.vlgmr.msra.gmra.mrb[20].mxu0 %v5743_v49 }
 0x6e1   : > { %5816 = vmatprep.mubr.f32.mxu0 %v5746_v63 }
 0x6e4   : > { %5817 = vmatmul.mubr.f32.gmra.mrb[22].mxu0 %v5745_v30 }
 0x7b3   : > { %v6875_v3 = vpop.f32.mrb[20].mxu0 }
 0x7b4   : > { %v6876_v60 = vpop.f32.mrb[21].mxu0 }
 0x7b5   : > { %v6877_v47 = vadd.f32 %v6876_v60, %v6875_v3 }
 0x7b7   : > { %5822 = vst [vmem:[%s410_s15] sm:$0xff] %v6877_v47  ;;  %v6878_v14 = vpop.f32.mrb[22].mxu0 }
 0x7b8   : > { %v6879_v51 = vpop.f32.mrb[23].mxu0 }
 0x7b9   : > { %v6880_v17 = vadd.f32 %v6879_v51, %v6878_v14 }
 0x7bb   : > { %5823 = vst [vmem:[%s410_s15 + $0x8] sm:$0xff] %v6880_v17 }
 0x7bc   : > { %7561 = shalt.err (!%p7558_p11)
}
 0x7bd   : > { %s7562_s17 = scalar_lea.hbm %s11734_s24, 256  ;;  %s7566_s16 = scalar_lea.hbm %s11788_s11, 512 }
 0x7be   : > { %p7563_p13 = scmp.ne.s32.totalorder %s11734_s24, %s7562_s17  ;;  %p7567_p6 = scmp.lt.u32.totalorder %s11734_s24, %s11788_s11 }
 0x7bf   : > { %p7568_p9 = scmp.lt.u32.totalorder %s7566_s16, %s7562_s17  ;;  %p7570_p12 = scmp.lt.u32.totalorder %s7562_s17, %s11734_s24 }
 0x7c0   : > { %p7564_p0 = pnand %p7563_p13, %p13333_p1 }
 0x7c1   : > { %p7569_p10 = por %p7568_p9, %p7567_p6 }
 0x7c2   : > { %p7565_p5 = pneg %p7564_p0 }
 0x7c3   : > { %p7571_p2 = por %p7570_p12, %p7569_p10 }
 0x7c5   : > { %p7572_p3 = pnand %p7571_p2, %p7565_p5 }
 0x7c7   : > { %7575 = shalt.err (!%p7572_p3)
}
 0x7c8   : > { %s7629_s22 = smov 128   ;;  %s7630_s19 = smov 8  }
 0x7c9   : > { %7230 = dma.vmem_to_hbm [thread:$0]  (%p13333_p1), %s11729_s29, 256, %s11734_s24, %s11736_s25, %s7629_s22, %s7629_s22, %s7630_s19  }
 0x7ca PF: > { %s13334_s26 = sld [smem:[#allocation11_spill]]  ;;  %s13335_s30 = sld [smem:[#allocation15_spill]] }
 0x7cb   : > { %p7247_p4 = scmp.ge.s32.totalorder %s7618_s20, 2 }
 0x7d0   : > { %s5853_s21 = sand.u32 1, %s13334_s26   ;;  %p13336_p7 = scmp.ne.s32.totalorder %s13335_s30, 0 }
 0x7d1   : > { %s5854_s14 = scalar_lea.sflag [#allocation4], %s5853_s21 }
 0x7d2   : > { %p7240_p8 = pnand %p7247_p4, %p13336_p7 }
 0x7d4   : > { %7601 = dma.done.wait (!%p7240_p8), %s5854_s14, 256  }
 0x7d5   : > { %7603 = vsyncadd (!%p7240_p8), %s5854_s14, 4294967040  ;;  %s13337_s20 = sld [smem:[#allocation13_spill]]  ;;  %s13338_s12 = sld [smem:[#allocation12_spill]] }
 0x7d6   : > { %s13339_s19 = sld [smem:[#allocation14_spill]]  ;;  %s13340_s17 = smov %s7610_s18 }
 0x7db   : > { %p23_p11 = scmp.ge.s32.totalorder %s13337_s20, 4   ;;  %s13341_s18 = smov %s13338_s12 }
 0x7dd   :  { %25 = sbr.rel (!%p23_p11) target bundleno = 5 (0x5), region = 114 }
 0x7e4   :  { %5859 = vsyncpa [#allocation3], 1 }
 0x7e5   :  { %5861 = vsyncpa [#allocation3 + $0x1], 1 }
 0x7e6   :  { %5862 = vsyncpa [#allocation6], 1 }
 0x7e7   :  { %5863 = vsyncpa [#allocation4], 1 }
 0x7e8   :  { %5865 = vsyncpa [#allocation4 + $0x1], 1 }

</bundles_post_ra>
